<compile_context>
chip_gen: v6e
topology: v6e:2x2x1
jax: 0.10.0
libtpu: 0.0.40
codegen_flags: <defaults>
</compile_context>

<pallas_src>
import jax
import jax.numpy as jnp
from jax.experimental import pallas as pl
from jax.experimental.pallas import tpu as pltpu


def _final_block_kernel(x_ref, w_ref, b_ref, o_ref):
    # x_ref: (TB, C, HW)       batch tile in NCHW-native layout (spatial on lanes)
    # w_ref: (C, NUM_CLASSES)  fc weight^T, pre-scaled by 1/HW (pool scale folded in)
    # b_ref: (1, NUM_CLASSES)  fc bias
    # o_ref: (TB, NUM_CLASSES)
    x = x_ref[...]
    # Global average pool: f32-accumulated sum over the spatial (lane) axis (VPU/XLU).
    pooled = jnp.sum(x.astype(jnp.float32), axis=2)                 # (TB, C) f32
    # MXU matmul: LHS cast to the weight's storage dtype (bf16 fast path if the weights
    # are bf16, no-op for f32); accumulate in f32 via preferred_element_type.
    logits = jnp.dot(pooled.astype(w_ref.dtype), w_ref[...],
                     preferred_element_type=jnp.float32)            # (TB, NUM_CLASSES)
    logits = logits + b_ref[...].astype(jnp.float32)
    o_ref[...] = logits.astype(o_ref.dtype)                         # dense lane store


def _pick_batch_tile(N, C, HW, x_itemsize, num_classes, w_itemsize, b_itemsize,
                     vmem_budget_bytes=28 * 1024 * 1024):
    """Largest batch tile whose double-buffered x block (+ resident weight/bias buffers)
    fits under a VMEM budget that is safe on v5e/v6e (128 MiB) and v7x (64 MiB)."""
    lane, sub = 128, 8
    hw_pad = -(-HW // lane) * lane            # minor dim pads to 128 lanes in VMEM
    c_pad = -(-C // sub) * sub                # second-minor pads to 8 sublanes
    nc_pad = -(-num_classes // lane) * lane
    x_row_bytes = c_pad * hw_pad * x_itemsize                 # one sample, one buffer
    # Weight/bias are double-buffered by the default pipeline even though their
    # index_map is constant (pipeline_mode=pl.Buffered(1) could halve this; not needed
    # at these sizes and the default is known-good).
    fixed = 2 * c_pad * nc_pad * w_itemsize + 2 * sub * nc_pad * b_itemsize
    avail = max(vmem_budget_bytes - fixed, 2 * x_row_bytes)
    tb = max(1, avail // (2 * x_row_bytes))                    # x is double-buffered
    tb = int(min(tb, 128, N))
    if tb < N:
        # When actually tiling the batch axis, keep the tile sublane-aligned so the
        # (TB, num_classes) output block satisfies the (8, 128) constraint.
        tb = max(8, (tb // 8) * 8)
    return tb


def final_block_forward(x_nchw, fc_weight, fc_bias):
    """Fused AdaptiveAvgPool2d((1,1)) + flatten + dropout(eval) + Linear.

    x_nchw:    (N, C, H, W)
    fc_weight: (num_classes, C)
    fc_bias:   (num_classes,)
    """
    N, C, H, W = x_nchw.shape
    num_classes = fc_weight.shape[0]
    HW = H * W

    # NCHW consumed directly: (N, C, H, W) -> (N, C, HW) is a free reshape; no extra
    # HBM transpose pass over the activation.
    x = x_nchw.reshape(N, C, HW)
    # Fold the 1/HW average-pool scale into the transposed weight at trace time.
    # Scale in f32 to avoid an extra bf16 rounding step when the weights are bf16.
    w_t = (fc_weight.astype(jnp.float32).T * (1.0 / HW)).astype(fc_weight.dtype)
    b = fc_bias.reshape(1, num_classes)

    tb = _pick_batch_tile(N, C, HW, x.dtype.itemsize, num_classes,
                          w_t.dtype.itemsize, b.dtype.itemsize)
    grid = (pl.cdiv(N, tb),)

    out_nbytes = N * num_classes * x_nchw.dtype.itemsize
    bytes_accessed = (N * C * HW * x.dtype.itemsize
                      + C * num_classes * w_t.dtype.itemsize
                      + num_classes * b.dtype.itemsize
                      + out_nbytes)
    cost = pl.CostEstimate(
        flops=2 * N * C * num_classes + N * C * HW,
        transcendentals=0,
        bytes_accessed=bytes_accessed,
    )

    out = pl.pallas_call(
        _final_block_kernel,
        out_shape=jax.ShapeDtypeStruct((N, num_classes), x_nchw.dtype),
        grid_spec=pltpu.PrefetchScalarGridSpec(
            num_scalar_prefetch=0,
            grid=grid,
            in_specs=[
                pl.BlockSpec((tb, C, HW), lambda n: (n, 0, 0)),
                # Constant index_map: weight/bias fetched once, stay resident across steps.
                pl.BlockSpec((C, num_classes), lambda n: (0, 0)),
                pl.BlockSpec((1, num_classes), lambda n: (0, 0)),
            ],
            out_specs=pl.BlockSpec((tb, num_classes), lambda n: (n, 0)),
        ),
        compiler_params=pltpu.CompilerParams(
            dimension_semantics=("parallel",),   # batch axis -> both v7x TensorCores
            vmem_limit_bytes=48 * 1024 * 1024,
        ),
        cost_estimate=cost,
    )(x, w_t, b)
    return out


if __name__ == "__main__":
    # C is fixed at 1536 by nn.Linear(1536, num_classes); small N/H/W/num_classes.
    N, C, H, W = 2, 1536, 4, 4
    NUM_CLASSES = 256

    key = jax.random.PRNGKey(0)
    kx, kw, kb = jax.random.split(key, 3)

    x = jax.random.normal(kx, (N, C, H, W), dtype=jnp.float32)
    bound = 1.0 / (C ** 0.5)
    fc_weight = jax.random.uniform(kw, (NUM_CLASSES, C), jnp.float32, -bound, bound)
    fc_bias = jax.random.uniform(kb, (NUM_CLASSES,), jnp.float32, -bound, bound)

    out = final_block_forward(x, fc_weight, fc_bias)
    out = jax.block_until_ready(out)

    # Pure-JAX reference (eval-mode: dropout is identity).
    pooled_ref = jnp.mean(x, axis=(2, 3))                    # (N, C)
    ref = pooled_ref @ fc_weight.T + fc_bias                 # (N, NUM_CLASSES)
    assert out.shape == (N, NUM_CLASSES)
    assert jnp.allclose(out, ref, atol=1e-4, rtol=1e-4), "mismatch vs reference"

    print("KERNEL_OK")
</pallas_src>

<mosaic_0001>
module attributes {stable_mosaic.version = 11 : i64} {
  func.func @_final_block_kernel(%arg0: i32, %arg1: memref<2x1536x16xf32, #tpu.memory_space<vmem>>, %arg2: memref<1536x256xf32, #tpu.memory_space<vmem>>, %arg3: memref<1x256xf32, #tpu.memory_space<vmem>>, %arg4: memref<2x256xf32, #tpu.memory_space<vmem>>) attributes {dimension_semantics = [#tpu.dimension_semantics<parallel>], iteration_bounds = array<i64: 1>, scalar_prefetch = 0 : i64, scratch_operands = 0 : i64, tpu.core_type = #tpu.core_type<tc>, window_params = [{transform_indices = @transform_0, window_bounds = array<i64: 2, 1536, 16>}, {pipeline_mode = #tpu.pipeline_mode<synchronous>, transform_indices = @transform_1, window_bounds = array<i64: 1536, 256>}, {pipeline_mode = #tpu.pipeline_mode<synchronous>, transform_indices = @transform_2, window_bounds = array<i64: 1, 256>}, {transform_indices = @transform_3, window_bounds = array<i64: 2, 256>}]} {
    %c0 = arith.constant 0 : index
    %c0_0 = arith.constant 0 : index
    %c0_1 = arith.constant 0 : index
    %0 = vector.load %arg1[%c0, %c0_0, %c0_1] : memref<2x1536x16xf32, #tpu.memory_space<vmem>>, vector<2x1536x16xf32>
    %cst = arith.constant dense<0.000000e+00> : vector<2x1536xf32>
    %1 = vector.multi_reduction <add>, %0, %cst [2] : vector<2x1536x16xf32> to vector<2x1536xf32>
    %c0_2 = arith.constant 0 : index
    %c0_3 = arith.constant 0 : index
    %2 = vector.load %arg2[%c0_2, %c0_3] : memref<1536x256xf32, #tpu.memory_space<vmem>>, vector<1536x256xf32>
    %cst_4 = arith.constant dense<0.000000e+00> : vector<2x256xf32>
    %3 = tpu.matmul %1, %2, %cst_4 {dimension_numbers = #tpu.dot_dimension_numbers<[1], [0], [0], [1], [0, 0, 1, 1], [], []>} : vector<2x1536xf32>, vector<1536x256xf32>, vector<2x256xf32> -> vector<2x256xf32>
    %c0_5 = arith.constant 0 : index
    %c0_6 = arith.constant 0 : index
    %4 = vector.load %arg3[%c0_5, %c0_6] : memref<1x256xf32, #tpu.memory_space<vmem>>, vector<1x256xf32>
    %5 = vector.broadcast %4 : vector<1x256xf32> to vector<2x256xf32>
    %6 = arith.addf %3, %5 : vector<2x256xf32>
    %c0_7 = arith.constant 0 : index
    %c0_8 = arith.constant 0 : index
    %7 = vector.load %arg4[%c0_7, %c0_8] : memref<2x256xf32, #tpu.memory_space<vmem>>, vector<2x256xf32>
    tpu.vector_store %arg4[%c0_7, %c0_8], %6 {strides = array<i32>} : memref<2x256xf32, #tpu.memory_space<vmem>>, vector<2x256xf32>,
    return
  }
  func.func @transform_0(%arg0: i32) -> (i32, i32, i32) {
    %c0_i32 = arith.constant 0 : i32
    %c0_i32_0 = arith.constant 0 : i32
    %c0_i32_1 = arith.constant 0 : i32
    return %arg0, %c0_i32, %c0_i32_0 : i32, i32, i32
  }
  func.func @transform_1(%arg0: i32) -> (i32, i32) {
    %c0_i32 = arith.constant 0 : i32
    %c0_i32_0 = arith.constant 0 : i32
    %c0_i32_1 = arith.constant 0 : i32
    return %c0_i32, %c0_i32_0 : i32, i32
  }
  func.func @transform_2(%arg0: i32) -> (i32, i32) {
    %c0_i32 = arith.constant 0 : i32
    %c0_i32_0 = arith.constant 0 : i32
    %c0_i32_1 = arith.constant 0 : i32
    return %c0_i32, %c0_i32_0 : i32, i32
  }
  func.func @transform_3(%arg0: i32) -> (i32, i32) {
    %c0_i32 = arith.constant 0 : i32
    %c0_i32_0 = arith.constant 0 : i32
    return %arg0, %c0_i32 : i32, i32
  }
}

</mosaic_0001>

<bundles_post_ra>
// kernel: tpu_custom_call.1
= control target key start
LH: loop header
LB: loop body
LE: loop exit
PB: predicated region body
PF: predicated region fallthrough
CT: control target
= control target key end

     0   :  { %vm399_vm0 = vcmask 130048   ;;  %s8644_s0 = inlined_call_operand.vmem [shape: f32[2,1536,16], index: 0, kind: input, shape index: {}]   ;;  %s8645_s1 = inlined_call_operand.vmem [shape: f32[1536,256], index: 1, kind: input, shape index: {}]   ;;  %s8646_s2 = inlined_call_operand.vmem [shape: f32[1,256], index: 2, kind: input, shape index: {}]   ;;  %s8647_s3 = inlined_call_operand.hbm [shape: f32[2,256], index: 3, kind: output, shape index: {}]  }
   0x1   :  { %v17_v0 = vld [vmem:[%s8644_s0 + $0x10] sm:$0xff]  ;;  %v15_v1 = vld [vmem:[%s8644_s0] sm:$0xff]  ;;  %v18_v2 = vld [vmem:[%s8644_s0 + $0x18] sm:$0xff] }
   0x2   :  { %v406_v3 = vsel %vm399_vm0, %v17_v0, 0.0  ;;  %v400_v4 = vsel %vm399_vm0, %v15_v1, 0.0  ;;  %v16_v5 = vld [vmem:[%s8644_s0 + $0x8] sm:$0xff]  ;;  %v409_v6 = vsel %vm399_vm0, %v18_v2, 0.0  ;;  %v19_v9 = vld [vmem:[%s8644_s0 + $0x20] sm:$0xff]  ;;  %v22_v12 = vld [vmem:[%s8644_s0 + $0x38] sm:$0xff] }
   0x3   :  { %407 = vadd.xlane.f32.xlu1 %v406_v3  ;;  %401 = vadd.xlane.f32.xlu0 %v400_v4  ;;  %v403_v7 = vsel %vm399_vm0, %v16_v5, 0.0  ;;  %v20_v8 = vld [vmem:[%s8644_s0 + $0x28] sm:$0xff]  ;;  %v412_v11 = vsel %vm399_vm0, %v19_v9, 0.0  ;;  %v21_v13 = vld [vmem:[%s8644_s0 + $0x30] sm:$0xff]  ;;  %v421_v14 = vsel %vm399_vm0, %v22_v12, 0.0  ;;  %v23_v17 = vld [vmem:[%s8644_s0 + $0x40] sm:$0xff] }
   0x4   :  { %v415_v10 = vsel %vm399_vm0, %v20_v8, 0.0  ;;  %v418_v15 = vsel %vm399_vm0, %v21_v13, 0.0  ;;  %v24_v16 = vld [vmem:[%s8644_s0 + $0x48] sm:$0xff]  ;;  %v424_v19 = vsel %vm399_vm0, %v23_v17, 0.0  ;;  %v26_v20 = vld [vmem:[%s8644_s0 + $0x58] sm:$0xff]  ;;  %v25_v21 = vld [vmem:[%s8644_s0 + $0x50] sm:$0xff] }
   0x5   :  { %v427_v18 = vsel %vm399_vm0, %v24_v16, 0.0  ;;  %v433_v22 = vsel %vm399_vm0, %v26_v20, 0.0  ;;  %v430_v23 = vsel %vm399_vm0, %v25_v21, 0.0  ;;  %v28_v24 = vld [vmem:[%s8644_s0 + $0x68] sm:$0xff]  ;;  %v27_v25 = vld [vmem:[%s8644_s0 + $0x60] sm:$0xff]  ;;  %v30_v28 = vld [vmem:[%s8644_s0 + $0x78] sm:$0xff] }
   0x6   :  { %v439_v26 = vsel %vm399_vm0, %v28_v24, 0.0  ;;  %v436_v27 = vsel %vm399_vm0, %v27_v25, 0.0  ;;  %v29_v29 = vld [vmem:[%s8644_s0 + $0x70] sm:$0xff]  ;;  %v445_v30 = vsel %vm399_vm0, %v30_v28, 0.0 }
   0x7   :  { %410 = vadd.xlane.f32.xlu1 %v409_v6  ;;  %404 = vadd.xlane.f32.xlu0 %v403_v7  ;;  %v442_v31 = vsel %vm399_vm0, %v29_v29, 0.0 }
   0xb   :  { %416 = vadd.xlane.f32.xlu1 %v415_v10  ;;  %413 = vadd.xlane.f32.xlu0 %v412_v11 }
   0xf   :  { %422 = vadd.xlane.f32.xlu1 %v421_v14  ;;  %419 = vadd.xlane.f32.xlu0 %v418_v15 }
  0x13   :  { %428 = vadd.xlane.f32.xlu1 %v427_v18  ;;  %425 = vadd.xlane.f32.xlu0 %v424_v19 }
  0x17   :  { %434 = vadd.xlane.f32.xlu1 %v433_v22  ;;  %431 = vadd.xlane.f32.xlu0 %v430_v23 }
  0x1b   :  { %440 = vadd.xlane.f32.xlu1 %v439_v26  ;;  %437 = vadd.xlane.f32.xlu0 %v436_v27 }
  0x1c   :  { %8 = vsyncpa [#allocation3], 0  ;;  %v32_v32 = vld [vmem:[%s8644_s0 + $0x88] sm:$0xff]  ;;  %v31_v33 = vld [vmem:[%s8644_s0 + $0x80] sm:$0xff]  ;;  %vm2343_vm1 = vcmask 130112   ;;  %vm2350_vm2 = vcmask 195712  }
  0x1d   :  { %v451_v34 = vsel %vm399_vm0, %v32_v32, 0.0  ;;  %v448_v35 = vsel %vm399_vm0, %v31_v33, 0.0  ;;  %v34_v36 = vld [vmem:[%s8644_s0 + $0x98] sm:$0xff]  ;;  %v33_v37 = vld [vmem:[%s8644_s0 + $0x90] sm:$0xff]  ;;  %v36_v40 = vld [vmem:[%s8644_s0 + $0xa8] sm:$0xff]  ;;  %vm2357_vm3 = vcmask 261312  }
  0x1e   :  { %v457_v38 = vsel %vm399_vm0, %v34_v36, 0.0  ;;  %v454_v39 = vsel %vm399_vm0, %v33_v37, 0.0  ;;  %v35_v41 = vld [vmem:[%s8644_s0 + $0xa0] sm:$0xff]  ;;  %v463_v42 = vsel %vm399_vm0, %v36_v40, 0.0  ;;  %v38_v44 = vld [vmem:[%s8644_s0 + $0xb8] sm:$0xff]  ;;  %v37_v45 = vld [vmem:[%s8644_s0 + $0xb0] sm:$0xff] }
  0x1f   :  { %446 = vadd.xlane.f32.xlu1 %v445_v30  ;;  %443 = vadd.xlane.f32.xlu0 %v442_v31  ;;  %v460_v43 = vsel %vm399_vm0, %v35_v41, 0.0  ;;  %v469_v46 = vsel %vm399_vm0, %v38_v44, 0.0  ;;  %v466_v47 = vsel %vm399_vm0, %v37_v45, 0.0  ;;  %v40_v48 = vld [vmem:[%s8644_s0 + $0xc8] sm:$0xff]  ;;  %v39_v49 = vld [vmem:[%s8644_s0 + $0xc0] sm:$0xff]  ;;  %v42_v52 = vld [vmem:[%s8644_s0 + $0xd8] sm:$0xff] }
  0x20   :  { %v475_v50 = vsel %vm399_vm0, %v40_v48, 0.0  ;;  %v472_v51 = vsel %vm399_vm0, %v39_v49, 0.0  ;;  %v41_v53 = vld [vmem:[%s8644_s0 + $0xd0] sm:$0xff]  ;;  %v481_v54 = vsel %vm399_vm0, %v42_v52, 0.0  ;;  %v44_v56 = vld [vmem:[%s8644_s0 + $0xe8] sm:$0xff]  ;;  %v43_v57 = vld [vmem:[%s8644_s0 + $0xe0] sm:$0xff] }
  0x21   :  { %v478_v55 = vsel %vm399_vm0, %v41_v53, 0.0  ;;  %v487_v58 = vsel %vm399_vm0, %v44_v56, 0.0  ;;  %v484_v59 = vsel %vm399_vm0, %v43_v57, 0.0  ;;  %v46_v60 = vld [vmem:[%s8644_s0 + $0xf8] sm:$0xff]  ;;  %v45_v61 = vld [vmem:[%s8644_s0 + $0xf0] sm:$0xff]  ;;  %v48_v0 = vld [vmem:[%s8644_s0 + $0x108] sm:$0xff] }
  0x22   :  { %v493_v62 = vsel %vm399_vm0, %v46_v60, 0.0  ;;  %v490_v63 = vsel %vm399_vm0, %v45_v61, 0.0  ;;  %v47_v1 = vld [vmem:[%s8644_s0 + $0x100] sm:$0xff]  ;;  %v499_v2 = vsel %vm399_vm0, %v48_v0, 0.0  ;;  %v50_v4 = vld [vmem:[%s8644_s0 + $0x118] sm:$0xff]  ;;  %v49_v5 = vld [vmem:[%s8644_s0 + $0x110] sm:$0xff] }
  0x23   :  { %452 = vadd.xlane.f32.xlu1 %v451_v34  ;;  %449 = vadd.xlane.f32.xlu0 %v448_v35  ;;  %v496_v3 = vsel %vm399_vm0, %v47_v1, 0.0  ;;  %v505_v6 = vsel %vm399_vm0, %v50_v4, 0.0  ;;  %v502_v7 = vsel %vm399_vm0, %v49_v5, 0.0  ;;  %v52_v8 = vld [vmem:[%s8644_s0 + $0x128] sm:$0xff]  ;;  %v51_v9 = vld [vmem:[%s8644_s0 + $0x120] sm:$0xff]  ;;  %v54_v12 = vld [vmem:[%s8644_s0 + $0x138] sm:$0xff] }
  0x24   :  { %v511_v10 = vsel %vm399_vm0, %v52_v8, 0.0  ;;  %v508_v11 = vsel %vm399_vm0, %v51_v9, 0.0  ;;  %v53_v13 = vld [vmem:[%s8644_s0 + $0x130] sm:$0xff]  ;;  %v517_v14 = vsel %vm399_vm0, %v54_v12, 0.0  ;;  %v56_v16 = vld [vmem:[%s8644_s0 + $0x148] sm:$0xff]  ;;  %v55_v17 = vld [vmem:[%s8644_s0 + $0x140] sm:$0xff] }
  0x25   :  { %v514_v15 = vsel %vm399_vm0, %v53_v13, 0.0  ;;  %v523_v18 = vsel %vm399_vm0, %v56_v16, 0.0  ;;  %v520_v19 = vsel %vm399_vm0, %v55_v17, 0.0  ;;  %v58_v20 = vld [vmem:[%s8644_s0 + $0x158] sm:$0xff]  ;;  %v57_v21 = vld [vmem:[%s8644_s0 + $0x150] sm:$0xff]  ;;  %v60_v24 = vld [vmem:[%s8644_s0 + $0x168] sm:$0xff] }
  0x26   :  { %v529_v22 = vsel %vm399_vm0, %v58_v20, 0.0  ;;  %v526_v23 = vsel %vm399_vm0, %v57_v21, 0.0  ;;  %v59_v25 = vld [vmem:[%s8644_s0 + $0x160] sm:$0xff]  ;;  %v535_v26 = vsel %vm399_vm0, %v60_v24, 0.0  ;;  %v62_v28 = vld [vmem:[%s8644_s0 + $0x178] sm:$0xff]  ;;  %v61_v29 = vld [vmem:[%s8644_s0 + $0x170] sm:$0xff] }
  0x27   :  { %458 = vadd.xlane.f32.xlu1 %v457_v38  ;;  %455 = vadd.xlane.f32.xlu0 %v454_v39  ;;  %v532_v27 = vsel %vm399_vm0, %v59_v25, 0.0  ;;  %v541_v30 = vsel %vm399_vm0, %v62_v28, 0.0  ;;  %v538_v31 = vsel %vm399_vm0, %v61_v29, 0.0  ;;  %v64_v32 = vld [vmem:[%s8644_s0 + $0x188] sm:$0xff]  ;;  %v63_v33 = vld [vmem:[%s8644_s0 + $0x180] sm:$0xff]  ;;  %v66_v36 = vld [vmem:[%s8644_s0 + $0x198] sm:$0xff] }
  0x28   :  { %v547_v34 = vsel %vm399_vm0, %v64_v32, 0.0  ;;  %v544_v35 = vsel %vm399_vm0, %v63_v33, 0.0  ;;  %v65_v37 = vld [vmem:[%s8644_s0 + $0x190] sm:$0xff]  ;;  %v553_v38 = vsel %vm399_vm0, %v66_v36, 0.0  ;;  %v68_v40 = vld [vmem:[%s8644_s0 + $0x1a8] sm:$0xff]  ;;  %v67_v41 = vld [vmem:[%s8644_s0 + $0x1a0] sm:$0xff] }
  0x29   :  { %v550_v39 = vsel %vm399_vm0, %v65_v37, 0.0  ;;  %v70_v44 = vld [vmem:[%s8644_s0 + $0x1b8] sm:$0xff]  ;;  %v69_v45 = vld [vmem:[%s8644_s0 + $0x1b0] sm:$0xff]  ;;  %v72_v48 = vld [vmem:[%s8644_s0 + $0x1c8] sm:$0xff]  ;;  %vm8660_vm4 = vcmask 326912   ;;  %vm2371_vm5 = vcmask 392512  }
  0x2a   :  { %v71_v49 = vld [vmem:[%s8644_s0 + $0x1c0] sm:$0xff]  ;;  %v74_v52 = vld [vmem:[%s8644_s0 + $0x1d8] sm:$0xff]  ;;  %v73_v53 = vld [vmem:[%s8644_s0 + $0x1d0] sm:$0xff]  ;;  %vm2378_vm6 = vcmask 458112   ;;  %vm2385_vm7 = vcmask 523712   ;;  %vm2392_vm8 = vcmask 589312  }
  0x2b   :  { %464 = vadd.xlane.f32.xlu1 %v463_v42  ;;  %461 = vadd.xlane.f32.xlu0 %v460_v43  ;;  %v559_v42 = vsel %vm399_vm0, %v68_v40, 0.0  ;;  %v556_v43 = vsel %vm399_vm0, %v67_v41, 0.0  ;;  %v76_v56 = vld [vmem:[%s8644_s0 + $0x1e8] sm:$0xff]  ;;  %v75_v57 = vld [vmem:[%s8644_s0 + $0x1e0] sm:$0xff]  ;;  %v78_v60 = vld [vmem:[%s8644_s0 + $0x1f8] sm:$0xff]  ;;  %vm2399_vm9 = vcmask 654912  }
  0x2c   :  { %v77_v61 = vld [vmem:[%s8644_s0 + $0x1f0] sm:$0xff]  ;;  %v80_v0 = vld [vmem:[%s8644_s0 + $0x208] sm:$0xff]  ;;  %v79_v1 = vld [vmem:[%s8644_s0 + $0x200] sm:$0xff]  ;;  %vm2406_vm10 = vcmask 720512   ;;  %vm2413_vm11 = vcmask 786112   ;;  %vm2420_vm12 = vcmask 851712  }
  0x2d   :  { %v82_v4 = vld [vmem:[%s8644_s0 + $0x218] sm:$0xff]  ;;  %v81_v5 = vld [vmem:[%s8644_s0 + $0x210] sm:$0xff]  ;;  %v84_v9 = vld [vmem:[%s8644_s0 + $0x228] sm:$0xff]  ;;  %vm2427_vm13 = vcmask 917312   ;;  %vm2434_vm14 = vcmask 982912   ;;  %vm2441_vm15 = vcmask 1048512  }
  0x2e   :  { %v598_v8 = vsel %vm399_vm0, %v81_v5, 0.0  ;;  %v607_v12 = vsel %vm399_vm0, %v84_v9, 0.0  ;;  %v85_v16 = vld [vmem:[%s8644_s0 + $0x230] sm:$0xff]  ;;  %v90_v32 = vld [vmem:[%s8644_s0 + $0x258] sm:$0xff] }
  0x2f   :  { %470 = vadd.xlane.f32.xlu1 %v469_v46  ;;  %467 = vadd.xlane.f32.xlu0 %v466_v47  ;;  %v565_v46 = vsel %vm399_vm0, %v70_v44, 0.0  ;;  %v562_v47 = vsel %vm399_vm0, %v69_v45, 0.0  ;;  %v89_v37 = vld [vmem:[%s8644_s0 + $0x250] sm:$0xff]  ;;  %v625_v45 = vsel %vm399_vm0, %v90_v32, 0.0 }
  0x30   :  { %v93_v5 = vld [vmem:[%s8644_s0 + $0x270] sm:$0xff] }
  0x33   :  { %476 = vadd.xlane.f32.xlu1 %v475_v50  ;;  %473 = vadd.xlane.f32.xlu0 %v472_v51  ;;  %v571_v50 = vsel %vm399_vm0, %v72_v48, 0.0  ;;  %v568_v51 = vsel %vm399_vm0, %v71_v49, 0.0  ;;  %v622_v48 = vsel %vm399_vm0, %v89_v37, 0.0 }
  0x37   :  { %482 = vadd.xlane.f32.xlu1 %v481_v54  ;;  %479 = vadd.xlane.f32.xlu0 %v478_v55  ;;  %v577_v54 = vsel %vm399_vm0, %v74_v52, 0.0  ;;  %v574_v55 = vsel %vm399_vm0, %v73_v53, 0.0 }
  0x3b   :  { %488 = vadd.xlane.f32.xlu1 %v487_v58  ;;  %485 = vadd.xlane.f32.xlu0 %v484_v59  ;;  %v583_v58 = vsel %vm399_vm0, %v76_v56, 0.0  ;;  %v580_v59 = vsel %vm399_vm0, %v75_v57, 0.0 }
  0x3f   :  { %494 = vadd.xlane.f32.xlu1 %v493_v62  ;;  %491 = vadd.xlane.f32.xlu0 %v490_v63  ;;  %v589_v62 = vsel %vm399_vm0, %v78_v60, 0.0  ;;  %v586_v63 = vsel %vm399_vm0, %v77_v61, 0.0 }
  0x43   :  { %500 = vadd.xlane.f32.xlu1 %v499_v2  ;;  %497 = vadd.xlane.f32.xlu0 %v496_v3  ;;  %v595_v2 = vsel %vm399_vm0, %v80_v0, 0.0  ;;  %v592_v3 = vsel %vm399_vm0, %v79_v1, 0.0 }
  0x47   :  { %506 = vadd.xlane.f32.xlu1 %v505_v6  ;;  %503 = vadd.xlane.f32.xlu0 %v502_v7  ;;  %v1938_v6 = vlaneseq  ;;  %v601_v7 = vsel %vm399_vm0, %v82_v4, 0.0  ;;  %v94_v4 = vld [vmem:[%s8644_s0 + $0x278] sm:$0xff] }
  0x4b   :  { %512 = vadd.xlane.f32.xlu1 %v511_v10  ;;  %509 = vadd.xlane.f32.xlu0 %v508_v11  ;;  %v83_v10 = vld [vmem:[%s8644_s0 + $0x220] sm:$0xff]  ;;  %v5060_v11 = vand.u32 127, %v1938_v6 }
  0x4c   :  { %v604_v13 = vsel %vm399_vm0, %v83_v10, 0.0 }
  0x4d   :  { %v2338_v17 = vadd.s32 4294967288, %v5060_v11  ;;  %v2366_v28 = vadd.s32 4294967256, %v5060_v11  ;;  %v2359_v29 = vadd.s32 4294967264, %v5060_v11  ;;  %v2394_v56 = vadd.s32 4294967224, %v5060_v11 }
  0x4e   :  { %v2387_v60 = vadd.s32 4294967232, %v5060_v11  ;;  %v2401_v10 = vadd.s32 4294967216, %v5060_v11 }
  0x4f   :  { %518 = vadd.xlane.f32.xlu1 %v517_v14  ;;  %515 = vadd.xlane.f32.xlu0 %v514_v15  ;;  %v5064_v14 = vshrl.u32 %v1938_v6, 7  ;;  %v86_v15 = vld [vmem:[%s8644_s0 + $0x238] sm:$0xff]  ;;  %v2408_v6 = vadd.s32 4294967208, %v5060_v11 }
  0x51   :  { %8664 = vst [vmem:[#allocation5_spill] sm:$0xff] %v5064_v14  ;;  %v5079_v24 = vsub.s32 %v5060_v11, %v5064_v14  ;;  %v5082_v25 = vsub.s32 %v2338_v17, %v5064_v14  ;;  %v5156_v9 = vsub.s32 %v2387_v60, %v5064_v14 }
  0x53   :  { %524 = vadd.xlane.f32.xlu1 %v523_v18  ;;  %521 = vadd.xlane.f32.xlu0 %v520_v19  ;;  %v2345_v18 = vadd.s32 4294967280, %v5060_v11  ;;  %v2352_v19 = vadd.s32 4294967272, %v5060_v11  ;;  %8665 = vst [vmem:[#allocation6_spill] sm:$0xff] %v5079_v24  ;;  %8666 = vst [vmem:[#allocation7_spill] sm:$0xff] %v5082_v25 }
  0x57   :  { %530 = vadd.xlane.f32.xlu1 %v529_v22  ;;  %527 = vadd.xlane.f32.xlu0 %v526_v23  ;;  %v613_v22 = vsel %vm399_vm0, %v86_v15, 0.0  ;;  %v610_v23 = vsel %vm399_vm0, %v85_v16, 0.0  ;;  %v634_v15 = vsel %vm399_vm0, %v93_v5, 0.0  ;;  %v102_v5 = vld [vmem:[%s8644_s0 + $0x2b8] sm:$0xff] }
  0x5b   :  { %536 = vadd.xlane.f32.xlu1 %v535_v26  ;;  %533 = vadd.xlane.f32.xlu0 %v532_v27  ;;  %v88_v26 = vld [vmem:[%s8644_s0 + $0x248] sm:$0xff]  ;;  %v87_v27 = vld [vmem:[%s8644_s0 + $0x240] sm:$0xff] }
  0x5c   :  { %v616_v36 = vsel %vm399_vm0, %v87_v27, 0.0  ;;  %v5176_v27 = vsub.s32 %v2401_v10, %v5064_v14 }
  0x5f   :  { %542 = vadd.xlane.f32.xlu1 %v541_v30  ;;  %539 = vadd.xlane.f32.xlu0 %v538_v31  ;;  %v5093_v30 = vsub.s32 %v2345_v18, %v5064_v14  ;;  %v5096_v31 = vsub.s32 %v2352_v19, %v5064_v14  ;;  %v5164_v19 = vsub.s32 %v2408_v6, %v5064_v14  ;;  %v101_v6 = vld [vmem:[%s8644_s0 + $0x2b0] sm:$0xff] }
  0x61   :  { %8667 = vst [vmem:[#allocation8_spill] sm:$0xff] %v5093_v30  ;;  %8668 = vst [vmem:[#allocation9_spill] sm:$0xff] %v5096_v31 }
  0x63   :  { %548 = vadd.xlane.f32.xlu1 %v547_v34  ;;  %545 = vadd.xlane.f32.xlu0 %v544_v35  ;;  %v619_v35 = vsel %vm399_vm0, %v88_v26, 0.0 }
  0x67   :  { %554 = vadd.xlane.f32.xlu1 %v553_v38  ;;  %551 = vadd.xlane.f32.xlu0 %v550_v39  ;;  %v2380_v38 = vadd.s32 4294967240, %v5060_v11  ;;  %v2373_v39 = vadd.s32 4294967248, %v5060_v11 }
  0x69   :  { %v5123_v52 = vsub.s32 %v2380_v38, %v5064_v14  ;;  %v5126_v53 = vsub.s32 %v2373_v39, %v5064_v14  ;;  %v2436_v38 = vadd.s32 4294967176, %v5060_v11 }
  0x6b   :  { %560 = vadd.xlane.f32.xlu1 %v559_v42  ;;  %557 = vadd.xlane.f32.xlu0 %v556_v43  ;;  %v5111_v42 = vsub.s32 %v2366_v28, %v5064_v14  ;;  %v5114_v43 = vsub.s32 %v2359_v29, %v5064_v14  ;;  %v2415_v28 = vadd.s32 4294967200, %v5060_v11 }
  0x6d   :  { %8669 = vst [vmem:[#allocation10_spill] sm:$0xff] %v5114_v43 }
  0x6f   :  { %566 = vadd.xlane.f32.xlu1 %v565_v46  ;;  %563 = vadd.xlane.f32.xlu0 %v562_v47 }
  0x73   :  { %572 = vadd.xlane.f32.xlu1 %v571_v50  ;;  %569 = vadd.xlane.f32.xlu0 %v568_v51 }
  0x77   :  { %578 = vadd.xlane.f32.xlu1 %v577_v54  ;;  %575 = vadd.xlane.f32.xlu0 %v574_v55  ;;  %v92_v54 = vld [vmem:[%s8644_s0 + $0x268] sm:$0xff]  ;;  %v91_v55 = vld [vmem:[%s8644_s0 + $0x260] sm:$0xff] }
  0x7b   :  { %584 = vadd.xlane.f32.xlu1 %v583_v58  ;;  %581 = vadd.xlane.f32.xlu0 %v580_v59 }
  0x7f   :  { %590 = vadd.xlane.f32.xlu1 %v589_v62  ;;  %587 = vadd.xlane.f32.xlu0 %v586_v63  ;;  %v631_v62 = vsel %vm399_vm0, %v92_v54, 0.0  ;;  %v628_v63 = vsel %vm399_vm0, %v91_v55, 0.0  ;;  %v5204_v55 = vsub.s32 %v2436_v38, %v5064_v14 }
  0x83   :  { %596 = vadd.xlane.f32.xlu1 %v595_v2  ;;  %593 = vadd.xlane.f32.xlu0 %v592_v3  ;;  %v5144_v3 = vsub.s32 %v2394_v56, %v5064_v14 }
  0x87   :  { %602 = vadd.xlane.f32.xlu1 %v601_v7  ;;  %599 = vadd.xlane.f32.xlu0 %v598_v8 }
  0x8b   :  { %608 = vadd.xlane.f32.xlu1 %v607_v12  ;;  %605 = vadd.xlane.f32.xlu0 %v604_v13  ;;  %v637_v13 = vsel %vm399_vm0, %v94_v4, 0.0 }
  0x8c   :  { %v408_v20 = vpop.xlane.xlu1 %407  ;;  %v402_v21 = vpop.xlane.xlu0 %401 }
  0x8d   :  { %v2337_v40 = vrot.slane %v402_v21, %v5079_v24  ;;  %v2349_v44 = vrot.slane %v408_v20, %v5093_v30  ;;  %v96_v20 = vld [vmem:[%s8644_s0 + $0x288] sm:$0xff]  ;;  %v95_v21 = vld [vmem:[%s8644_s0 + $0x280] sm:$0xff] }
  0x8e   :  { %v643_v32 = vsel %vm399_vm0, %v96_v20, 0.0  ;;  %v103_v20 = vld [vmem:[%s8644_s0 + $0x2c0] sm:$0xff] }
  0x8f   :  { %614 = vadd.xlane.f32.xlu1 %v613_v22  ;;  %611 = vadd.xlane.f32.xlu0 %v610_v23  ;;  %v2422_v22 = vadd.s32 4294967192, %v5060_v11 }
  0x90   :  { %v411_v33 = vpop.xlane.xlu1 %410  ;;  %v405_v34 = vpop.xlane.xlu0 %404 }
  0x91   :  { %v2342_v41 = vrot.slane %v405_v34, %v5082_v25  ;;  %v2356_v46 = vrot.slane %v411_v33, %v5096_v31  ;;  %v640_v33 = vsel %vm399_vm0, %v95_v21, 0.0  ;;  %v5184_v37 = vsub.s32 %v2422_v22, %v5064_v14 }
  0x93   :  { %v2344_v47 = vsel %vm2343_vm1, %v2342_v41, %v2337_v40  ;;  %620 = vadd.xlane.f32.xlu1 %v619_v35  ;;  %617 = vadd.xlane.f32.xlu0 %v616_v36  ;;  %v5190_v41 = vsub.s32 %v2415_v28, %v5064_v14  ;;  %v664_v28 = vsel %vm399_vm0, %v103_v20, 0.0 }
  0x94   :  { %v2351_v49 = vsel %vm2350_vm2, %v2349_v44, %v2344_v47  ;;  %v417_v50 = vpop.xlane.xlu1 %416  ;;  %v414_v51 = vpop.xlane.xlu0 %413  ;;  %v98_v44 = vld [vmem:[%s8644_s0 + $0x298] sm:$0xff] }
  0x95   :  { %v2370_v57 = vrot.slane %v417_v50, %v5111_v42  ;;  %v2358_v58 = vsel %vm2357_vm3, %v2356_v46, %v2351_v49  ;;  %v2363_v59 = vrot.slane %v414_v51, %v5114_v43  ;;  %v2429_v46 = vadd.s32 4294967184, %v5060_v11 }
  0x96   :  { %v649_v51 = vsel %vm399_vm0, %v98_v44, 0.0 }
  0x97   :  { %v2365_v61 = vsel %vm8660_vm4, %v2363_v59, %v2358_v58  ;;  %626 = vadd.xlane.f32.xlu1 %v625_v45  ;;  %623 = vadd.xlane.f32.xlu0 %v622_v48  ;;  %v97_v45 = vld [vmem:[%s8644_s0 + $0x290] sm:$0xff]  ;;  %v100_v58 = vld [vmem:[%s8644_s0 + $0x2a8] sm:$0xff]  ;;  %v99_v59 = vld [vmem:[%s8644_s0 + $0x2a0] sm:$0xff] }
  0x98   :  { %v423_v0 = vpop.xlane.xlu1 %422  ;;  %v2372_v1 = vsel %vm2371_vm5, %v2370_v57, %v2365_v61  ;;  %v420_v2 = vpop.xlane.xlu0 %419  ;;  %v646_v54 = vsel %vm399_vm0, %v97_v45, 0.0  ;;  %v5209_v57 = vsub.s32 %v2429_v46, %v5064_v14  ;;  %v331_v14 = vld [vmem:[%s8644_s0 + $0x9e0] sm:$0xff] }
  0x99   :  { %v2384_v7 = vrot.slane %v423_v0, %v5123_v52  ;;  %v2377_v8 = vrot.slane %v420_v2, %v5126_v53  ;;  %v652_v0 = vsel %vm399_vm0, %v99_v59, 0.0 }
  0x9b   :  { %v2379_v12 = vsel %vm2378_vm6, %v2377_v8, %v2372_v1  ;;  %632 = vadd.xlane.f32.xlu1 %v631_v62  ;;  %629 = vadd.xlane.f32.xlu0 %v628_v63  ;;  %v655_v63 = vsel %vm399_vm0, %v100_v58, 0.0 }
  0x9c   :  { %v429_v16 = vpop.xlane.xlu1 %428  ;;  %v2386_v17 = vsel %vm2385_vm7, %v2384_v7, %v2379_v12  ;;  %v426_v18 = vpop.xlane.xlu0 %425  ;;  %v661_v12 = vsel %vm399_vm0, %v102_v5, 0.0 }
  0x9d   :  { %v2398_v23 = vrot.slane %v429_v16, %v5144_v3  ;;  %v2391_v26 = vrot.slane %v426_v18, %v5156_v9  ;;  %v104_v18 = vld [vmem:[%s8644_s0 + $0x2c8] sm:$0xff] }
  0x9f   :  { %v2393_v29 = vsel %vm2392_vm8, %v2391_v26, %v2386_v17  ;;  %638 = vadd.xlane.f32.xlu1 %v637_v13  ;;  %635 = vadd.xlane.f32.xlu0 %v634_v15  ;;  %v658_v13 = vsel %vm399_vm0, %v101_v6, 0.0  ;;  %v667_v26 = vsel %vm399_vm0, %v104_v18, 0.0 }
  0xa0   :  { %v435_v34 = vpop.xlane.xlu1 %434  ;;  %v2400_v35 = vsel %vm2399_vm9, %v2398_v23, %v2393_v29  ;;  %v432_v36 = vpop.xlane.xlu0 %431 }
  0xa1   :  { %v2412_v39 = vrot.slane %v435_v34, %v5164_v19  ;;  %v2405_v40 = vrot.slane %v432_v36, %v5176_v27  ;;  %v105_v34 = vld [vmem:[%s8644_s0 + $0x2d0] sm:$0xff] }
  0xa2   :  { %v670_v44 = vsel %vm399_vm0, %v105_v34, 0.0 }
  0xa3   :  { %v2407_v47 = vsel %vm2406_vm10, %v2405_v40, %v2400_v35  ;;  %644 = vadd.xlane.f32.xlu1 %v643_v32  ;;  %641 = vadd.xlane.f32.xlu0 %v640_v33  ;;  %v106_v33 = vld [vmem:[%s8644_s0 + $0x2d8] sm:$0xff] }
  0xa4   :  { %v441_v48 = vpop.xlane.xlu1 %440  ;;  %v2414_v49 = vsel %vm2413_vm11, %v2412_v39, %v2407_v47  ;;  %v438_v50 = vpop.xlane.xlu0 %437  ;;  %v673_v40 = vsel %vm399_vm0, %v106_v33, 0.0  ;;  %v108_v47 = vld [vmem:[%s8644_s0 + $0x2e8] sm:$0xff] }
  0xa5   :  { %v2426_v56 = vrot.slane %v441_v48, %v5184_v37  ;;  %v2419_v11 = vrot.slane %v438_v50, %v5190_v41  ;;  %v107_v48 = vld [vmem:[%s8644_s0 + $0x2e0] sm:$0xff] }
  0xa7   :  { %v2421_v60 = vsel %vm2420_vm12, %v2419_v11, %v2414_v49  ;;  %650 = vadd.xlane.f32.xlu1 %v649_v51  ;;  %647 = vadd.xlane.f32.xlu0 %v646_v54  ;;  %v676_v11 = vsel %vm399_vm0, %v107_v48, 0.0 }
  0xa8   :  { %v447_v61 = vpop.xlane.xlu1 %446  ;;  %v444_v62 = vpop.xlane.xlu0 %443  ;;  %v2428_v1 = vsel %vm2427_vm13, %v2426_v56, %v2421_v60  ;;  %v679_v56 = vsel %vm399_vm0, %v108_v47, 0.0  ;;  %v110_v60 = vld [vmem:[%s8644_s0 + $0x2f8] sm:$0xff] }
  0xa9   :  { %v2440_v2 = vrot.slane %v447_v61, %v5204_v55  ;;  %v2433_v4 = vrot.slane %v444_v62, %v5209_v57  ;;  %v109_v61 = vld [vmem:[%s8644_s0 + $0x2f0] sm:$0xff] }
  0xab   :  { %656 = vadd.xlane.f32.xlu1 %v655_v63  ;;  %653 = vadd.xlane.f32.xlu0 %v652_v0  ;;  %v2435_v7 = vsel %vm2434_vm14, %v2433_v4, %v2428_v1  ;;  %v682_v4 = vsel %vm399_vm0, %v109_v61, 0.0 }
  0xac   :  { %v453_v8 = vpop.xlane.xlu1 %452  ;;  %v450_v10 = vpop.xlane.xlu0 %449  ;;  %v5233_v15 = vsel %vm2441_vm15, %v2440_v2, %v2435_v7  ;;  %v685_v2 = vsel %vm399_vm0, %v110_v60, 0.0  ;;  %v112_v7 = vld [vmem:[%s8644_s0 + $0x308] sm:$0xff] }
  0xad   :  { %v2450_v16 = vrot.slane %v453_v8, %v5082_v25  ;;  %v2446_v17 = vrot.slane %v450_v10, %v5079_v24  ;;  %v111_v8 = vld [vmem:[%s8644_s0 + $0x300] sm:$0xff] }
  0xae   :  { %v688_v18 = vsel %vm399_vm0, %v111_v8, 0.0 }
  0xaf   :  { %v2451_v21 = vsel %vm2343_vm1, %v2450_v16, %v2446_v17  ;;  %662 = vadd.xlane.f32.xlu1 %v661_v12  ;;  %659 = vadd.xlane.f32.xlu0 %v658_v13  ;;  %v691_v17 = vsel %vm399_vm0, %v112_v7, 0.0 }
  0xb0   :  { %v459_v22 = vpop.xlane.xlu1 %458  ;;  %v456_v23 = vpop.xlane.xlu0 %455 }
  0xb1   :  { %v2460_v29 = vrot.slane %v459_v22, %v5096_v31  ;;  %v2455_v32 = vrot.slane %v456_v23, %v5093_v30  ;;  %v114_v22 = vld [vmem:[%s8644_s0 + $0x318] sm:$0xff]  ;;  %v113_v23 = vld [vmem:[%s8644_s0 + $0x310] sm:$0xff] }
  0xb2   :  { %v697_v33 = vsel %vm399_vm0, %v114_v22, 0.0  ;;  %v694_v34 = vsel %vm399_vm0, %v113_v23, 0.0 }
  0xb3   :  { %v2456_v35 = vsel %vm2350_vm2, %v2455_v32, %v2451_v21  ;;  %668 = vadd.xlane.f32.xlu1 %v667_v26  ;;  %665 = vadd.xlane.f32.xlu0 %v664_v28 }
  0xb4   :  { %v465_v36 = vpop.xlane.xlu1 %464  ;;  %v2461_v38 = vsel %vm2357_vm3, %v2460_v29, %v2456_v35  ;;  %v462_v39 = vpop.xlane.xlu0 %461 }
  0xb5   :  { %v2470_v45 = vrot.slane %v465_v36, %v5111_v42  ;;  %v2465_v46 = vrot.slane %v462_v39, %v5114_v43  ;;  %v115_v39 = vld [vmem:[%s8644_s0 + $0x320] sm:$0xff] }
  0xb6   :  { %v700_v47 = vsel %vm399_vm0, %v115_v39, 0.0 }
  0xb7   :  { %v2466_v49 = vsel %vm8660_vm4, %v2465_v46, %v2461_v38  ;;  %674 = vadd.xlane.f32.xlu1 %v673_v40  ;;  %671 = vadd.xlane.f32.xlu0 %v670_v44  ;;  %v116_v38 = vld [vmem:[%s8644_s0 + $0x328] sm:$0xff] }
  0xb8   :  { %v471_v50 = vpop.xlane.xlu1 %470  ;;  %v2471_v51 = vsel %vm2371_vm5, %v2470_v45, %v2466_v49  ;;  %v468_v54 = vpop.xlane.xlu0 %467  ;;  %v703_v46 = vsel %vm399_vm0, %v116_v38, 0.0 }
  0xb9   :  { %v2480_v58 = vrot.slane %v471_v50, %v5123_v52  ;;  %v2475_v59 = vrot.slane %v468_v54, %v5126_v53  ;;  %v117_v54 = vld [vmem:[%s8644_s0 + $0x330] sm:$0xff] }
  0xba   :  { %v706_v60 = vsel %vm399_vm0, %v117_v54, 0.0 }
  0xbb   :  { %v2476_v62 = vsel %vm2378_vm6, %v2475_v59, %v2471_v51  ;;  %680 = vadd.xlane.f32.xlu1 %v679_v56  ;;  %677 = vadd.xlane.f32.xlu0 %v676_v11  ;;  %v118_v51 = vld [vmem:[%s8644_s0 + $0x338] sm:$0xff] }
  0xbc   :  { %v477_v63 = vpop.xlane.xlu1 %476  ;;  %v2481_v0 = vsel %vm2385_vm7, %v2480_v58, %v2476_v62  ;;  %v474_v1 = vpop.xlane.xlu0 %473  ;;  %v709_v59 = vsel %vm399_vm0, %v118_v51, 0.0 }
  0xbd   :  { %v2490_v5 = vrot.slane %v477_v63, %v5144_v3  ;;  %v2485_v6 = vrot.slane %v474_v1, %v5156_v9  ;;  %v119_v1 = vld [vmem:[%s8644_s0 + $0x340] sm:$0xff] }
  0xbe   :  { %v712_v7 = vsel %vm399_vm0, %v119_v1, 0.0 }
  0xbf   :  { %v2486_v10 = vsel %vm2392_vm8, %v2485_v6, %v2481_v0  ;;  %686 = vadd.xlane.f32.xlu1 %v685_v2  ;;  %683 = vadd.xlane.f32.xlu0 %v682_v4  ;;  %v120_v0 = vld [vmem:[%s8644_s0 + $0x348] sm:$0xff] }
  0xc0   :  { %v483_v12 = vpop.xlane.xlu1 %482  ;;  %v2491_v13 = vsel %vm2399_vm9, %v2490_v5, %v2486_v10  ;;  %v480_v16 = vpop.xlane.xlu0 %479  ;;  %v715_v6 = vsel %vm399_vm0, %v120_v0, 0.0 }
  0xc1   :  { %v2500_v20 = vrot.slane %v483_v12, %v5164_v19  ;;  %v2495_v21 = vrot.slane %v480_v16, %v5176_v27  ;;  %v122_v12 = vld [vmem:[%s8644_s0 + $0x358] sm:$0xff] }
  0xc3   :  { %v2496_v26 = vsel %vm2406_vm10, %v2495_v21, %v2491_v13  ;;  %692 = vadd.xlane.f32.xlu1 %v691_v17  ;;  %689 = vadd.xlane.f32.xlu0 %v688_v18  ;;  %v121_v13 = vld [vmem:[%s8644_s0 + $0x350] sm:$0xff]  ;;  %v721_v21 = vsel %vm399_vm0, %v122_v12, 0.0 }
  0xc4   :  { %v489_v28 = vpop.xlane.xlu1 %488  ;;  %v2501_v29 = vsel %vm2413_vm11, %v2500_v20, %v2496_v26  ;;  %v486_v32 = vpop.xlane.xlu0 %485  ;;  %v718_v22 = vsel %vm399_vm0, %v121_v13, 0.0 }
  0xc5   :  { %v2510_v35 = vrot.slane %v489_v28, %v5184_v37  ;;  %v2505_v36 = vrot.slane %v486_v32, %v5190_v41  ;;  %v124_v28 = vld [vmem:[%s8644_s0 + $0x368] sm:$0xff] }
  0xc7   :  { %v2506_v40 = vsel %vm2420_vm12, %v2505_v36, %v2501_v29  ;;  %698 = vadd.xlane.f32.xlu1 %v697_v33  ;;  %695 = vadd.xlane.f32.xlu0 %v694_v34  ;;  %v123_v29 = vld [vmem:[%s8644_s0 + $0x360] sm:$0xff]  ;;  %v727_v36 = vsel %vm399_vm0, %v124_v28, 0.0 }
  0xc8   :  { %v495_v44 = vpop.xlane.xlu1 %494  ;;  %v492_v45 = vpop.xlane.xlu0 %491  ;;  %v2511_v48 = vsel %vm2427_vm13, %v2510_v35, %v2506_v40  ;;  %v724_v38 = vsel %vm399_vm0, %v123_v29, 0.0 }
  0xc9   :  { %v2520_v49 = vrot.slane %v495_v44, %v5204_v55  ;;  %v2515_v50 = vrot.slane %v492_v45, %v5209_v57  ;;  %v126_v44 = vld [vmem:[%s8644_s0 + $0x378] sm:$0xff]  ;;  %v125_v45 = vld [vmem:[%s8644_s0 + $0x370] sm:$0xff] }
  0xca   :  { %v730_v51 = vsel %vm399_vm0, %v125_v45, 0.0 }
  0xcb   :  { %704 = vadd.xlane.f32.xlu1 %v703_v46  ;;  %701 = vadd.xlane.f32.xlu0 %v700_v47  ;;  %v2516_v56 = vsel %vm2434_vm14, %v2515_v50, %v2511_v48  ;;  %v733_v50 = vsel %vm399_vm0, %v126_v44, 0.0 }
  0xcc   :  { %v501_v11 = vpop.xlane.xlu1 %500  ;;  %v498_v58 = vpop.xlane.xlu0 %497  ;;  %v5330_v61 = vsel %vm2441_vm15, %v2520_v49, %v2516_v56 }
  0xcd   :  { %v2529_v62 = vrot.slane %v501_v11, %v5082_v25  ;;  %v2525_v63 = vrot.slane %v498_v58, %v5079_v24  ;;  %v128_v11 = vld [vmem:[%s8644_s0 + $0x388] sm:$0xff]  ;;  %v127_v58 = vld [vmem:[%s8644_s0 + $0x380] sm:$0xff] }
  0xce   :  { %v739_v0 = vsel %vm399_vm0, %v128_v11, 0.0  ;;  %v736_v1 = vsel %vm399_vm0, %v127_v58, 0.0 }
  0xcf   :  { %v2530_v2 = vsel %vm2343_vm1, %v2529_v62, %v2525_v63  ;;  %710 = vadd.xlane.f32.xlu1 %v709_v59  ;;  %707 = vadd.xlane.f32.xlu0 %v706_v60 }
  0xd0   :  { %v507_v4 = vpop.xlane.xlu1 %506  ;;  %v504_v5 = vpop.xlane.xlu0 %503 }
  0xd1   :  { %v2539_v8 = vrot.slane %v507_v4, %v5096_v31  ;;  %v2534_v10 = vrot.slane %v504_v5, %v5093_v30  ;;  %v130_v5 = vld [vmem:[%s8644_s0 + $0x398] sm:$0xff] }
  0xd2   :  { %v745_v13 = vsel %vm399_vm0, %v130_v5, 0.0 }
  0xd3   :  { %v2535_v16 = vsel %vm2350_vm2, %v2534_v10, %v2530_v2  ;;  %716 = vadd.xlane.f32.xlu1 %v715_v6  ;;  %713 = vadd.xlane.f32.xlu0 %v712_v7  ;;  %v129_v6 = vld [vmem:[%s8644_s0 + $0x390] sm:$0xff] }
  0xd4   :  { %v513_v17 = vpop.xlane.xlu1 %512  ;;  %v2540_v18 = vsel %vm2357_vm3, %v2539_v8, %v2535_v16  ;;  %v510_v20 = vpop.xlane.xlu0 %509  ;;  %v742_v16 = vsel %vm399_vm0, %v129_v6, 0.0 }
  0xd5   :  { %v2549_v23 = vrot.slane %v513_v17, %v5111_v42  ;;  %v2544_v26 = vrot.slane %v510_v20, %v5114_v43  ;;  %v132_v20 = vld [vmem:[%s8644_s0 + $0x3a8] sm:$0xff] }
  0xd6   :  { %v751_v28 = vsel %vm399_vm0, %v132_v20, 0.0 }
  0xd7   :  { %v2545_v32 = vsel %vm8660_vm4, %v2544_v26, %v2540_v18  ;;  %722 = vadd.xlane.f32.xlu1 %v721_v21  ;;  %719 = vadd.xlane.f32.xlu0 %v718_v22  ;;  %v131_v21 = vld [vmem:[%s8644_s0 + $0x3a0] sm:$0xff] }
  0xd8   :  { %v519_v33 = vpop.xlane.xlu1 %518  ;;  %v2550_v34 = vsel %vm2371_vm5, %v2549_v23, %v2545_v32  ;;  %v516_v35 = vpop.xlane.xlu0 %515  ;;  %v748_v29 = vsel %vm399_vm0, %v131_v21, 0.0 }
  0xd9   :  { %v2559_v39 = vrot.slane %v519_v33, %v5123_v52  ;;  %v2554_v40 = vrot.slane %v516_v35, %v5126_v53  ;;  %v134_v35 = vld [vmem:[%s8644_s0 + $0x3b8] sm:$0xff] }
  0xda   :  { %v757_v44 = vsel %vm399_vm0, %v134_v35, 0.0 }
  0xdb   :  { %v2555_v46 = vsel %vm2378_vm6, %v2554_v40, %v2550_v34  ;;  %728 = vadd.xlane.f32.xlu1 %v727_v36  ;;  %725 = vadd.xlane.f32.xlu0 %v724_v38  ;;  %v133_v36 = vld [vmem:[%s8644_s0 + $0x3b0] sm:$0xff] }
  0xdc   :  { %v525_v47 = vpop.xlane.xlu1 %524  ;;  %v2560_v48 = vsel %vm2385_vm7, %v2559_v39, %v2555_v46  ;;  %v522_v49 = vpop.xlane.xlu0 %521  ;;  %v754_v45 = vsel %vm399_vm0, %v133_v36, 0.0 }
  0xdd   :  { %v2569_v54 = vrot.slane %v525_v47, %v5144_v3  ;;  %v2564_v56 = vrot.slane %v522_v49, %v5156_v9  ;;  %v136_v49 = vld [vmem:[%s8644_s0 + $0x3c8] sm:$0xff] }
  0xde   :  { %v763_v11 = vsel %vm399_vm0, %v136_v49, 0.0 }
  0xdf   :  { %v2565_v59 = vsel %vm2392_vm8, %v2564_v56, %v2560_v48  ;;  %734 = vadd.xlane.f32.xlu1 %v733_v50  ;;  %731 = vadd.xlane.f32.xlu0 %v730_v51  ;;  %v135_v50 = vld [vmem:[%s8644_s0 + $0x3c0] sm:$0xff] }
  0xe0   :  { %v531_v60 = vpop.xlane.xlu1 %530  ;;  %v2570_v62 = vsel %vm2399_vm9, %v2569_v54, %v2565_v59  ;;  %v528_v63 = vpop.xlane.xlu0 %527  ;;  %v760_v58 = vsel %vm399_vm0, %v135_v50, 0.0 }
  0xe1   :  { %v2579_v2 = vrot.slane %v531_v60, %v5164_v19  ;;  %v2574_v4 = vrot.slane %v528_v63, %v5176_v27  ;;  %v137_v63 = vld [vmem:[%s8644_s0 + $0x3d0] sm:$0xff] }
  0xe2   :  { %v766_v6 = vsel %vm399_vm0, %v137_v63, 0.0 }
  0xe3   :  { %v2575_v7 = vsel %vm2406_vm10, %v2574_v4, %v2570_v62  ;;  %740 = vadd.xlane.f32.xlu1 %v739_v0  ;;  %737 = vadd.xlane.f32.xlu0 %v736_v1  ;;  %v138_v62 = vld [vmem:[%s8644_s0 + $0x3d8] sm:$0xff] }
  0xe4   :  { %v537_v8 = vpop.xlane.xlu1 %536  ;;  %v2580_v10 = vsel %vm2413_vm11, %v2579_v2, %v2575_v7  ;;  %v534_v12 = vpop.xlane.xlu0 %533  ;;  %v769_v5 = vsel %vm399_vm0, %v138_v62, 0.0 }
  0xe5   :  { %v2589_v17 = vrot.slane %v537_v8, %v5184_v37  ;;  %v2584_v18 = vrot.slane %v534_v12, %v5190_v41  ;;  %v139_v12 = vld [vmem:[%s8644_s0 + $0x3e0] sm:$0xff] }
  0xe6   :  { %v772_v21 = vsel %vm399_vm0, %v139_v12, 0.0 }
  0xe7   :  { %v2585_v22 = vsel %vm2420_vm12, %v2584_v18, %v2580_v10  ;;  %746 = vadd.xlane.f32.xlu1 %v745_v13  ;;  %743 = vadd.xlane.f32.xlu0 %v742_v16  ;;  %v140_v10 = vld [vmem:[%s8644_s0 + $0x3e8] sm:$0xff] }
  0xe8   :  { %v543_v23 = vpop.xlane.xlu1 %542  ;;  %v540_v26 = vpop.xlane.xlu0 %539  ;;  %v2590_v32 = vsel %vm2427_vm13, %v2589_v17, %v2585_v22  ;;  %v775_v20 = vsel %vm399_vm0, %v140_v10, 0.0 }
  0xe9   :  { %v2599_v33 = vrot.slane %v543_v23, %v5204_v55  ;;  %v2594_v34 = vrot.slane %v540_v26, %v5209_v57  ;;  %v142_v26 = vld [vmem:[%s8644_s0 + $0x3f8] sm:$0xff] }
  0xea   :  { %v781_v35 = vsel %vm399_vm0, %v142_v26, 0.0 }
  0xeb   :  { %752 = vadd.xlane.f32.xlu1 %v751_v28  ;;  %749 = vadd.xlane.f32.xlu0 %v748_v29  ;;  %v2595_v38 = vsel %vm2434_vm14, %v2594_v34, %v2590_v32  ;;  %v141_v28 = vld [vmem:[%s8644_s0 + $0x3f0] sm:$0xff] }
  0xec   :  { %v549_v39 = vpop.xlane.xlu1 %548  ;;  %v546_v40 = vpop.xlane.xlu0 %545  ;;  %v5427_v46 = vsel %vm2441_vm15, %v2599_v33, %v2595_v38  ;;  %v778_v36 = vsel %vm399_vm0, %v141_v28, 0.0 }
  0xed   :  { %v2608_v47 = vrot.slane %v549_v39, %v5082_v25  ;;  %v2604_v48 = vrot.slane %v546_v40, %v5079_v24  ;;  %v144_v40 = vld [vmem:[%s8644_s0 + $0x408] sm:$0xff] }
  0xee   :  { %v787_v50 = vsel %vm399_vm0, %v144_v40, 0.0 }
  0xef   :  { %v2609_v51 = vsel %vm2343_vm1, %v2608_v47, %v2604_v48  ;;  %758 = vadd.xlane.f32.xlu1 %v757_v44  ;;  %755 = vadd.xlane.f32.xlu0 %v754_v45  ;;  %v143_v44 = vld [vmem:[%s8644_s0 + $0x400] sm:$0xff] }
  0xf0   :  { %v555_v54 = vpop.xlane.xlu1 %554  ;;  %v552_v56 = vpop.xlane.xlu0 %551 }
  0xf1   :  { %v2618_v59 = vrot.slane %v555_v54, %v5096_v31  ;;  %v2613_v60 = vrot.slane %v552_v56, %v5093_v30 }
  0xf3   :  { %v2614_v0 = vsel %vm2350_vm2, %v2613_v60, %v2609_v51  ;;  %764 = vadd.xlane.f32.xlu1 %v763_v11  ;;  %761 = vadd.xlane.f32.xlu0 %v760_v58  ;;  %v784_v51 = vsel %vm399_vm0, %v143_v44, 0.0  ;;  %v146_v11 = vld [vmem:[%s8644_s0 + $0x418] sm:$0xff]  ;;  %v145_v58 = vld [vmem:[%s8644_s0 + $0x410] sm:$0xff] }
  0xf4   :  { %v561_v1 = vpop.xlane.xlu1 %560  ;;  %v2619_v2 = vsel %vm2357_vm3, %v2618_v59, %v2614_v0  ;;  %v558_v4 = vpop.xlane.xlu0 %557  ;;  %v793_v0 = vsel %vm399_vm0, %v146_v11, 0.0 }
  0xf5   :  { %v2628_v7 = vrot.slane %v561_v1, %v5111_v42  ;;  %v2623_v8 = vrot.slane %v558_v4, %v5114_v43  ;;  %v790_v1 = vsel %vm399_vm0, %v145_v58, 0.0 }
  0xf7   :  { %v2624_v13 = vsel %vm8660_vm4, %v2623_v8, %v2619_v2  ;;  %770 = vadd.xlane.f32.xlu1 %v769_v5  ;;  %767 = vadd.xlane.f32.xlu0 %v766_v6  ;;  %v148_v5 = vld [vmem:[%s8644_s0 + $0x428] sm:$0xff]  ;;  %v147_v6 = vld [vmem:[%s8644_s0 + $0x420] sm:$0xff] }
  0xf8   :  { %v567_v16 = vpop.xlane.xlu1 %566  ;;  %v2629_v17 = vsel %vm2371_vm5, %v2628_v7, %v2624_v13  ;;  %v564_v18 = vpop.xlane.xlu0 %563  ;;  %v799_v12 = vsel %vm399_vm0, %v148_v5, 0.0  ;;  %v796_v13 = vsel %vm399_vm0, %v147_v6, 0.0 }
  0xf9   :  { %v2638_v22 = vrot.slane %v567_v16, %v5123_v52  ;;  %v2633_v23 = vrot.slane %v564_v18, %v5126_v53 }
  0xfb   :  { %v2634_v29 = vsel %vm2378_vm6, %v2633_v23, %v2629_v17  ;;  %776 = vadd.xlane.f32.xlu1 %v775_v20  ;;  %773 = vadd.xlane.f32.xlu0 %v772_v21  ;;  %v150_v20 = vld [vmem:[%s8644_s0 + $0x438] sm:$0xff]  ;;  %v149_v21 = vld [vmem:[%s8644_s0 + $0x430] sm:$0xff] }
  0xfc   :  { %v573_v32 = vpop.xlane.xlu1 %572  ;;  %v2639_v33 = vsel %vm2385_vm7, %v2638_v22, %v2634_v29  ;;  %v570_v34 = vpop.xlane.xlu0 %569  ;;  %v805_v28 = vsel %vm399_vm0, %v150_v20, 0.0  ;;  %v802_v29 = vsel %vm399_vm0, %v149_v21, 0.0 }
  0xfd   :  { %v2648_v38 = vrot.slane %v573_v32, %v5144_v3  ;;  %v2643_v39 = vrot.slane %v570_v34, %v5156_v9 }
  0xff   :  { %v2644_v45 = vsel %vm2392_vm8, %v2643_v39, %v2639_v33  ;;  %782 = vadd.xlane.f32.xlu1 %v781_v35  ;;  %779 = vadd.xlane.f32.xlu0 %v778_v36  ;;  %v152_v35 = vld [vmem:[%s8644_s0 + $0x448] sm:$0xff]  ;;  %v151_v36 = vld [vmem:[%s8644_s0 + $0x440] sm:$0xff] }
 0x100   :  { %v579_v47 = vpop.xlane.xlu1 %578  ;;  %v2649_v48 = vsel %vm2399_vm9, %v2648_v38, %v2644_v45  ;;  %v576_v49 = vpop.xlane.xlu0 %575  ;;  %v811_v44 = vsel %vm399_vm0, %v152_v35, 0.0  ;;  %v808_v45 = vsel %vm399_vm0, %v151_v36, 0.0 }
 0x101   :  { %v2658_v54 = vrot.slane %v579_v47, %v5164_v19  ;;  %v2653_v56 = vrot.slane %v576_v49, %v5176_v27  ;;  %v154_v49 = vld [vmem:[%s8644_s0 + $0x458] sm:$0xff] }
 0x102   :  { %v817_v58 = vsel %vm399_vm0, %v154_v49, 0.0 }
 0x103   :  { %v2654_v59 = vsel %vm2406_vm10, %v2653_v56, %v2649_v48  ;;  %788 = vadd.xlane.f32.xlu1 %v787_v50  ;;  %785 = vadd.xlane.f32.xlu0 %v784_v51  ;;  %v153_v50 = vld [vmem:[%s8644_s0 + $0x450] sm:$0xff] }
 0x104   :  { %v585_v60 = vpop.xlane.xlu1 %584  ;;  %v2659_v62 = vsel %vm2413_vm11, %v2658_v54, %v2654_v59  ;;  %v582_v63 = vpop.xlane.xlu0 %581  ;;  %v814_v59 = vsel %vm399_vm0, %v153_v50, 0.0 }
 0x105   :  { %v2668_v2 = vrot.slane %v585_v60, %v5184_v37  ;;  %v2663_v4 = vrot.slane %v582_v63, %v5190_v41  ;;  %v156_v63 = vld [vmem:[%s8644_s0 + $0x468] sm:$0xff] }
 0x106   :  { %v823_v6 = vsel %vm399_vm0, %v156_v63, 0.0 }
 0x107   :  { %v2664_v7 = vsel %vm2420_vm12, %v2663_v4, %v2659_v62  ;;  %794 = vadd.xlane.f32.xlu1 %v793_v0  ;;  %791 = vadd.xlane.f32.xlu0 %v790_v1  ;;  %v155_v0 = vld [vmem:[%s8644_s0 + $0x460] sm:$0xff] }
 0x108   :  { %v591_v8 = vpop.xlane.xlu1 %590  ;;  %v588_v10 = vpop.xlane.xlu0 %587  ;;  %v2669_v16 = vsel %vm2427_vm13, %v2668_v2, %v2664_v7  ;;  %v820_v7 = vsel %vm399_vm0, %v155_v0, 0.0 }
 0x109   :  { %v2678_v17 = vrot.slane %v591_v8, %v5204_v55  ;;  %v2673_v18 = vrot.slane %v588_v10, %v5209_v57 }
 0x10b   :  { %800 = vadd.xlane.f32.xlu1 %v799_v12  ;;  %797 = vadd.xlane.f32.xlu0 %v796_v13  ;;  %v2674_v22 = vsel %vm2434_vm14, %v2673_v18, %v2669_v16  ;;  %v158_v12 = vld [vmem:[%s8644_s0 + $0x478] sm:$0xff]  ;;  %v157_v13 = vld [vmem:[%s8644_s0 + $0x470] sm:$0xff] }
 0x10c   :  { %v597_v23 = vpop.xlane.xlu1 %596  ;;  %v594_v26 = vpop.xlane.xlu0 %593  ;;  %v5524_v32 = vsel %vm2441_vm15, %v2678_v17, %v2674_v22  ;;  %v829_v21 = vsel %vm399_vm0, %v158_v12, 0.0  ;;  %v826_v22 = vsel %vm399_vm0, %v157_v13, 0.0 }
 0x10d   :  { %v2687_v33 = vrot.slane %v597_v23, %v5082_v25  ;;  %v2683_v34 = vrot.slane %v594_v26, %v5079_v24 }
 0x10f   :  { %v2688_v38 = vsel %vm2343_vm1, %v2687_v33, %v2683_v34  ;;  %806 = vadd.xlane.f32.xlu1 %v805_v28  ;;  %803 = vadd.xlane.f32.xlu0 %v802_v29  ;;  %v160_v28 = vld [vmem:[%s8644_s0 + $0x488] sm:$0xff]  ;;  %v159_v29 = vld [vmem:[%s8644_s0 + $0x480] sm:$0xff] }
 0x110   :  { %v603_v39 = vpop.xlane.xlu1 %602  ;;  %v600_v40 = vpop.xlane.xlu0 %599 }
 0x111   :  { %v2697_v47 = vrot.slane %v603_v39, %v5096_v31  ;;  %v2692_v48 = vrot.slane %v600_v40, %v5093_v30  ;;  %v832_v39 = vsel %vm399_vm0, %v159_v29, 0.0 }
 0x113   :  { %v2693_v51 = vsel %vm2350_vm2, %v2692_v48, %v2688_v38  ;;  %812 = vadd.xlane.f32.xlu1 %v811_v44  ;;  %809 = vadd.xlane.f32.xlu0 %v808_v45  ;;  %v835_v38 = vsel %vm399_vm0, %v160_v28, 0.0  ;;  %v162_v45 = vld [vmem:[%s8644_s0 + $0x498] sm:$0xff] }
 0x114   :  { %v609_v54 = vpop.xlane.xlu1 %608  ;;  %v2698_v56 = vsel %vm2357_vm3, %v2697_v47, %v2693_v51  ;;  %v606_v11 = vpop.xlane.xlu0 %605  ;;  %v161_v47 = vld [vmem:[%s8644_s0 + $0x490] sm:$0xff] }
 0x115   :  { %v2707_v60 = vrot.slane %v609_v54, %v5111_v42  ;;  %v2702_v62 = vrot.slane %v606_v11, %v5114_v43  ;;  %v841_v54 = vsel %vm399_vm0, %v162_v45, 0.0 }
 0x117   :  { %v2703_v1 = vsel %vm8660_vm4, %v2702_v62, %v2698_v56  ;;  %818 = vadd.xlane.f32.xlu1 %v817_v58  ;;  %815 = vadd.xlane.f32.xlu0 %v814_v59  ;;  %v838_v56 = vsel %vm399_vm0, %v161_v47, 0.0  ;;  %v164_v59 = vld [vmem:[%s8644_s0 + $0x4a8] sm:$0xff] }
 0x118   :  { %v615_v2 = vpop.xlane.xlu1 %614  ;;  %v2708_v4 = vsel %vm2371_vm5, %v2707_v60, %v2703_v1  ;;  %v612_v5 = vpop.xlane.xlu0 %611  ;;  %v163_v60 = vld [vmem:[%s8644_s0 + $0x4a0] sm:$0xff] }
 0x119   :  { %v2717_v8 = vrot.slane %v615_v2, %v5123_v52  ;;  %v2712_v10 = vrot.slane %v612_v5, %v5126_v53  ;;  %v847_v2 = vsel %vm399_vm0, %v164_v59, 0.0 }
 0x11b   :  { %v2713_v16 = vsel %vm2378_vm6, %v2712_v10, %v2708_v4  ;;  %824 = vadd.xlane.f32.xlu1 %v823_v6  ;;  %821 = vadd.xlane.f32.xlu0 %v820_v7  ;;  %v844_v4 = vsel %vm399_vm0, %v163_v60, 0.0  ;;  %v166_v7 = vld [vmem:[%s8644_s0 + $0x4b8] sm:$0xff] }
 0x11c   :  { %v621_v17 = vpop.xlane.xlu1 %620  ;;  %v2718_v18 = vsel %vm2385_vm7, %v2717_v8, %v2713_v16  ;;  %v618_v20 = vpop.xlane.xlu0 %617  ;;  %v165_v8 = vld [vmem:[%s8644_s0 + $0x4b0] sm:$0xff]  ;;  %v853_v16 = vsel %vm399_vm0, %v166_v7, 0.0 }
 0x11d   :  { %v2727_v23 = vrot.slane %v621_v17, %v5144_v3  ;;  %v2722_v26 = vrot.slane %v618_v20, %v5156_v9  ;;  %v850_v17 = vsel %vm399_vm0, %v165_v8, 0.0 }
 0x11f   :  { %v2723_v33 = vsel %vm2392_vm8, %v2722_v26, %v2718_v18  ;;  %830 = vadd.xlane.f32.xlu1 %v829_v21  ;;  %827 = vadd.xlane.f32.xlu0 %v826_v22  ;;  %v168_v22 = vld [vmem:[%s8644_s0 + $0x4c8] sm:$0xff] }
 0x120   :  { %v627_v34 = vpop.xlane.xlu1 %626  ;;  %v2728_v35 = vsel %vm2399_vm9, %v2727_v23, %v2723_v33  ;;  %v624_v36 = vpop.xlane.xlu0 %623  ;;  %v167_v23 = vld [vmem:[%s8644_s0 + $0x4c0] sm:$0xff]  ;;  %v859_v33 = vsel %vm399_vm0, %v168_v22, 0.0 }
 0x121   :  { %v2737_v40 = vrot.slane %v627_v34, %v5164_v19  ;;  %v2732_v44 = vrot.slane %v624_v36, %v5176_v27  ;;  %v856_v34 = vsel %vm399_vm0, %v167_v23, 0.0 }
 0x123   :  { %v2733_v48 = vsel %vm2406_vm10, %v2732_v44, %v2728_v35  ;;  %836 = vadd.xlane.f32.xlu1 %v835_v38  ;;  %833 = vadd.xlane.f32.xlu0 %v832_v39  ;;  %v170_v38 = vld [vmem:[%s8644_s0 + $0x4d8] sm:$0xff]  ;;  %v169_v39 = vld [vmem:[%s8644_s0 + $0x4d0] sm:$0xff] }
 0x124   :  { %v633_v49 = vpop.xlane.xlu1 %632  ;;  %v2738_v50 = vsel %vm2413_vm11, %v2737_v40, %v2733_v48  ;;  %v630_v51 = vpop.xlane.xlu0 %629  ;;  %v865_v48 = vsel %vm399_vm0, %v170_v38, 0.0 }
 0x125   :  { %v2747_v11 = vrot.slane %v633_v49, %v5184_v37  ;;  %v2742_v58 = vrot.slane %v630_v51, %v5190_v41  ;;  %v862_v49 = vsel %vm399_vm0, %v169_v39, 0.0 }
 0x127   :  { %v2743_v62 = vsel %vm2420_vm12, %v2742_v58, %v2738_v50  ;;  %842 = vadd.xlane.f32.xlu1 %v841_v54  ;;  %839 = vadd.xlane.f32.xlu0 %v838_v56  ;;  %v172_v54 = vld [vmem:[%s8644_s0 + $0x4e8] sm:$0xff]  ;;  %v171_v56 = vld [vmem:[%s8644_s0 + $0x4e0] sm:$0xff] }
 0x128   :  { %v639_v63 = vpop.xlane.xlu1 %638  ;;  %v2748_v0 = vsel %vm2427_vm13, %v2747_v11, %v2743_v62  ;;  %v636_v1 = vpop.xlane.xlu0 %635  ;;  %v871_v62 = vsel %vm399_vm0, %v172_v54, 0.0 }
 0x129   :  { %v2757_v5 = vrot.slane %v639_v63, %v5204_v55  ;;  %v2752_v6 = vrot.slane %v636_v1, %v5209_v57  ;;  %v868_v63 = vsel %vm399_vm0, %v171_v56, 0.0 }
 0x12b   :  { %v2753_v10 = vsel %vm2434_vm14, %v2752_v6, %v2748_v0  ;;  %848 = vadd.xlane.f32.xlu1 %v847_v2  ;;  %845 = vadd.xlane.f32.xlu0 %v844_v4  ;;  %v174_v2 = vld [vmem:[%s8644_s0 + $0x4f8] sm:$0xff]  ;;  %v173_v4 = vld [vmem:[%s8644_s0 + $0x4f0] sm:$0xff] }
 0x12c   :  { %v645_v12 = vpop.xlane.xlu1 %644  ;;  %v642_v13 = vpop.xlane.xlu0 %641  ;;  %v5621_v18 = vsel %vm2441_vm15, %v2757_v5, %v2753_v10  ;;  %v877_v10 = vsel %vm399_vm0, %v174_v2, 0.0 }
 0x12d   :  { %8670 = vst [vmem:[#allocation11_spill] sm:$0xff] %v5621_v18  ;;  %v2766_v20 = vrot.slane %v645_v12, %v5082_v25  ;;  %v2762_v21 = vrot.slane %v642_v13, %v5079_v24  ;;  %v874_v12 = vsel %vm399_vm0, %v173_v4, 0.0 }
 0x12f   :  { %v2767_v26 = vsel %vm2343_vm1, %v2766_v20, %v2762_v21  ;;  %854 = vadd.xlane.f32.xlu1 %v853_v16  ;;  %851 = vadd.xlane.f32.xlu0 %v850_v17  ;;  %v176_v17 = vld [vmem:[%s8644_s0 + $0x508] sm:$0xff]  ;;  %v175_v20 = vld [vmem:[%s8644_s0 + $0x500] sm:$0xff] }
 0x130   :  { %v651_v28 = vpop.xlane.xlu1 %650  ;;  %v648_v29 = vpop.xlane.xlu0 %647 }
 0x131   :  { %v2776_v35 = vrot.slane %v651_v28, %v5096_v31  ;;  %v2771_v36 = vrot.slane %v648_v29, %v5093_v30  ;;  %v883_v28 = vsel %vm399_vm0, %v176_v17, 0.0  ;;  %v880_v29 = vsel %vm399_vm0, %v175_v20, 0.0 }
 0x133   :  { %v2772_v40 = vsel %vm2350_vm2, %v2771_v36, %v2767_v26  ;;  %860 = vadd.xlane.f32.xlu1 %v859_v33  ;;  %857 = vadd.xlane.f32.xlu0 %v856_v34  ;;  %v177_v36 = vld [vmem:[%s8644_s0 + $0x510] sm:$0xff] }
 0x134   :  { %v657_v44 = vpop.xlane.xlu1 %656  ;;  %v2777_v45 = vsel %vm2357_vm3, %v2776_v35, %v2772_v40  ;;  %v654_v47 = vpop.xlane.xlu0 %653  ;;  %v178_v35 = vld [vmem:[%s8644_s0 + $0x518] sm:$0xff] }
 0x135   :  { %v2786_v50 = vrot.slane %v657_v44, %v5111_v42  ;;  %v2781_v51 = vrot.slane %v654_v47, %v5114_v43  ;;  %v886_v47 = vsel %vm399_vm0, %v177_v36, 0.0 }
 0x137   :  { %v2782_v11 = vsel %vm8660_vm4, %v2781_v51, %v2777_v45  ;;  %866 = vadd.xlane.f32.xlu1 %v865_v48  ;;  %863 = vadd.xlane.f32.xlu0 %v862_v49  ;;  %v889_v45 = vsel %vm399_vm0, %v178_v35, 0.0  ;;  %v179_v51 = vld [vmem:[%s8644_s0 + $0x520] sm:$0xff] }
 0x138   :  { %v663_v58 = vpop.xlane.xlu1 %662  ;;  %v2787_v59 = vsel %vm2371_vm5, %v2786_v50, %v2782_v11  ;;  %v660_v60 = vpop.xlane.xlu0 %659  ;;  %v180_v50 = vld [vmem:[%s8644_s0 + $0x528] sm:$0xff] }
 0x139   :  { %v2796_v0 = vrot.slane %v663_v58, %v5123_v52  ;;  %v2791_v1 = vrot.slane %v660_v60, %v5126_v53  ;;  %v895_v58 = vsel %vm399_vm0, %v180_v50, 0.0 }
 0x13b   :  { %v2792_v5 = vsel %vm2378_vm6, %v2791_v1, %v2787_v59  ;;  %872 = vadd.xlane.f32.xlu1 %v871_v62  ;;  %869 = vadd.xlane.f32.xlu0 %v868_v63  ;;  %v892_v59 = vsel %vm399_vm0, %v179_v51, 0.0  ;;  %v181_v1 = vld [vmem:[%s8644_s0 + $0x530] sm:$0xff] }
 0x13c   :  { %v669_v6 = vpop.xlane.xlu1 %668  ;;  %v2797_v7 = vsel %vm2385_vm7, %v2796_v0, %v2792_v5  ;;  %v666_v8 = vpop.xlane.xlu0 %665  ;;  %v182_v0 = vld [vmem:[%s8644_s0 + $0x538] sm:$0xff] }
 0x13d   :  { %v2806_v13 = vrot.slane %v669_v6, %v5144_v3  ;;  %v2801_v16 = vrot.slane %v666_v8, %v5156_v9  ;;  %v901_v6 = vsel %vm399_vm0, %v182_v0, 0.0 }
 0x13f   :  { %v2802_v21 = vsel %vm2392_vm8, %v2801_v16, %v2797_v7  ;;  %878 = vadd.xlane.f32.xlu1 %v877_v10  ;;  %875 = vadd.xlane.f32.xlu0 %v874_v12  ;;  %v898_v7 = vsel %vm399_vm0, %v181_v1, 0.0  ;;  %v183_v16 = vld [vmem:[%s8644_s0 + $0x540] sm:$0xff] }
 0x140   :  { %v675_v22 = vpop.xlane.xlu1 %674  ;;  %v2807_v23 = vsel %vm2399_vm9, %v2806_v13, %v2802_v21  ;;  %v672_v26 = vpop.xlane.xlu0 %671  ;;  %v184_v13 = vld [vmem:[%s8644_s0 + $0x548] sm:$0xff] }
 0x141   :  { %v2816_v33 = vrot.slane %v675_v22, %v5164_v19  ;;  %v2811_v34 = vrot.slane %v672_v26, %v5176_v27  ;;  %v907_v22 = vsel %vm399_vm0, %v184_v13, 0.0 }
 0x143   :  { %v2812_v38 = vsel %vm2406_vm10, %v2811_v34, %v2807_v23  ;;  %884 = vadd.xlane.f32.xlu1 %v883_v28  ;;  %881 = vadd.xlane.f32.xlu0 %v880_v29  ;;  %v904_v23 = vsel %vm399_vm0, %v183_v16, 0.0  ;;  %v186_v29 = vld [vmem:[%s8644_s0 + $0x558] sm:$0xff] }
 0x144   :  { %v681_v39 = vpop.xlane.xlu1 %680  ;;  %v2817_v40 = vsel %vm2413_vm11, %v2816_v33, %v2812_v38  ;;  %v678_v44 = vpop.xlane.xlu0 %677  ;;  %v185_v33 = vld [vmem:[%s8644_s0 + $0x550] sm:$0xff] }
 0x145   :  { %v2826_v48 = vrot.slane %v681_v39, %v5184_v37  ;;  %v2821_v49 = vrot.slane %v678_v44, %v5190_v41  ;;  %v913_v39 = vsel %vm399_vm0, %v186_v29, 0.0  ;;  %v208_v29 = vld [vmem:[%s8644_s0 + $0x608] sm:$0xff] }
 0x147   :  { %v2822_v54 = vsel %vm2420_vm12, %v2821_v49, %v2817_v40  ;;  %890 = vadd.xlane.f32.xlu1 %v889_v45  ;;  %887 = vadd.xlane.f32.xlu0 %v886_v47  ;;  %v910_v40 = vsel %vm399_vm0, %v185_v33, 0.0  ;;  %v188_v47 = vld [vmem:[%s8644_s0 + $0x568] sm:$0xff] }
 0x148   :  { %v687_v56 = vpop.xlane.xlu1 %686  ;;  %v684_v11 = vpop.xlane.xlu0 %683  ;;  %v2827_v60 = vsel %vm2427_vm13, %v2826_v48, %v2822_v54  ;;  %v187_v48 = vld [vmem:[%s8644_s0 + $0x560] sm:$0xff] }
 0x149   :  { %v2836_v62 = vrot.slane %v687_v56, %v5204_v55  ;;  %v2831_v63 = vrot.slane %v684_v11, %v5209_v57  ;;  %v919_v56 = vsel %vm399_vm0, %v188_v47, 0.0  ;;  %v916_v11 = vsel %vm399_vm0, %v187_v48, 0.0  ;;  %v209_v47 = vld [vmem:[%s8644_s0 + $0x610] sm:$0xff] }
 0x14b   :  { %896 = vadd.xlane.f32.xlu1 %v895_v58  ;;  %893 = vadd.xlane.f32.xlu0 %v892_v59  ;;  %v2832_v2 = vsel %vm2434_vm14, %v2831_v63, %v2827_v60  ;;  %v223_v60 = vld [vmem:[%s8644_s0 + $0x680] sm:$0xff] }
 0x14c   :  { %v693_v4 = vpop.xlane.xlu1 %692  ;;  %v690_v5 = vpop.xlane.xlu0 %689  ;;  %v5718_v8 = vsel %vm2441_vm15, %v2836_v62, %v2832_v2  ;;  %v189_v62 = vld [vmem:[%s8644_s0 + $0x570] sm:$0xff] }
 0x14d   :  { %8671 = vst [vmem:[#allocation12_spill] sm:$0xff] %v5718_v8  ;;  %v2845_v10 = vrot.slane %v693_v4, %v5082_v25  ;;  %v2841_v12 = vrot.slane %v690_v5, %v5079_v24  ;;  %v1024_v4 = vsel %vm399_vm0, %v223_v60, 0.0  ;;  %v922_v5 = vsel %vm399_vm0, %v189_v62, 0.0  ;;  %v255_v60 = vld [vmem:[%s8644_s0 + $0x780] sm:$0xff] }
 0x14f   :  { %v2846_v17 = vsel %vm2343_vm1, %v2845_v10, %v2841_v12  ;;  %902 = vadd.xlane.f32.xlu1 %v901_v6  ;;  %899 = vadd.xlane.f32.xlu0 %v898_v7  ;;  %v207_v10 = vld [vmem:[%s8644_s0 + $0x600] sm:$0xff]  ;;  %v224_v12 = vld [vmem:[%s8644_s0 + $0x688] sm:$0xff] }
 0x150   :  { %v699_v20 = vpop.xlane.xlu1 %698  ;;  %v696_v21 = vpop.xlane.xlu0 %695 }
 0x151   :  { %v2855_v26 = vrot.slane %v699_v20, %v5096_v31  ;;  %v2850_v28 = vrot.slane %v696_v21, %v5093_v30  ;;  %v976_v21 = vsel %vm399_vm0, %v207_v10, 0.0  ;;  %v210_v10 = vld [vmem:[%s8644_s0 + $0x618] sm:$0xff] }
 0x153   :  { %v2851_v34 = vsel %vm2350_vm2, %v2850_v28, %v2846_v17  ;;  %908 = vadd.xlane.f32.xlu1 %v907_v22  ;;  %905 = vadd.xlane.f32.xlu0 %v904_v23  ;;  %v1027_v22 = vsel %vm399_vm0, %v224_v12, 0.0  ;;  %v225_v28 = vld [vmem:[%s8644_s0 + $0x690] sm:$0xff] }
 0x154   :  { %v705_v35 = vpop.xlane.xlu1 %704  ;;  %v2856_v36 = vsel %vm2357_vm3, %v2855_v26, %v2851_v34  ;;  %v702_v38 = vpop.xlane.xlu0 %701 }
 0x155   :  { %v2865_v44 = vrot.slane %v705_v35, %v5111_v42  ;;  %v2860_v45 = vrot.slane %v702_v38, %v5114_v43  ;;  %v1030_v38 = vsel %vm399_vm0, %v225_v28, 0.0 }
 0x157   :  { %v2861_v49 = vsel %vm8660_vm4, %v2860_v45, %v2856_v36  ;;  %914 = vadd.xlane.f32.xlu1 %v913_v39  ;;  %911 = vadd.xlane.f32.xlu0 %v910_v40  ;;  %v979_v39 = vsel %vm399_vm0, %v208_v29, 0.0  ;;  %v226_v45 = vld [vmem:[%s8644_s0 + $0x698] sm:$0xff] }
 0x158   :  { %v711_v50 = vpop.xlane.xlu1 %710  ;;  %v2866_v51 = vsel %vm2371_vm5, %v2865_v44, %v2861_v49  ;;  %v708_v54 = vpop.xlane.xlu0 %707 }
 0x159   :  { %v2875_v58 = vrot.slane %v711_v50, %v5123_v52  ;;  %v2870_v59 = vrot.slane %v708_v54, %v5126_v53  ;;  %v1033_v54 = vsel %vm399_vm0, %v226_v45, 0.0 }
 0x15b   :  { %v2871_v63 = vsel %vm2378_vm6, %v2870_v59, %v2866_v51  ;;  %920 = vadd.xlane.f32.xlu1 %v919_v56  ;;  %917 = vadd.xlane.f32.xlu0 %v916_v11  ;;  %v982_v56 = vsel %vm399_vm0, %v209_v47, 0.0  ;;  %v256_v59 = vld [vmem:[%s8644_s0 + $0x788] sm:$0xff] }
 0x15c   :  { %v717_v0 = vpop.xlane.xlu1 %716  ;;  %v2876_v1 = vsel %vm2385_vm7, %v2875_v58, %v2871_v63  ;;  %v714_v2 = vpop.xlane.xlu0 %713 }
 0x15d   :  { %v2885_v6 = vrot.slane %v717_v0, %v5144_v3  ;;  %v2880_v7 = vrot.slane %v714_v2, %v5156_v9  ;;  %v1120_v2 = vsel %vm399_vm0, %v255_v60, 0.0 }
 0x15f   :  { %v2881_v13 = vsel %vm2392_vm8, %v2880_v7, %v2876_v1  ;;  %1025 = vadd.xlane.f32.xlu1 %v1024_v4  ;;  %923 = vadd.xlane.f32.xlu0 %v922_v5  ;;  %v1123_v1 = vsel %vm399_vm0, %v256_v59, 0.0  ;;  %v227_v7 = vld [vmem:[%s8644_s0 + $0x6a0] sm:$0xff] }
 0x160   :  { %v723_v16 = vpop.xlane.xlu1 %722  ;;  %v2886_v17 = vsel %vm2399_vm9, %v2885_v6, %v2881_v13  ;;  %v720_v20 = vpop.xlane.xlu0 %719 }
 0x161   :  { %v2895_v23 = vrot.slane %v723_v16, %v5164_v19  ;;  %v2890_v26 = vrot.slane %v720_v20, %v5176_v27  ;;  %v985_v20 = vsel %vm399_vm0, %v210_v10, 0.0 }
 0x163   :  { %v2891_v33 = vsel %vm2406_vm10, %v2890_v26, %v2886_v17  ;;  %977 = vadd.xlane.f32.xlu1 %v976_v21  ;;  %1028 = vadd.xlane.f32.xlu0 %v1027_v22  ;;  %v1036_v17 = vsel %vm399_vm0, %v227_v7, 0.0  ;;  %v239_v26 = vld [vmem:[%s8644_s0 + $0x700] sm:$0xff]  ;;  %v258_v7 = vld [vmem:[%s8644_s0 + $0x798] sm:$0xff] }
 0x164   :  { %v729_v34 = vpop.xlane.xlu1 %728  ;;  %v2896_v35 = vsel %vm2413_vm11, %v2895_v23, %v2891_v33  ;;  %v726_v36 = vpop.xlane.xlu0 %725  ;;  %v240_v23 = vld [vmem:[%s8644_s0 + $0x708] sm:$0xff] }
 0x165   :  { %v2905_v40 = vrot.slane %v729_v34, %v5184_v37  ;;  %v2900_v44 = vrot.slane %v726_v36, %v5190_v41  ;;  %v1072_v36 = vsel %vm399_vm0, %v239_v26, 0.0  ;;  %v229_v26 = vld [vmem:[%s8644_s0 + $0x6b0] sm:$0xff] }
 0x167   :  { %v2901_v48 = vsel %vm2420_vm12, %v2900_v44, %v2896_v35  ;;  %1031 = vadd.xlane.f32.xlu1 %v1030_v38  ;;  %980 = vadd.xlane.f32.xlu0 %v979_v39  ;;  %v1075_v35 = vsel %vm399_vm0, %v240_v23, 0.0  ;;  %v257_v44 = vld [vmem:[%s8644_s0 + $0x790] sm:$0xff]  ;;  %v242_v23 = vld [vmem:[%s8644_s0 + $0x718] sm:$0xff] }
 0x168   :  { %v735_v49 = vpop.xlane.xlu1 %734  ;;  %v2906_v50 = vsel %vm2427_vm13, %v2905_v40, %v2901_v48  ;;  %v732_v51 = vpop.xlane.xlu0 %731  ;;  %v211_v40 = vld [vmem:[%s8644_s0 + $0x620] sm:$0xff] }
 0x169   :  { %v2915_v11 = vrot.slane %v735_v49, %v5204_v55  ;;  %v2910_v58 = vrot.slane %v732_v51, %v5209_v57  ;;  %v1126_v51 = vsel %vm399_vm0, %v257_v44, 0.0  ;;  %v259_v44 = vld [vmem:[%s8644_s0 + $0x7a0] sm:$0xff] }
 0x16b   :  { %v2911_v62 = vsel %vm2434_vm14, %v2910_v58, %v2906_v50  ;;  %1034 = vadd.xlane.f32.xlu1 %v1033_v54  ;;  %983 = vadd.xlane.f32.xlu0 %v982_v56  ;;  %v988_v50 = vsel %vm399_vm0, %v211_v40, 0.0  ;;  %v228_v58 = vld [vmem:[%s8644_s0 + $0x6a8] sm:$0xff]  ;;  %v213_v40 = vld [vmem:[%s8644_s0 + $0x630] sm:$0xff] }
 0x16c   :  { %v741_v63 = vpop.xlane.xlu1 %740  ;;  %v738_v0 = vpop.xlane.xlu0 %737  ;;  %v5815_v4 = vsel %vm2441_vm15, %v2915_v11, %v2911_v62  ;;  %v241_v11 = vld [vmem:[%s8644_s0 + $0x710] sm:$0xff] }
 0x16d   :  { %8672 = vst [vmem:[#allocation13_spill] sm:$0xff] %v5815_v4  ;;  %v2924_v5 = vrot.slane %v741_v63, %v5082_v25  ;;  %v2920_v6 = vrot.slane %v738_v0, %v5079_v24  ;;  %v1078_v0 = vsel %vm399_vm0, %v241_v11, 0.0  ;;  %v243_v11 = vld [vmem:[%s8644_s0 + $0x720] sm:$0xff]  ;;  %v332_v4 = vld [vmem:[%s8644_s0 + $0x9e8] sm:$0xff] }
 0x16f   :  { %v2925_v12 = vsel %vm2343_vm1, %v2924_v5, %v2920_v6  ;;  %1124 = vadd.xlane.f32.xlu1 %v1123_v1  ;;  %1121 = vadd.xlane.f32.xlu0 %v1120_v2  ;;  %v1039_v1 = vsel %vm399_vm0, %v228_v58, 0.0  ;;  %v212_v6 = vld [vmem:[%s8644_s0 + $0x628] sm:$0xff]  ;;  %v230_v58 = vld [vmem:[%s8644_s0 + $0x6b8] sm:$0xff] }
 0x170   :  { %v747_v13 = vpop.xlane.xlu1 %746  ;;  %v744_v16 = vpop.xlane.xlu0 %743 }
 0x171   :  { %v2934_v21 = vrot.slane %v747_v13, %v5096_v31  ;;  %v2929_v22 = vrot.slane %v744_v16, %v5093_v30 }
 0x173   :  { %v2930_v28 = vsel %vm2350_vm2, %v2929_v22, %v2925_v12  ;;  %1037 = vadd.xlane.f32.xlu1 %v1036_v17  ;;  %986 = vadd.xlane.f32.xlu0 %v985_v20  ;;  %v991_v17 = vsel %vm399_vm0, %v212_v6, 0.0  ;;  %v1129_v20 = vsel %vm399_vm0, %v258_v7, 0.0  ;;  %v214_v6 = vld [vmem:[%s8644_s0 + $0x638] sm:$0xff]  ;;  %v260_v7 = vld [vmem:[%s8644_s0 + $0x7a8] sm:$0xff] }
 0x174   :  { %v753_v29 = vpop.xlane.xlu1 %752  ;;  %v2935_v33 = vsel %vm2357_vm3, %v2934_v21, %v2930_v28  ;;  %v750_v34 = vpop.xlane.xlu0 %749 }
 0x175   :  { %v2944_v38 = vrot.slane %v753_v29, %v5111_v42  ;;  %v2939_v39 = vrot.slane %v750_v34, %v5114_v43 }
 0x177   :  { %v2940_v45 = vsel %vm8660_vm4, %v2939_v39, %v2935_v33  ;;  %1076 = vadd.xlane.f32.xlu1 %v1075_v35  ;;  %1073 = vadd.xlane.f32.xlu0 %v1072_v36  ;;  %v1081_v35 = vsel %vm399_vm0, %v242_v23, 0.0  ;;  %v1042_v36 = vsel %vm399_vm0, %v229_v26, 0.0  ;;  %v231_v23 = vld [vmem:[%s8644_s0 + $0x6c0] sm:$0xff] }
 0x178   :  { %v759_v47 = vpop.xlane.xlu1 %758  ;;  %v2945_v48 = vsel %vm2371_vm5, %v2944_v38, %v2940_v45  ;;  %v756_v49 = vpop.xlane.xlu0 %755 }
 0x179   :  { %v2954_v54 = vrot.slane %v759_v47, %v5123_v52  ;;  %v2949_v56 = vrot.slane %v756_v49, %v5126_v53  ;;  %v994_v49 = vsel %vm399_vm0, %v213_v40, 0.0  ;;  %v261_v40 = vld [vmem:[%s8644_s0 + $0x7b0] sm:$0xff] }
 0x17b   :  { %v2950_v59 = vsel %vm2378_vm6, %v2949_v56, %v2945_v48  ;;  %989 = vadd.xlane.f32.xlu1 %v988_v50  ;;  %1127 = vadd.xlane.f32.xlu0 %v1126_v51  ;;  %v1132_v50 = vsel %vm399_vm0, %v259_v44, 0.0 }
 0x17c   :  { %v765_v60 = vpop.xlane.xlu1 %764  ;;  %v2955_v62 = vsel %vm2385_vm7, %v2954_v54, %v2950_v59  ;;  %v762_v63 = vpop.xlane.xlu0 %761 }
 0x17d   :  { %v2964_v2 = vrot.slane %v765_v60, %v5144_v3  ;;  %v2959_v5 = vrot.slane %v762_v63, %v5156_v9  ;;  %v1084_v63 = vsel %vm399_vm0, %v243_v11, 0.0  ;;  %v232_v11 = vld [vmem:[%s8644_s0 + $0x6c8] sm:$0xff] }
 0x17f   :  { %v2960_v10 = vsel %vm2392_vm8, %v2959_v5, %v2955_v62  ;;  %1079 = vadd.xlane.f32.xlu1 %v1078_v0  ;;  %1040 = vadd.xlane.f32.xlu0 %v1039_v1  ;;  %v1045_v0 = vsel %vm399_vm0, %v230_v58, 0.0 }
 0x180   :  { %v771_v12 = vpop.xlane.xlu1 %770  ;;  %v2965_v13 = vsel %vm2399_vm9, %v2964_v2, %v2960_v10  ;;  %v768_v16 = vpop.xlane.xlu0 %767 }
 0x181   :  { %v2974_v21 = vrot.slane %v771_v12, %v5164_v19  ;;  %v2969_v22 = vrot.slane %v768_v16, %v5176_v27  ;;  %v997_v16 = vsel %vm399_vm0, %v214_v6, 0.0  ;;  %v216_v6 = vld [vmem:[%s8644_s0 + $0x648] sm:$0xff] }
 0x183   :  { %v2970_v28 = vsel %vm2406_vm10, %v2969_v22, %v2965_v13  ;;  %992 = vadd.xlane.f32.xlu1 %v991_v17  ;;  %1130 = vadd.xlane.f32.xlu0 %v1129_v20  ;;  %v1135_v17 = vsel %vm399_vm0, %v260_v7, 0.0  ;;  %v244_v22 = vld [vmem:[%s8644_s0 + $0x728] sm:$0xff]  ;;  %v262_v7 = vld [vmem:[%s8644_s0 + $0x7b8] sm:$0xff] }
 0x184   :  { %v777_v29 = vpop.xlane.xlu1 %776  ;;  %v2975_v33 = vsel %vm2413_vm11, %v2974_v21, %v2970_v28  ;;  %v774_v34 = vpop.xlane.xlu0 %773 }
 0x185   :  { %v2984_v38 = vrot.slane %v777_v29, %v5184_v37  ;;  %v2979_v39 = vrot.slane %v774_v34, %v5190_v41  ;;  %v1087_v34 = vsel %vm399_vm0, %v244_v22, 0.0 }
 0x187   :  { %v2980_v45 = vsel %vm2420_vm12, %v2979_v39, %v2975_v33  ;;  %1082 = vadd.xlane.f32.xlu1 %v1081_v35  ;;  %1043 = vadd.xlane.f32.xlu0 %v1042_v36  ;;  %v1048_v35 = vsel %vm399_vm0, %v231_v23, 0.0  ;;  %v215_v39 = vld [vmem:[%s8644_s0 + $0x640] sm:$0xff] }
 0x188   :  { %v783_v47 = vpop.xlane.xlu1 %782  ;;  %v780_v48 = vpop.xlane.xlu0 %779  ;;  %v2985_v51 = vsel %vm2427_vm13, %v2984_v38, %v2980_v45 }
 0x189   :  { %v2994_v54 = vrot.slane %v783_v47, %v5204_v55  ;;  %v2989_v56 = vrot.slane %v780_v48, %v5209_v57 }
 0x18b   :  { %995 = vadd.xlane.f32.xlu1 %v994_v49  ;;  %1133 = vadd.xlane.f32.xlu0 %v1132_v50  ;;  %v2990_v59 = vsel %vm2434_vm14, %v2989_v56, %v2985_v51  ;;  %v1000_v49 = vsel %vm399_vm0, %v215_v39, 0.0  ;;  %v1138_v50 = vsel %vm399_vm0, %v261_v40, 0.0  ;;  %v245_v56 = vld [vmem:[%s8644_s0 + $0x730] sm:$0xff] }
 0x18c   :  { %v789_v60 = vpop.xlane.xlu1 %788  ;;  %v786_v62 = vpop.xlane.xlu0 %785  ;;  %v5912_v1 = vsel %vm2441_vm15, %v2994_v54, %v2990_v59 }
 0x18d   :  { %8673 = vst [vmem:[#allocation14_spill] sm:$0xff] %v5912_v1  ;;  %v3003_v2 = vrot.slane %v789_v60, %v5082_v25  ;;  %v2999_v5 = vrot.slane %v786_v62, %v5079_v24  ;;  %v334_v1 = vld [vmem:[%s8644_s0 + $0x9f8] sm:$0xff] }
 0x18f   :  { %v3004_v10 = vsel %vm2343_vm1, %v3003_v2, %v2999_v5  ;;  %1085 = vadd.xlane.f32.xlu1 %v1084_v63  ;;  %1046 = vadd.xlane.f32.xlu0 %v1045_v0  ;;  %v1090_v63 = vsel %vm399_vm0, %v245_v56, 0.0  ;;  %v1051_v0 = vsel %vm399_vm0, %v232_v11, 0.0  ;;  %v1576_v11 = vld [vmem:[%s8645_s1 + $0xc0] sm:$0xff] }
 0x190   :  { %v795_v12 = vpop.xlane.xlu1 %794  ;;  %v792_v13 = vpop.xlane.xlu0 %791 }
 0x191   :  { %v3013_v20 = vrot.slane %v795_v12, %v5096_v31  ;;  %v3008_v21 = vrot.slane %v792_v13, %v5093_v30 }
 0x193   :  { %v3009_v26 = vsel %vm2350_vm2, %v3008_v21, %v3004_v10  ;;  %998 = vadd.xlane.f32.xlu1 %v997_v16  ;;  %1136 = vadd.xlane.f32.xlu0 %v1135_v17  ;;  %v1003_v17 = vsel %vm399_vm0, %v216_v6, 0.0  ;;  %v1583_v21 = vld [vmem:[%s8645_s1 + $0xf8] sm:$0xff] }
 0x194   :  { %v801_v28 = vpop.xlane.xlu1 %800  ;;  %v3014_v29 = vsel %vm2357_vm3, %v3013_v20, %v3009_v26  ;;  %v798_v33 = vpop.xlane.xlu0 %797  ;;  %v1141_v20 = vsel %vm399_vm0, %v262_v7, 0.0  ;;  %v246_v26 = vld [vmem:[%s8644_s0 + $0x738] sm:$0xff]  ;;  %4285 = vmatprep.subr.mxu0 %v1583_v21 }
 0x195   :  { %v3023_v36 = vrot.slane %v801_v28, %v5111_v42  ;;  %v3018_v38 = vrot.slane %v798_v33, %v5114_v43  ;;  %v233_v28 = vld [vmem:[%s8644_s0 + $0x6d0] sm:$0xff]  ;;  %v1581_v33 = vld [vmem:[%s8645_s1 + $0xe8] sm:$0xff]  ;;  %v1093_v40 = vsel %vm399_vm0, %v246_v26, 0.0  ;;  %v234_v6 = vld [vmem:[%s8644_s0 + $0x6d8] sm:$0xff] }
 0x196   :  { %v1575_v7 = vld [vmem:[%s8645_s1 + $0xb8] sm:$0xff]  ;;  %v1057_v21 = vsel %vm399_vm0, %v234_v6, 0.0 }
 0x197   :  { %v3019_v44 = vsel %vm8660_vm4, %v3018_v38, %v3014_v29  ;;  %1088 = vadd.xlane.f32.xlu1 %v1087_v34  ;;  %1049 = vadd.xlane.f32.xlu0 %v1048_v35  ;;  %v1582_v29 = vld [vmem:[%s8645_s1 + $0xf0] sm:$0xff]  ;;  %v1580_v35 = vld [vmem:[%s8645_s1 + $0xe0] sm:$0xff] }
 0x198   :  { %v807_v45 = vpop.xlane.xlu1 %806  ;;  %v3024_v47 = vsel %vm2371_vm5, %v3023_v36, %v3019_v44  ;;  %v804_v48 = vpop.xlane.xlu0 %803  ;;  %4286 = vmatpush1.msra.mxu0 %v1582_v29  ;;  %v1054_v44 = vsel %vm399_vm0, %v233_v28, 0.0 }
 0x199   :  { %v3033_v51 = vrot.slane %v807_v45, %v5123_v52  ;;  %v3028_v54 = vrot.slane %v804_v48, %v5126_v53  ;;  %4287 = vmatprep.subr.mxu0 %v1581_v33  ;;  %v1579_v45 = vld [vmem:[%s8645_s1 + $0xd8] sm:$0xff]  ;;  %v264_v33 = vld [vmem:[%s8644_s0 + $0x7c8] sm:$0xff] }
 0x19a   :  { %4288 = vmatpush1.msra.mxu0 %v1580_v35  ;;  %v1646_v35 = vld [vmem:[%s8645_s1 + $0x2f0] sm:$0xff] }
 0x19b   :  { %v3029_v58 = vsel %vm2378_vm6, %v3028_v54, %v3024_v47  ;;  %1001 = vadd.xlane.f32.xlu1 %v1000_v49  ;;  %1139 = vadd.xlane.f32.xlu0 %v1138_v50  ;;  %v217_v49 = vld [vmem:[%s8644_s0 + $0x650] sm:$0xff]  ;;  %v263_v50 = vld [vmem:[%s8644_s0 + $0x7c0] sm:$0xff]  ;;  %v1577_v54 = vld [vmem:[%s8645_s1 + $0xc8] sm:$0xff] }
 0x19c   :  { %v813_v59 = vpop.xlane.xlu1 %812  ;;  %v3034_v60 = vsel %vm2385_vm7, %v3033_v51, %v3029_v58  ;;  %v810_v62 = vpop.xlane.xlu0 %809  ;;  %v1578_v51 = vld [vmem:[%s8645_s1 + $0xd0] sm:$0xff]  ;;  %4289 = vmatprep.subr.mxu0 %v1579_v45 }
 0x19d   :  { %v3043_v2 = vrot.slane %v813_v59, %v5144_v3  ;;  %v3038_v5 = vrot.slane %v810_v62, %v5156_v9  ;;  %v1006_v62 = vsel %vm399_vm0, %v217_v49, 0.0  ;;  %4290 = vmatpush1.msra.mxu0 %v1578_v51  ;;  %v1147_v49 = vsel %vm399_vm0, %v264_v33, 0.0  ;;  %v1643_v51 = vld [vmem:[%s8645_s1 + $0x2d8] sm:$0xff]  ;;  %v1564_v33 = vld [vmem:[%s8645_s1 + $0x60] sm:$0xff] }
 0x19e   :  { %4291 = vmatprep.subr.mxu0 %v1577_v54 }
 0x19f   :  { %v3039_v10 = vsel %vm2392_vm8, %v3038_v5, %v3034_v60  ;;  %1091 = vadd.xlane.f32.xlu1 %v1090_v63  ;;  %1052 = vadd.xlane.f32.xlu0 %v1051_v0  ;;  %v1144_v63 = vsel %vm399_vm0, %v263_v50, 0.0  ;;  %v247_v5 = vld [vmem:[%s8644_s0 + $0x740] sm:$0xff]  ;;  %v248_v50 = vld [vmem:[%s8644_s0 + $0x748] sm:$0xff] }
 0x1a0   :  { %v819_v12 = vpop.xlane.xlu1 %818  ;;  %v3044_v13 = vsel %vm2399_vm9, %v3043_v2, %v3039_v10  ;;  %v816_v16 = vpop.xlane.xlu0 %815  ;;  %4292 = vmatpush1.msra.mxu0 %v1576_v11  ;;  %v1574_v10 = vld [vmem:[%s8645_s1 + $0xb0] sm:$0xff]  ;;  %v235_v11 = vld [vmem:[%s8644_s0 + $0x6e0] sm:$0xff] }
 0x1a1   :  { %v3053_v22 = vrot.slane %v819_v12, %v5164_v19  ;;  %v3048_v23 = vrot.slane %v816_v16, %v5176_v27  ;;  %4293 = vmatprep.subr.mxu0 %v1575_v7 }
 0x1a2   :  { %4294 = vmatpush1.msra.mxu0 %v1574_v10  ;;  %v1099_v10 = vsel %vm399_vm0, %v248_v50, 0.0  ;;  %v1636_v50 = vld [vmem:[%s8645_s1 + $0x2a0] sm:$0xff] }
 0x1a3   :  { %v3049_v34 = vsel %vm2406_vm10, %v3048_v23, %v3044_v13  ;;  %1004 = vadd.xlane.f32.xlu1 %v1003_v17  ;;  %1142 = vadd.xlane.f32.xlu0 %v1141_v20  ;;  %v1573_v13 = vld [vmem:[%s8645_s1 + $0xa8] sm:$0xff]  ;;  %v1096_v20 = vsel %vm399_vm0, %v247_v5, 0.0  ;;  %v1647_v23 = vld [vmem:[%s8645_s1 + $0x2f8] sm:$0xff] }
 0x1a4   :  { %v825_v36 = vpop.xlane.xlu1 %824  ;;  %v3054_v38 = vsel %vm2413_vm11, %v3053_v22, %v3049_v34  ;;  %v822_v39 = vpop.xlane.xlu0 %821  ;;  %v218_v22 = vld [vmem:[%s8644_s0 + $0x658] sm:$0xff]  ;;  %v1572_v34 = vld [vmem:[%s8645_s1 + $0xa0] sm:$0xff]  ;;  %4356 = vmatprep.subr.mxu1 %v1647_v23  ;;  %4295 = vmatprep.subr.mxu0 %v1573_v13  ;;  %v1565_v23 = vld [vmem:[%s8645_s1 + $0x68] sm:$0xff] }
 0x1a5   :  { %v3063_v47 = vrot.slane %v825_v36, %v5184_v37  ;;  %v3058_v48 = vrot.slane %v822_v39, %v5190_v41  ;;  %v1571_v36 = vld [vmem:[%s8645_s1 + $0x98] sm:$0xff]  ;;  %4357 = vmatpush1.msra.mxu1 %v1646_v35  ;;  %4296 = vmatpush1.msra.mxu0 %v1572_v34  ;;  %v219_v13 = vld [vmem:[%s8644_s0 + $0x660] sm:$0xff]  ;;  %v1637_v34 = vld [vmem:[%s8645_s1 + $0x2a8] sm:$0xff] }
 0x1a6   :  { %4297 = vmatprep.subr.mxu0 %v1571_v36 }
 0x1a7   :  { %v3059_v56 = vsel %vm2420_vm12, %v3058_v48, %v3054_v38  ;;  %1094 = vadd.xlane.f32.xlu1 %v1093_v40  ;;  %1055 = vadd.xlane.f32.xlu0 %v1054_v44  ;;  %v1645_v38 = vld [vmem:[%s8645_s1 + $0x2e8] sm:$0xff]  ;;  %v1570_v40 = vld [vmem:[%s8645_s1 + $0x90] sm:$0xff]  ;;  %v1644_v44 = vld [vmem:[%s8645_s1 + $0x2e0] sm:$0xff]  ;;  %v1009_v48 = vsel %vm399_vm0, %v218_v22, 0.0 }
 0x1a8   :  { %v831_v58 = vpop.xlane.xlu1 %830  ;;  %v3064_v59 = vsel %vm2427_vm13, %v3063_v47, %v3059_v56  ;;  %v828_v60 = vpop.xlane.xlu0 %827  ;;  %4358 = vmatprep.subr.mxu1 %v1645_v38  ;;  %4298 = vmatpush1.msra.mxu0 %v1570_v40  ;;  %v1639_v22 = vld [vmem:[%s8645_s1 + $0x2b8] sm:$0xff] }
 0x1a9   :  { %v3073_v0 = vrot.slane %v831_v58, %v5204_v55  ;;  %v3068_v2 = vrot.slane %v828_v60, %v5209_v57  ;;  %v1569_v58 = vld [vmem:[%s8645_s1 + $0x88] sm:$0xff]  ;;  %4359 = vmatpush1.msra.mxu1 %v1644_v44  ;;  %v1568_v60 = vld [vmem:[%s8645_s1 + $0x80] sm:$0xff]  ;;  %v249_v44 = vld [vmem:[%s8644_s0 + $0x750] sm:$0xff] }
 0x1aa   :  { %4360 = vmatprep.subr.mxu1 %v1643_v51  ;;  %4299 = vmatprep.subr.mxu0 %v1569_v58  ;;  %v1562_v51 = vld [vmem:[%s8645_s1 + $0x50] sm:$0xff] }
 0x1ab   :  { %v3069_v12 = vsel %vm2434_vm14, %v3068_v2, %v3064_v59  ;;  %1007 = vadd.xlane.f32.xlu1 %v1006_v62  ;;  %1145 = vadd.xlane.f32.xlu0 %v1144_v63  ;;  %v1642_v59 = vld [vmem:[%s8645_s1 + $0x2d0] sm:$0xff]  ;;  %v1641_v62 = vld [vmem:[%s8645_s1 + $0x2c8] sm:$0xff]  ;;  %v1640_v2 = vld [vmem:[%s8645_s1 + $0x2c0] sm:$0xff] }
 0x1ac   :  { %v837_v16 = vpop.xlane.xlu1 %836  ;;  %v834_v17 = vpop.xlane.xlu0 %833  ;;  %v6048_v26 = vsel %vm2441_vm15, %v3073_v0, %v3069_v12  ;;  %v1567_v0 = vld [vmem:[%s8645_s1 + $0x78] sm:$0xff]  ;;  %v1060_v12 = vsel %vm399_vm0, %v235_v11, 0.0  ;;  %4361 = vmatpush1.msra.mxu1 %v1642_v59  ;;  %4300 = vmatpush1.msra.mxu0 %v1568_v60  ;;  %v1561_v11 = vld [vmem:[%s8645_s1 + $0x48] sm:$0xff]  ;;  %v1634_v58 = vld [vmem:[%s8645_s1 + $0x290] sm:$0xff] }
 0x1ad   :  { %8674 = vst [vmem:[#allocation15_spill] sm:$0xff] %v6048_v26  ;;  %v3082_v28 = vrot.slane %v837_v16, %v5082_v25  ;;  %v3078_v29 = vrot.slane %v834_v17, %v5079_v24  ;;  %4362 = vmatprep.subr.mxu1 %v1641_v62  ;;  %4301 = vmatprep.subr.mxu0 %v1567_v0  ;;  %v302_v26 = vld [vmem:[%s8644_s0 + $0x8f8] sm:$0xff] }
 0x1ae   :  { %4363 = vmatpush1.msra.mxu1 %v1640_v2  ;;  %v220_v2 = vld [vmem:[%s8644_s0 + $0x668] sm:$0xff] }
 0x1af   :  { %v3083_v39 = vsel %vm2343_vm1, %v3082_v28, %v3078_v29  ;;  %1097 = vadd.xlane.f32.xlu1 %v1096_v20  ;;  %1058 = vadd.xlane.f32.xlu0 %v1057_v21  ;;  %v265_v20 = vld [vmem:[%s8644_s0 + $0x7d0] sm:$0xff] }
 0x1b0   :  { %v843_v45 = vpop.xlane.xlu1 %842  ;;  %v840_v47 = vpop.xlane.xlu0 %839  ;;  %v1566_v21 = vld [vmem:[%s8645_s1 + $0x70] sm:$0xff]  ;;  %v1150_v40 = vsel %vm399_vm0, %v265_v20, 0.0  ;;  %4364 = vmatprep.subr.mxu1 %v1639_v22 }
 0x1b1   :  { %v3092_v54 = vrot.slane %v843_v45, %v5096_v31  ;;  %v3087_v56 = vrot.slane %v840_v47, %v5093_v30  ;;  %v1638_v28 = vld [vmem:[%s8645_s1 + $0x2b0] sm:$0xff]  ;;  %4302 = vmatpush1.msra.mxu0 %v1566_v21  ;;  %v1631_v21 = vld [vmem:[%s8645_s1 + $0x278] sm:$0xff] }
 0x1b2   :  { %4303 = vmatprep.subr.mxu0 %v1565_v23  ;;  %4365 = vmatpush1.msra.mxu1 %v1638_v28  ;;  %v1558_v20 = vld [vmem:[%s8645_s1 + $0x30] sm:$0xff] }
 0x1b3   :  { %v3088_v63 = vsel %vm2350_vm2, %v3087_v56, %v3083_v39  ;;  %1010 = vadd.xlane.f32.xlu1 %v1009_v48  ;;  %1148 = vadd.xlane.f32.xlu0 %v1147_v49  ;;  %v1012_v39 = vsel %vm399_vm0, %v219_v13, 0.0  ;;  %v236_v48 = vld [vmem:[%s8644_s0 + $0x6e8] sm:$0xff]  ;;  %v1563_v49 = vld [vmem:[%s8645_s1 + $0x58] sm:$0xff] }
 0x1b4   :  { %v849_v5 = vpop.xlane.xlu1 %848  ;;  %v3093_v6 = vsel %vm2357_vm3, %v3092_v54, %v3088_v63  ;;  %v846_v7 = vpop.xlane.xlu0 %845  ;;  %4304 = vmatpush1.msra.mxu0 %v1564_v33  ;;  %4366 = vmatprep.subr.mxu1 %v1637_v34  ;;  %v1635_v54 = vld [vmem:[%s8645_s1 + $0x298] sm:$0xff]  ;;  %v1102_v63 = vsel %vm399_vm0, %v249_v44, 0.0  ;;  %v1063_v0 = vsel %vm399_vm0, %v236_v48, 0.0  ;;  %v1556_v44 = vld [vmem:[%s8645_s1 + $0x20] sm:$0xff] }
 0x1b5   :  { %v3102_v16 = vrot.slane %v849_v5, %v5111_v42  ;;  %v3097_v17 = vrot.slane %v846_v7, %v5114_v43  ;;  %4305 = vmatprep.subr.mxu0 %v1563_v49  ;;  %4367 = vmatpush1.msra.mxu1 %v1636_v50  ;;  %v266_v7 = vld [vmem:[%s8644_s0 + $0x7d8] sm:$0xff]  ;;  %v1628_v49 = vld [vmem:[%s8645_s1 + $0x260] sm:$0xff] }
 0x1b6   :  { %4306 = vmatpush1.msra.mxu0 %v1562_v51  ;;  %4368 = vmatprep.subr.mxu1 %v1635_v54  ;;  %v1559_v13 = vld [vmem:[%s8645_s1 + $0x38] sm:$0xff]  ;;  %v1153_v33 = vsel %vm399_vm0, %v266_v7, 0.0  ;;  %v1552_v7 = vld [vmem:[%s8645_s1] sm:$0xff] }
 0x1b7   :  { %v3098_v29 = vsel %vm8660_vm4, %v3097_v17, %v3093_v6  ;;  %1100 = vadd.xlane.f32.xlu1 %v1099_v10  ;;  %1061 = vadd.xlane.f32.xlu0 %v1060_v12  ;;  %v1560_v10 = vld [vmem:[%s8645_s1 + $0x40] sm:$0xff]  ;;  %v1633_v12 = vld [vmem:[%s8645_s1 + $0x288] sm:$0xff]  ;;  %v250_v34 = vld [vmem:[%s8644_s0 + $0x758] sm:$0xff] }
 0x1b8   :  { %v855_v35 = vpop.xlane.xlu1 %854  ;;  %v3103_v36 = vsel %vm2371_vm5, %v3102_v16, %v3098_v29  ;;  %v852_v38 = vpop.xlane.xlu0 %851  ;;  %4307 = vmatprep.subr.mxu0 %v1561_v11  ;;  %4369 = vmatpush1.msra.mxu1 %v1634_v58  ;;  %v1632_v16 = vld [vmem:[%s8645_s1 + $0x280] sm:$0xff]  ;;  %v1015_v29 = vsel %vm399_vm0, %v220_v2, 0.0  ;;  %v1555_v48 = vld [vmem:[%s8645_s1 + $0x18] sm:$0xff]  ;;  %v221_v58 = vld [vmem:[%s8644_s0 + $0x670] sm:$0xff] }
 0x1b9   :  { %v3112_v45 = vrot.slane %v855_v35, %v5123_v52  ;;  %v3107_v47 = vrot.slane %v852_v38, %v5126_v53  ;;  %4308 = vmatpush1.msra.mxu0 %v1560_v10  ;;  %4370 = vmatprep.subr.mxu1 %v1633_v12  ;;  %v237_v38 = vld [vmem:[%s8644_s0 + $0x6f0] sm:$0xff]  ;;  %v1553_v2 = vld [vmem:[%s8645_s1 + $0x8] sm:$0xff] }
 0x1ba   :  { %4309 = vmatprep.subr.mxu0 %v1559_v13  ;;  %4371 = vmatpush1.msra.mxu1 %v1632_v16  ;;  %v1066_v11 = vsel %vm399_vm0, %v237_v38, 0.0  ;;  %v1625_v10 = vld [vmem:[%s8645_s1 + $0x248] sm:$0xff]  ;;  %v1018_v16 = vsel %vm399_vm0, %v221_v58, 0.0  ;;  %v1622_v38 = vld [vmem:[%s8645_s1 + $0x230] sm:$0xff]  ;;  %v1611_v58 = vld [vmem:[%s8645_s1 + $0x1d8] sm:$0xff] }
 0x1bb   :  { %v3108_v56 = vsel %vm2378_vm6, %v3107_v47, %v3103_v36  ;;  %1013 = vadd.xlane.f32.xlu1 %v1012_v39  ;;  %1151 = vadd.xlane.f32.xlu0 %v1150_v40  ;;  %v1557_v39 = vld [vmem:[%s8645_s1 + $0x28] sm:$0xff]  ;;  %v1630_v40 = vld [vmem:[%s8645_s1 + $0x270] sm:$0xff] }
 0x1bc   :  { %v861_v59 = vpop.xlane.xlu1 %860  ;;  %v3113_v60 = vsel %vm2385_vm7, %v3112_v45, %v3108_v56  ;;  %v858_v62 = vpop.xlane.xlu0 %857  ;;  %4310 = vmatpush1.msra.mxu0 %v1558_v20  ;;  %4372 = vmatprep.subr.mxu1 %v1631_v21  ;;  %v1629_v45 = vld [vmem:[%s8645_s1 + $0x268] sm:$0xff]  ;;  %v1105_v56 = vsel %vm399_vm0, %v250_v34, 0.0  ;;  %v251_v20 = vld [vmem:[%s8644_s0 + $0x760] sm:$0xff]  ;;  %v1614_v34 = vld [vmem:[%s8645_s1 + $0x1f0] sm:$0xff] }
 0x1bd   :  { %v3122_v5 = vrot.slane %v861_v59, %v5144_v3  ;;  %v3117_v6 = vrot.slane %v858_v62, %v5156_v9  ;;  %4311 = vmatprep.subr.mxu0 %v1557_v39  ;;  %4373 = vmatpush1.msra.mxu1 %v1630_v40  ;;  %v267_v62 = vld [vmem:[%s8644_s0 + $0x7e0] sm:$0xff] }
 0x1be   :  { %4312 = vmatpush1.msra.mxu0 %v1556_v44  ;;  %4374 = vmatprep.subr.mxu1 %v1629_v45  ;;  %v1108_v45 = vsel %vm399_vm0, %v251_v20, 0.0  ;;  %v1608_v20 = vld [vmem:[%s8645_s1 + $0x1c0] sm:$0xff] }
 0x1bf   :  { %v3118_v17 = vsel %vm2392_vm8, %v3117_v6, %v3113_v60  ;;  %1103 = vadd.xlane.f32.xlu1 %v1102_v63  ;;  %1064 = vadd.xlane.f32.xlu0 %v1063_v0  ;;  %v1554_v63 = vld [vmem:[%s8645_s1 + $0x10] sm:$0xff]  ;;  %v1627_v0 = vld [vmem:[%s8645_s1 + $0x258] sm:$0xff] }
 0x1c0   :  { %v867_v22 = vpop.xlane.xlu1 %866  ;;  %v3123_v23 = vsel %vm2399_vm9, %v3122_v5, %v3118_v17  ;;  %v864_v28 = vpop.xlane.xlu0 %863  ;;  %4313 = vmatprep.subr.mxu0 %v1555_v48  ;;  %4375 = vmatpush1.msra.mxu1 %v1628_v49  ;;  %v1626_v5 = vld [vmem:[%s8645_s1 + $0x250] sm:$0xff]  ;;  %v1156_v17 = vsel %vm399_vm0, %v267_v62, 0.0  ;;  %v222_v48 = vld [vmem:[%s8644_s0 + $0x678] sm:$0xff] }
 0x1c1   :  { %v3132_v35 = vrot.slane %v867_v22, %v5164_v19  ;;  %v3127_v36 = vrot.slane %v864_v28, %v5176_v27  ;;  %4314 = vmatpush1.msra.mxu0 %v1554_v63  ;;  %4376 = vmatprep.subr.mxu1 %v1627_v0  ;;  %v238_v28 = vld [vmem:[%s8644_s0 + $0x6f8] sm:$0xff]  ;;  %v1610_v62 = vld [vmem:[%s8645_s1 + $0x1d0] sm:$0xff] }
 0x1c2   :  { %4315 = vmatprep.subr.mxu0 %v1553_v2  ;;  %4377 = vmatpush1.msra.mxu1 %v1626_v5  ;;  %v1619_v63 = vld [vmem:[%s8645_s1 + $0x218] sm:$0xff]  ;;  %v1021_v5 = vsel %vm399_vm0, %v222_v48, 0.0  ;;  %v1605_v48 = vld [vmem:[%s8645_s1 + $0x1a8] sm:$0xff] }
 0x1c3   :  { %v3128_v47 = vsel %vm2406_vm10, %v3127_v36, %v3123_v23  ;;  %1016 = vadd.xlane.f32.xlu1 %v1015_v29  ;;  %1154 = vadd.xlane.f32.xlu0 %v1153_v33  ;;  %v1615_v29 = vld [vmem:[%s8645_s1 + $0x1f8] sm:$0xff]  ;;  %v1624_v33 = vld [vmem:[%s8645_s1 + $0x240] sm:$0xff]  ;;  %v1613_v36 = vld [vmem:[%s8645_s1 + $0x1e8] sm:$0xff] }
 0x1c4   :  { %v873_v50 = vpop.xlane.xlu1 %872  ;;  %v3133_v51 = vsel %vm2413_vm11, %v3132_v35, %v3128_v47  ;;  %v870_v54 = vpop.xlane.xlu0 %869  ;;  %4316 = vmatpush1.msra.mxu0 %v1552_v7  ;;  %4378 = vmatprep.subr.mxu1 %v1625_v10  ;;  %v1623_v35 = vld [vmem:[%s8645_s1 + $0x238] sm:$0xff]  ;;  %v1069_v47 = vsel %vm399_vm0, %v238_v28, 0.0  ;;  %v269_v7 = vld [vmem:[%s8644_s0 + $0x7f0] sm:$0xff]  ;;  %v1616_v28 = vld [vmem:[%s8645_s1 + $0x200] sm:$0xff] }
 0x1c5   :  { %v3142_v59 = vrot.slane %v873_v50, %v5184_v37  ;;  %v3137_v60 = vrot.slane %v870_v54, %v5190_v41  ;;  %4317 = vmatprep.subr.mxu0 %v1615_v29  ;;  %4379 = vmatpush1.msra.mxu1 %v1624_v33  ;;  %v268_v54 = vld [vmem:[%s8644_s0 + $0x7e8] sm:$0xff] }
 0x1c6   :  { %4318 = vmatpush2.msra.mxu0 %v1614_v34  ;;  %4380 = vmatprep.subr.mxu1 %v1623_v35  ;;  %v1162_v35 = vsel %vm399_vm0, %v269_v7, 0.0  ;;  %v1676_v7 = vld [vmem:[%s8645_s1 + $0x3e0] sm:$0xff] }
 0x1c7   :  { %v3138_v6 = vsel %vm2420_vm12, %v3137_v60, %v3133_v51  ;;  %1106 = vadd.xlane.f32.xlu1 %v1105_v56  ;;  %1067 = vadd.xlane.f32.xlu0 %v1066_v11  ;;  %v1612_v56 = vld [vmem:[%s8645_s1 + $0x1e0] sm:$0xff]  ;;  %v1621_v11 = vld [vmem:[%s8645_s1 + $0x228] sm:$0xff] }
 0x1c8   :  { %v879_v12 = vpop.xlane.xlu1 %878  ;;  %v876_v13 = vpop.xlane.xlu0 %875  ;;  %v3143_v21 = vsel %vm2427_vm13, %v3142_v59, %v3138_v6  ;;  %4319 = vmatprep.subr.mxu0 %v1613_v36  ;;  %4381 = vmatpush1.msra.mxu1 %v1622_v38  ;;  %v1620_v59 = vld [vmem:[%s8645_s1 + $0x220] sm:$0xff]  ;;  %v1159_v6 = vsel %vm399_vm0, %v268_v54, 0.0  ;;  %v270_v38 = vld [vmem:[%s8644_s0 + $0x7f8] sm:$0xff] }
 0x1c9   :  { %v3152_v22 = vrot.slane %v879_v12, %v5204_v55  ;;  %v3147_v23 = vrot.slane %v876_v13, %v5209_v57  ;;  %4320 = vmatpush2.msra.mxu0 %v1612_v56  ;;  %4382 = vmatprep.subr.mxu1 %v1621_v11  ;;  %v252_v13 = vld [vmem:[%s8644_s0 + $0x768] sm:$0xff]  ;;  %v1604_v54 = vld [vmem:[%s8645_s1 + $0x1a0] sm:$0xff] }
 0x1ca   :  { %4321 = vmatprep.subr.mxu0 %v1611_v58  ;;  %4383 = vmatpush1.msra.mxu1 %v1620_v59  ;;  %v1111_v36 = vsel %vm399_vm0, %v252_v13, 0.0  ;;  %v1677_v56 = vld [vmem:[%s8645_s1 + $0x3e8] sm:$0xff] }
 0x1cb   :  { %1019 = vadd.xlane.f32.xlu1 %v1018_v16  ;;  %1157 = vadd.xlane.f32.xlu0 %v1156_v17  ;;  %v3148_v39 = vsel %vm2434_vm14, %v3147_v23, %v3143_v21  ;;  %v1609_v16 = vld [vmem:[%s8645_s1 + $0x1c8] sm:$0xff]  ;;  %v1618_v17 = vld [vmem:[%s8645_s1 + $0x210] sm:$0xff]  ;;  %v1607_v23 = vld [vmem:[%s8645_s1 + $0x1b8] sm:$0xff] }
 0x1cc   :  { %v885_v40 = vpop.xlane.xlu1 %884  ;;  %v882_v44 = vpop.xlane.xlu0 %881  ;;  %v6292_v49 = vsel %vm2441_vm15, %v3152_v22, %v3148_v39  ;;  %4322 = vmatpush2.msra.mxu0 %v1610_v62  ;;  %4384 = vmatprep.subr.mxu1 %v1619_v63  ;;  %v1617_v21 = vld [vmem:[%s8645_s1 + $0x208] sm:$0xff]  ;;  %v287_v63 = vld [vmem:[%s8644_s0 + $0x880] sm:$0xff] }
 0x1cd   :  { %8675 = vst [vmem:[#allocation16_spill] sm:$0xff] %v6292_v49  ;;  %v3161_v50 = vrot.slane %v885_v40, %v5082_v25  ;;  %v3157_v51 = vrot.slane %v882_v44, %v5079_v24  ;;  %4323 = vmatprep.subr.mxu0 %v1609_v16  ;;  %4385 = vmatpush1.msra.mxu1 %v1618_v17  ;;  %v253_v44 = vld [vmem:[%s8644_s0 + $0x770] sm:$0xff]  ;;  %v1601_v16 = vld [vmem:[%s8645_s1 + $0x188] sm:$0xff] }
 0x1ce   :  { %4324 = vmatpush2.msra.mxu0 %v1608_v20  ;;  %4386 = vmatprep.subr.mxu1 %v1617_v21  ;;  %v1114_v62 = vsel %vm399_vm0, %v253_v44, 0.0  ;;  %v1674_v17 = vld [vmem:[%s8645_s1 + $0x3d0] sm:$0xff] }
 0x1cf   :  { %v3162_v60 = vsel %vm2343_vm1, %v3161_v50, %v3157_v51  ;;  %1109 = vadd.xlane.f32.xlu1 %v1108_v45  ;;  %1070 = vadd.xlane.f32.xlu0 %v1069_v47  ;;  %v1606_v45 = vld [vmem:[%s8645_s1 + $0x1b0] sm:$0xff]  ;;  %v1679_v47 = vld [vmem:[%s8645_s1 + $0x3f8] sm:$0xff] }
 0x1d0   :  { %v891_v0 = vpop.xlane.xlu1 %890  ;;  %v888_v2 = vpop.xlane.xlu0 %887  ;;  %4325 = vmatprep.subr.mxu0 %v1607_v23  ;;  %4387 = vmatpush1.msra.mxu1 %v1616_v28  ;;  %v1678_v50 = vld [vmem:[%s8645_s1 + $0x3f0] sm:$0xff]  ;;  %v1216_v23 = vsel %vm399_vm0, %v287_v63, 0.0 }
 0x1d1   :  { %v3171_v10 = vrot.slane %v891_v0, %v5096_v31  ;;  %v3166_v12 = vrot.slane %v888_v2, %v5093_v30  ;;  %4326 = vmatpush2.msra.mxu0 %v1606_v45  ;;  %4388 = vmatprep.subr.mxu1 %v1679_v47  ;;  %v1598_v45 = vld [vmem:[%s8645_s1 + $0x170] sm:$0xff]  ;;  %v1671_v47 = vld [vmem:[%s8645_s1 + $0x3b8] sm:$0xff] }
 0x1d2   :  { %4327 = vmatprep.subr.mxu0 %v1605_v48  ;;  %4389 = vmatpush2.msra.mxu1 %v1678_v50  ;;  %v1670_v63 = vld [vmem:[%s8645_s1 + $0x3b0] sm:$0xff] }
 0x1d3   :  { %v3167_v22 = vsel %vm2350_vm2, %v3166_v12, %v3162_v60  ;;  %1022 = vadd.xlane.f32.xlu1 %v1021_v5  ;;  %1160 = vadd.xlane.f32.xlu0 %v1159_v6  ;;  %v1165_v60 = vsel %vm399_vm0, %v270_v38, 0.0  ;;  %v254_v5 = vld [vmem:[%s8644_s0 + $0x778] sm:$0xff]  ;;  %v1673_v38 = vld [vmem:[%s8645_s1 + $0x3c8] sm:$0xff] }
 0x1d4   :  { %v897_v29 = vpop.xlane.xlu1 %896  ;;  %v3172_v33 = vsel %vm2357_vm3, %v3171_v10, %v3167_v22  ;;  %v894_v34 = vpop.xlane.xlu0 %893  ;;  %v1603_v6 = vld [vmem:[%s8645_s1 + $0x198] sm:$0xff]  ;;  %4328 = vmatpush2.msra.mxu0 %v1604_v54  ;;  %v1602_v10 = vld [vmem:[%s8645_s1 + $0x190] sm:$0xff]  ;;  %4390 = vmatprep.subr.mxu1 %v1677_v56  ;;  %v1117_v28 = vsel %vm399_vm0, %v254_v5, 0.0 }
 0x1d5   :  { %v3181_v39 = vrot.slane %v897_v29, %v5111_v42  ;;  %v3176_v40 = vrot.slane %v894_v34, %v5114_v43  ;;  %v1675_v12 = vld [vmem:[%s8645_s1 + $0x3d8] sm:$0xff]  ;;  %v271_v29 = vld [vmem:[%s8644_s0 + $0x800] sm:$0xff]  ;;  %4329 = vmatprep.subr.mxu0 %v1603_v6  ;;  %4391 = vmatpush2.msra.mxu1 %v1676_v7 }
 0x1d6   :  { %4330 = vmatpush2.msra.mxu0 %v1602_v10  ;;  %4392 = vmatprep.subr.mxu1 %v1675_v12  ;;  %v1168_v54 = vsel %vm399_vm0, %v271_v29, 0.0  ;;  %v1595_v6 = vld [vmem:[%s8645_s1 + $0x158] sm:$0xff]  ;;  %v1668_v7 = vld [vmem:[%s8645_s1 + $0x3a0] sm:$0xff] }
 0x1d7   :  { %v3177_v51 = vsel %vm8660_vm4, %v3176_v40, %v3172_v33  ;;  %1163 = vadd.xlane.f32.xlu1 %v1162_v35  ;;  %1112 = vadd.xlane.f32.xlu0 %v1111_v36  ;;  %v288_v35 = vld [vmem:[%s8644_s0 + $0x888] sm:$0xff]  ;;  %v1600_v36 = vld [vmem:[%s8645_s1 + $0x180] sm:$0xff]  ;;  %v1667_v29 = vld [vmem:[%s8645_s1 + $0x398] sm:$0xff] }
 0x1d8   :  { %v903_v11 = vpop.xlane.xlu1 %902  ;;  %v3182_v58 = vsel %vm2371_vm5, %v3181_v39, %v3177_v51  ;;  %v900_v59 = vpop.xlane.xlu0 %899  ;;  %4331 = vmatprep.subr.mxu0 %v1601_v16  ;;  %v1599_v39 = vld [vmem:[%s8645_s1 + $0x178] sm:$0xff]  ;;  %4393 = vmatpush2.msra.mxu1 %v1674_v17  ;;  %v1672_v40 = vld [vmem:[%s8645_s1 + $0x3c0] sm:$0xff]  ;;  %v1219_v56 = vsel %vm399_vm0, %v288_v35, 0.0 }
 0x1d9   :  { %v3191_v0 = vrot.slane %v903_v11, %v5123_v52  ;;  %v3186_v2 = vrot.slane %v900_v59, %v5126_v53  ;;  %v289_v11 = vld [vmem:[%s8644_s0 + $0x890] sm:$0xff]  ;;  %4332 = vmatpush2.msra.mxu0 %v1600_v36  ;;  %4394 = vmatprep.subr.mxu1 %v1673_v38  ;;  %v1592_v36 = vld [vmem:[%s8645_s1 + $0x140] sm:$0xff]  ;;  %v1665_v38 = vld [vmem:[%s8645_s1 + $0x388] sm:$0xff] }
 0x1da   :  { %4333 = vmatprep.subr.mxu0 %v1599_v39  ;;  %4395 = vmatpush2.msra.mxu1 %v1672_v40  ;;  %v1222_v16 = vsel %vm399_vm0, %v289_v11, 0.0  ;;  %v1590_v11 = vld [vmem:[%s8645_s1 + $0x130] sm:$0xff] }
 0x1db   :  { %v3187_v13 = vsel %vm2378_vm6, %v3186_v2, %v3182_v58  ;;  %1166 = vadd.xlane.f32.xlu1 %v1165_v60  ;;  %1115 = vadd.xlane.f32.xlu0 %v1114_v62  ;;  %v272_v60 = vld [vmem:[%s8644_s0 + $0x808] sm:$0xff] }
 0x1dc   :  { %v909_v20 = vpop.xlane.xlu1 %908  ;;  %v3192_v21 = vsel %vm2385_vm7, %v3191_v0, %v3187_v13  ;;  %v906_v22 = vpop.xlane.xlu0 %905  ;;  %v1597_v62 = vld [vmem:[%s8645_s1 + $0x168] sm:$0xff]  ;;  %4334 = vmatpush2.msra.mxu0 %v1598_v45  ;;  %v1596_v0 = vld [vmem:[%s8645_s1 + $0x160] sm:$0xff]  ;;  %4396 = vmatprep.subr.mxu1 %v1671_v47  ;;  %v1171_v17 = vsel %vm399_vm0, %v272_v60, 0.0 }
 0x1dd   :  { %v3201_v33 = vrot.slane %v909_v20, %v5144_v3  ;;  %v3196_v34 = vrot.slane %v906_v22, %v5156_v9  ;;  %v1669_v2 = vld [vmem:[%s8645_s1 + $0x3a8] sm:$0xff]  ;;  %v290_v20 = vld [vmem:[%s8644_s0 + $0x898] sm:$0xff]  ;;  %4335 = vmatprep.subr.mxu0 %v1597_v62  ;;  %4397 = vmatpush2.msra.mxu1 %v1670_v63  ;;  %v1662_v62 = vld [vmem:[%s8645_s1 + $0x370] sm:$0xff] }
 0x1de   :  { %4336 = vmatpush2.msra.mxu0 %v1596_v0  ;;  %4398 = vmatprep.subr.mxu1 %v1669_v2  ;;  %v1225_v45 = vsel %vm399_vm0, %v290_v20, 0.0  ;;  %v1589_v60 = vld [vmem:[%s8645_s1 + $0x128] sm:$0xff]  ;;  %v1660_v20 = vld [vmem:[%s8645_s1 + $0x360] sm:$0xff] }
 0x1df   :  { %v3197_v44 = vsel %vm2392_vm8, %v3196_v34, %v3192_v21  ;;  %1217 = vadd.xlane.f32.xlu1 %v1216_v23  ;;  %1118 = vadd.xlane.f32.xlu0 %v1117_v28  ;;  %v273_v23 = vld [vmem:[%s8644_s0 + $0x810] sm:$0xff] }
 0x1e0   :  { %v915_v48 = vpop.xlane.xlu1 %914  ;;  %v3202_v50 = vsel %vm2399_vm9, %v3201_v33, %v3197_v44  ;;  %v912_v51 = vpop.xlane.xlu0 %911  ;;  %v1594_v28 = vld [vmem:[%s8645_s1 + $0x150] sm:$0xff]  ;;  %4337 = vmatprep.subr.mxu0 %v1595_v6  ;;  %v1593_v33 = vld [vmem:[%s8645_s1 + $0x148] sm:$0xff]  ;;  %4399 = vmatpush2.msra.mxu1 %v1668_v7  ;;  %v1174_v47 = vsel %vm399_vm0, %v273_v23, 0.0  ;;  %v291_v6 = vld [vmem:[%s8644_s0 + $0x8a0] sm:$0xff] }
 0x1e1   :  { %v3211_v58 = vrot.slane %v915_v48, %v5164_v19  ;;  %v3206_v59 = vrot.slane %v912_v51, %v5176_v27  ;;  %v1666_v34 = vld [vmem:[%s8645_s1 + $0x390] sm:$0xff]  ;;  %v320_v48 = vld [vmem:[%s8644_s0 + $0x988] sm:$0xff]  ;;  %4338 = vmatpush2.msra.mxu0 %v1594_v28  ;;  %4400 = vmatprep.subr.mxu1 %v1667_v29  ;;  %v319_v51 = vld [vmem:[%s8644_s0 + $0x980] sm:$0xff] }
 0x1e2   :  { %4339 = vmatprep.subr.mxu0 %v1593_v33  ;;  %4401 = vmatpush2.msra.mxu1 %v1666_v34  ;;  %v1315_v2 = vsel %vm399_vm0, %v320_v48, 0.0  ;;  %v1659_v23 = vld [vmem:[%s8645_s1 + $0x358] sm:$0xff]  ;;  %v1228_v33 = vsel %vm399_vm0, %v291_v6, 0.0  ;;  %v1657_v48 = vld [vmem:[%s8645_s1 + $0x348] sm:$0xff]  ;;  %v1654_v6 = vld [vmem:[%s8645_s1 + $0x330] sm:$0xff] }
 0x1e3   :  { %v3207_v5 = vsel %vm2406_vm10, %v3206_v59, %v3202_v50  ;;  %1169 = vadd.xlane.f32.xlu1 %v1168_v54  ;;  %1220 = vadd.xlane.f32.xlu0 %v1219_v56  ;;  %v1591_v54 = vld [vmem:[%s8645_s1 + $0x138] sm:$0xff]  ;;  %v1664_v56 = vld [vmem:[%s8645_s1 + $0x380] sm:$0xff] }
 0x1e4   :  { %v921_v10 = vpop.xlane.xlu1 %920  ;;  %v3212_v12 = vsel %vm2413_vm11, %v3211_v58, %v3207_v5  ;;  %v918_v13 = vpop.xlane.xlu0 %917  ;;  %4340 = vmatpush2.msra.mxu0 %v1592_v36  ;;  %4402 = vmatprep.subr.mxu1 %v1665_v38  ;;  %v1663_v58 = vld [vmem:[%s8645_s1 + $0x378] sm:$0xff]  ;;  %v1312_v5 = vsel %vm399_vm0, %v319_v51, 0.0 }
 0x1e5   :  { %v3221_v21 = vrot.slane %v921_v10, %v5184_v37  ;;  %v3216_v22 = vrot.slane %v918_v13, %v5190_v41  ;;  %4341 = vmatprep.subr.mxu0 %v1591_v54  ;;  %4403 = vmatpush2.msra.mxu1 %v1664_v56  ;;  %v1588_v13 = vld [vmem:[%s8645_s1 + $0x120] sm:$0xff] }
 0x1e6   :  { %4342 = vmatpush2.msra.mxu0 %v1590_v11  ;;  %4404 = vmatprep.subr.mxu1 %v1663_v58  ;;  %v1656_v54 = vld [vmem:[%s8645_s1 + $0x340] sm:$0xff] }
 0x1e7   :  { %v3217_v35 = vsel %vm2420_vm12, %v3216_v22, %v3212_v12  ;;  %1223 = vadd.xlane.f32.xlu1 %v1222_v16  ;;  %1172 = vadd.xlane.f32.xlu0 %v1171_v17  ;;  %v274_v12 = vld [vmem:[%s8644_s0 + $0x818] sm:$0xff]  ;;  %v1661_v16 = vld [vmem:[%s8645_s1 + $0x368] sm:$0xff]  ;;  %v1586_v22 = vld [vmem:[%s8645_s1 + $0x110] sm:$0xff] }
 0x1e8   :  { %v1026_v39 = vpop.xlane.xlu1 %1025  ;;  %v3222_v40 = vsel %vm2427_vm13, %v3221_v21, %v3217_v35  ;;  %v924_v44 = vpop.xlane.xlu0 %923  ;;  %4343 = vmatprep.subr.mxu0 %v1589_v60  ;;  %v1587_v17 = vld [vmem:[%s8645_s1 + $0x118] sm:$0xff]  ;;  %4405 = vmatpush2.msra.mxu1 %v1662_v62  ;;  %v1177_v34 = vsel %vm399_vm0, %v274_v12, 0.0  ;;  %v304_v35 = vld [vmem:[%s8644_s0 + $0x908] sm:$0xff] }
 0x1e9   :  { %v3226_v50 = vrot.slane %v924_v44, %v5209_v57  ;;  %v3394_v7 = vrot.slane %v1026_v39, %v5079_v24  ;;  %4344 = vmatpush2.msra.mxu0 %v1588_v13  ;;  %4406 = vmatprep.subr.mxu1 %v1661_v16  ;;  %v1585_v44 = vld [vmem:[%s8645_s1 + $0x108] sm:$0xff]  ;;  %v1267_v58 = vsel %vm399_vm0, %v304_v35, 0.0  ;;  %v1650_v35 = vld [vmem:[%s8645_s1 + $0x310] sm:$0xff] }
 0x1ea   :  { %4345 = vmatprep.subr.mxu0 %v1587_v17  ;;  %4407 = vmatpush2.msra.mxu1 %v1660_v20  ;;  %v1653_v12 = vld [vmem:[%s8645_s1 + $0x328] sm:$0xff] }
 0x1eb   :  { %v6520_v59 = vsel %vm2434_vm14, %v3226_v50, %v3222_v40  ;;  %1226 = vadd.xlane.f32.xlu1 %v1225_v45  ;;  %1175 = vadd.xlane.f32.xlu0 %v1174_v47  ;;  %v303_v40 = vld [vmem:[%s8644_s0 + $0x900] sm:$0xff]  ;;  %v1658_v45 = vld [vmem:[%s8645_s1 + $0x350] sm:$0xff] }
 0x1ec   :  { %8676 = vst [vmem:[#allocation17_spill] sm:$0xff] %v6520_v59  ;;  %v978_v63 = vpop.xlane.xlu1 %977  ;;  %v1029_v0 = vpop.xlane.xlu0 %1028  ;;  %4346 = vmatpush2.msra.mxu0 %v1586_v22  ;;  %v1584_v47 = vld [vmem:[%s8645_s1 + $0x100] sm:$0xff]  ;;  %4408 = vmatprep.subr.mxu1 %v1659_v23  ;;  %v1264_v60 = vsel %vm399_vm0, %v303_v40, 0.0  ;;  %v305_v23 = vld [vmem:[%s8644_s0 + $0x910] sm:$0xff] }
 0x1ed   :  { %v3398_v10 = vrot.slane %v1029_v0, %v5082_v25  ;;  %v3315_v36 = vrot.slane %v978_v63, %v5079_v24  ;;  %4347 = vmatprep.subr.mxu0 %v1585_v44  ;;  %4409 = vmatpush2.msra.mxu1 %v1658_v45  ;;  %v275_v0 = vld [vmem:[%s8644_s0 + $0x820] sm:$0xff] }
 0x1ee   :  { %4348 = vmatpush2.msra.mxu0 %v1584_v47  ;;  %4410 = vmatprep.subr.mxu1 %v1657_v48  ;;  %v1180_v17 = vsel %vm399_vm0, %v275_v0, 0.0  ;;  %v276_v47 = vld [vmem:[%s8644_s0 + $0x828] sm:$0xff]  ;;  %v322_v48 = vld [vmem:[%s8644_s0 + $0x998] sm:$0xff] }
 0x1ef   :  { %v3399_v21 = vsel %vm2343_vm1, %v3398_v10, %v3394_v7  ;;  %1316 = vadd.xlane.f32.xlu1 %v1315_v2  ;;  %1313 = vadd.xlane.f32.xlu0 %v1312_v5  ;;  %v321_v2 = vld [vmem:[%s8644_s0 + $0x990] sm:$0xff]  ;;  %v1655_v5 = vld [vmem:[%s8645_s1 + $0x338] sm:$0xff] }
 0x1f0   :  { %v1032_v28 = vpop.xlane.xlu1 %1031  ;;  %v981_v29 = vpop.xlane.xlu0 %980  ;;  %4411 = vmatpush2.msra.mxu1 %v1656_v54  ;;  %v1318_v20 = vsel %vm399_vm0, %v321_v2, 0.0  ;;  %v306_v2 = vld [vmem:[%s8644_s0 + $0x918] sm:$0xff] }
 0x1f1   :  { %v3403_v38 = vrot.slane %v1032_v28, %v5093_v30  ;;  %v3319_v39 = vrot.slane %v981_v29, %v5082_v25  ;;  %4412 = vmatprep.subr.mxu1 %v1655_v5  ;;  %v292_v28 = vld [vmem:[%s8644_s0 + $0x8a8] sm:$0xff]  ;;  %v1652_v29 = vld [vmem:[%s8645_s1 + $0x320] sm:$0xff]  ;;  %v293_v5 = vld [vmem:[%s8644_s0 + $0x8b0] sm:$0xff] }
 0x1f2   :  { %4413 = vmatpush2.msra.mxu1 %v1654_v6  ;;  %v1231_v40 = vsel %vm399_vm0, %v292_v28, 0.0 }
 0x1f3   :  { %v3404_v50 = vsel %vm2350_vm2, %v3403_v38, %v3399_v21  ;;  %v3320_v51 = vsel %vm2343_vm1, %v3319_v39, %v3315_v36  ;;  %1229 = vadd.xlane.f32.xlu1 %v1228_v33  ;;  %1178 = vadd.xlane.f32.xlu0 %v1177_v34  ;;  %v1651_v33 = vld [vmem:[%s8645_s1 + $0x318] sm:$0xff]  ;;  %v1270_v39 = vsel %vm399_vm0, %v305_v23, 0.0 }
 0x1f4   :  { %v1035_v56 = vpop.xlane.xlu1 %1034  ;;  %v984_v11 = vpop.xlane.xlu0 %983  ;;  %4414 = vmatprep.subr.mxu1 %v1653_v12  ;;  %v1273_v12 = vsel %vm399_vm0, %v306_v2, 0.0 }
 0x1f5   :  { %v3408_v62 = vrot.slane %v1035_v56, %v5096_v31  ;;  %v3324_v63 = vrot.slane %v984_v11, %v5093_v30  ;;  %4415 = vmatpush2.msra.mxu1 %v1652_v29 }
 0x1f6   :  { %4416 = vmatprep.subr.mxu1 %v1651_v33 }
 0x1f7   :  { %v3409_v7 = vsel %vm2357_vm3, %v3408_v62, %v3404_v50  ;;  %v3325_v10 = vsel %vm2350_vm2, %v3324_v63, %v3320_v51  ;;  %1268 = vadd.xlane.f32.xlu1 %v1267_v58  ;;  %1265 = vadd.xlane.f32.xlu0 %v1264_v60  ;;  %v1649_v50 = vld [vmem:[%s8645_s1 + $0x308] sm:$0xff]  ;;  %v1648_v51 = vld [vmem:[%s8645_s1 + $0x300] sm:$0xff]  ;;  %v1183_v60 = vsel %vm399_vm0, %v276_v47, 0.0  ;;  %v1321_v62 = vsel %vm399_vm0, %v322_v48, 0.0 }
 0x1f8   :  { %v1125_v13 = vpop.xlane.xlu1 %1124  ;;  %v1122_v16 = vpop.xlane.xlu0 %1121  ;;  %4417 = vmatpush2.msra.mxu1 %v1650_v35 }
 0x1f9   :  { %v3556_v21 = vrot.slane %v1125_v13, %v5082_v25  ;;  %v3552_v22 = vrot.slane %v1122_v16, %v5079_v24  ;;  %4418 = vmatprep.subr.mxu1 %v1649_v50  ;;  %v1234_v13 = vsel %vm399_vm0, %v293_v5, 0.0 }
 0x1fa   :  { %4419 = vmatpush2.msra.mxu1 %v1648_v51 }
 0x1fb   :  { %v3557_v34 = vsel %vm2343_vm1, %v3556_v21, %v3552_v22  ;;  %1181 = vadd.xlane.f32.xlu1 %v1180_v17  ;;  %1319 = vadd.xlane.f32.xlu0 %v1318_v20  ;;  %v277_v20 = vld [vmem:[%s8644_s0 + $0x830] sm:$0xff]  ;;  %v323_v21 = vld [vmem:[%s8644_s0 + $0x9a0] sm:$0xff] }
 0x1fc   :  { %v1038_v36 = vpop.xlane.xlu1 %1037  ;;  %v987_v38 = vpop.xlane.xlu0 %986  ;;  %v1186_v33 = vsel %vm399_vm0, %v277_v20, 0.0  ;;  %v1324_v35 = vsel %vm399_vm0, %v323_v21, 0.0  ;;  %v279_v21 = vld [vmem:[%s8644_s0 + $0x840] sm:$0xff] }
 0x1fd   :  { %v3413_v44 = vrot.slane %v1038_v36, %v5114_v43  ;;  %v3329_v45 = vrot.slane %v987_v38, %v5096_v31 }
 0x1ff   :  { %v3414_v54 = vsel %vm8660_vm4, %v3413_v44, %v3409_v7  ;;  %v3330_v56 = vsel %vm2357_vm3, %v3329_v45, %v3325_v10  ;;  %1271 = vadd.xlane.f32.xlu1 %v1270_v39  ;;  %1232 = vadd.xlane.f32.xlu0 %v1231_v40  ;;  %v307_v39 = vld [vmem:[%s8644_s0 + $0x920] sm:$0xff] }
 0x200   :  { %v1077_v11 = vpop.xlane.xlu1 %1076  ;;  %v1074_v58 = vpop.xlane.xlu0 %1073  ;;  %v1276_v48 = vsel %vm399_vm0, %v307_v39, 0.0  ;;  %v296_v39 = vld [vmem:[%s8644_s0 + $0x8c8] sm:$0xff] }
 0x201   :  { %v3477_v63 = vrot.slane %v1077_v11, %v5082_v25  ;;  %v3473_v0 = vrot.slane %v1074_v58, %v5079_v24  ;;  %v278_v11 = vld [vmem:[%s8644_s0 + $0x838] sm:$0xff] }
 0x203   :  { %v3478_v6 = vsel %vm2343_vm1, %v3477_v63, %v3473_v0  ;;  %1184 = vadd.xlane.f32.xlu1 %v1183_v60  ;;  %1322 = vadd.xlane.f32.xlu0 %v1321_v62  ;;  %v1189_v0 = vsel %vm399_vm0, %v278_v11, 0.0 }
 0x204   :  { %v990_v7 = vpop.xlane.xlu1 %989  ;;  %v1128_v10 = vpop.xlane.xlu0 %1127 }
 0x205   :  { %v3334_v16 = vrot.slane %v990_v7, %v5114_v43  ;;  %v3561_v17 = vrot.slane %v1128_v10, %v5093_v30  ;;  %v295_v7 = vld [vmem:[%s8644_s0 + $0x8c0] sm:$0xff] }
 0x207   :  { %v3335_v22 = vsel %vm8660_vm4, %v3334_v16, %v3330_v56  ;;  %v3562_v23 = vsel %vm2350_vm2, %v3561_v17, %v3557_v34  ;;  %1274 = vadd.xlane.f32.xlu1 %v1273_v12  ;;  %1235 = vadd.xlane.f32.xlu0 %v1234_v13  ;;  %v294_v34 = vld [vmem:[%s8644_s0 + $0x8b8] sm:$0xff]  ;;  %v1240_v17 = vsel %vm399_vm0, %v295_v7, 0.0 }
 0x208   :  { %v1080_v28 = vpop.xlane.xlu1 %1079  ;;  %v1041_v29 = vpop.xlane.xlu0 %1040  ;;  %v1237_v50 = vsel %vm399_vm0, %v294_v34, 0.0 }
 0x209   :  { %v3482_v36 = vrot.slane %v1080_v28, %v5093_v30  ;;  %v3418_v38 = vrot.slane %v1041_v29, %v5111_v42 }
 0x20b   :  { %v3483_v40 = vsel %vm2350_vm2, %v3482_v36, %v3478_v6  ;;  %v6679_v44 = vsel %vm2371_vm5, %v3418_v38, %v3414_v54  ;;  %1187 = vadd.xlane.f32.xlu1 %v1186_v33  ;;  %1325 = vadd.xlane.f32.xlu0 %v1324_v35  ;;  %v324_v54 = vld [vmem:[%s8644_s0 + $0x9a8] sm:$0xff]  ;;  %v1192_v33 = vsel %vm399_vm0, %v279_v21, 0.0  ;;  %v309_v38 = vld [vmem:[%s8644_s0 + $0x930] sm:$0xff] }
 0x20c   :  { %v993_v45 = vpop.xlane.xlu1 %992  ;;  %v1131_v47 = vpop.xlane.xlu0 %1130  ;;  %v1327_v2 = vsel %vm399_vm0, %v324_v54, 0.0  ;;  %v308_v6 = vld [vmem:[%s8644_s0 + $0x928] sm:$0xff] }
 0x20d   :  { %v3339_v51 = vrot.slane %v993_v45, %v5111_v42  ;;  %v3566_v56 = vrot.slane %v1131_v47, %v5096_v31  ;;  %v1279_v16 = vsel %vm399_vm0, %v308_v6, 0.0  ;;  %v1282_v47 = vsel %vm399_vm0, %v309_v38, 0.0 }
 0x20f   :  { %v6692_v58 = vsel %vm2371_vm5, %v3339_v51, %v3335_v22  ;;  %v3567_v60 = vsel %vm2357_vm3, %v3566_v56, %v3562_v23  ;;  %1277 = vadd.xlane.f32.xlu1 %v1276_v48  ;;  %1238 = vadd.xlane.f32.xlu0 %v1237_v50  ;;  %v325_v22 = vld [vmem:[%s8644_s0 + $0x9b0] sm:$0xff]  ;;  %v1243_v48 = vsel %vm399_vm0, %v296_v39, 0.0  ;;  %v280_v50 = vld [vmem:[%s8644_s0 + $0x848] sm:$0xff]  ;;  %v326_v51 = vld [vmem:[%s8644_s0 + $0x9b8] sm:$0xff] }
 0x210   :  { %v1083_v62 = vpop.xlane.xlu1 %1082  ;;  %v6695_v63 = vpop.xlane.xlu0 %1043  ;;  %v1330_v35 = vsel %vm399_vm0, %v325_v22, 0.0  ;;  %v1195_v54 = vsel %vm399_vm0, %v280_v50, 0.0  ;;  %v328_v50 = vld [vmem:[%s8644_s0 + $0x9c8] sm:$0xff] }
 0x211   :  { %v3487_v5 = vrot.slane %v1083_v62, %v5096_v31  ;;  %v1711_v62 = vld [vmem:[%s8645_s1 + $0x4f8] sm:$0xff] }
 0x212   :  { %4427 = vmatprep.subr.mxu0 %v1711_v62  ;;  %v1339_v62 = vsel %vm399_vm0, %v328_v50, 0.0 }
 0x213   :  { %v3488_v10 = vsel %vm2357_vm3, %v3487_v5, %v3483_v40  ;;  %1190 = vadd.xlane.f32.xlu1 %v1189_v0  ;;  %1328 = vadd.xlane.f32.xlu0 %v1327_v2  ;;  %v310_v0 = vld [vmem:[%s8644_s0 + $0x938] sm:$0xff]  ;;  %v297_v2 = vld [vmem:[%s8644_s0 + $0x8d0] sm:$0xff] }
 0x214   :  { %v6707_v12 = vpop.xlane.xlu1 %995  ;;  %v1134_v13 = vpop.xlane.xlu0 %1133  ;;  %v1285_v7 = vsel %vm399_vm0, %v310_v0, 0.0  ;;  %v312_v0 = vld [vmem:[%s8644_s0 + $0x948] sm:$0xff] }
 0x215   :  { %v3571_v20 = vrot.slane %v1134_v13, %v5114_v43  ;;  %v281_v13 = vld [vmem:[%s8644_s0 + $0x850] sm:$0xff] }
 0x216   :  { %v1198_v21 = vsel %vm399_vm0, %v281_v13, 0.0  ;;  %v1291_v13 = vsel %vm399_vm0, %v312_v0, 0.0 }
 0x217   :  { %v6719_v23 = vsel %vm8660_vm4, %v3571_v20, %v3567_v60  ;;  %1280 = vadd.xlane.f32.xlu1 %v1279_v16  ;;  %1241 = vadd.xlane.f32.xlu0 %v1240_v17  ;;  %v1333_v60 = vsel %vm399_vm0, %v326_v51, 0.0  ;;  %v327_v16 = vld [vmem:[%s8644_s0 + $0x9c0] sm:$0xff] }
 0x218   :  { %v1086_v28 = vpop.xlane.xlu1 %1085  ;;  %v6721_v29 = vpop.xlane.xlu0 %1046  ;;  %v1336_v22 = vsel %vm399_vm0, %v327_v16, 0.0 }
 0x219   :  { %v3492_v36 = vrot.slane %v1086_v28, %v5114_v43  ;;  %v311_v28 = vld [vmem:[%s8644_s0 + $0x940] sm:$0xff] }
 0x21a   :  { %v1288_v38 = vsel %vm399_vm0, %v311_v28, 0.0 }
 0x21b   :  { %v6733_v34 = vsel %vm8660_vm4, %v3492_v36, %v3488_v10  ;;  %1193 = vadd.xlane.f32.xlu1 %v1192_v33  ;;  %1331 = vadd.xlane.f32.xlu0 %v1330_v35  ;;  %v1246_v10 = vsel %vm399_vm0, %v297_v2, 0.0  ;;  %v298_v33 = vld [vmem:[%s8644_s0 + $0x8d8] sm:$0xff]  ;;  %v299_v2 = vld [vmem:[%s8644_s0 + $0x8e0] sm:$0xff]  ;;  %vm8661_vm4 = vcmask 1041409  }
 0x21c   :  { %v6735_v40 = vpop.xlane.xlu1 %998  ;;  %v6737_v45 = vpop.xlane.xlu0 %1136  ;;  %v1249_v39 = vsel %vm399_vm0, %v298_v33, 0.0  ;;  %v1252_v16 = vsel %vm399_vm0, %v299_v2, 0.0  ;;  %v284_v2 = vld [vmem:[%s8644_s0 + $0x868] sm:$0xff] }
 0x21f   :  { %1283 = vadd.xlane.f32.xlu1 %v1282_v47  ;;  %1244 = vadd.xlane.f32.xlu0 %v1243_v48  ;;  %v1775_v47 = vld [vmem:[%s8645_s1 + $0x6f8] sm:$0xff] }
 0x220   :  { %v6747_v56 = vpop.xlane.xlu1 %1088  ;;  %v6749_v11 = vpop.xlane.xlu0 %1049  ;;  %v282_v48 = vld [vmem:[%s8644_s0 + $0x858] sm:$0xff]  ;;  %4498 = vmatprep.subr.mxu1 %v1775_v47  ;;  %v313_v47 = vld [vmem:[%s8644_s0 + $0x950] sm:$0xff] }
 0x221   :  { %v3433_v18 = vrot.slane %v6749_v11, %v5156_v9  ;;  %v351_v11 = vld [vmem:[%s8644_s0 + $0xa80] sm:$0xff] }
 0x223   :  { %1196 = vadd.xlane.f32.xlu1 %v1195_v54  ;;  %1334 = vadd.xlane.f32.xlu0 %v1333_v60  ;;  %v1201_v60 = vsel %vm399_vm0, %v282_v48, 0.0  ;;  %v300_v48 = vld [vmem:[%s8644_s0 + $0x8e8] sm:$0xff] }
 0x224   :  { %v6762_v5 = vpop.xlane.xlu1 %1001  ;;  %v6764_v6 = vpop.xlane.xlu0 %1139  ;;  %v1255_v0 = vsel %vm399_vm0, %v300_v48, 0.0 }
 0x227   :  { %1286 = vadd.xlane.f32.xlu1 %v1285_v7  ;;  %1247 = vadd.xlane.f32.xlu0 %v1246_v10 }
 0x228   :  { %v6774_v17 = vpop.xlane.xlu1 %1091  ;;  %v6776_v20 = vpop.xlane.xlu0 %1052 }
 0x22b   :  { %1199 = vadd.xlane.f32.xlu1 %v1198_v21  ;;  %1337 = vadd.xlane.f32.xlu0 %v1336_v22  ;;  %v283_v21 = vld [vmem:[%s8644_s0 + $0x860] sm:$0xff]  ;;  %v329_v22 = vld [vmem:[%s8644_s0 + $0x9d0] sm:$0xff] }
 0x22c   :  { %v6786_v35 = vpop.xlane.xlu1 %1004  ;;  %v6788_v36 = vpop.xlane.xlu0 %1142 }
 0x22f   :  { %1289 = vadd.xlane.f32.xlu1 %v1288_v38  ;;  %1250 = vadd.xlane.f32.xlu0 %v1249_v39  ;;  %v1204_v38 = vsel %vm399_vm0, %v283_v21, 0.0  ;;  %v1342_v39 = vsel %vm399_vm0, %v329_v22, 0.0  ;;  %v1207_v22 = vsel %vm399_vm0, %v284_v2, 0.0 }
 0x230   :  { %v6801_v51 = vpop.xlane.xlu1 %1094  ;;  %v6803_v54 = vpop.xlane.xlu0 %1055 }
 0x233   :  { %1202 = vadd.xlane.f32.xlu1 %v1201_v60  ;;  %1340 = vadd.xlane.f32.xlu0 %v1339_v62  ;;  %v1294_v62 = vsel %vm399_vm0, %v313_v47, 0.0  ;;  %v301_v47 = vld [vmem:[%s8644_s0 + $0x8f0] sm:$0xff] }
 0x234   :  { %v6813_v7 = vpop.xlane.xlu1 %1007  ;;  %v6815_v10 = vpop.xlane.xlu0 %1145  ;;  %v1258_v2 = vsel %vm399_vm0, %v301_v47, 0.0  ;;  %v315_v47 = vld [vmem:[%s8644_s0 + $0x960] sm:$0xff] }
 0x235   :  { %v1300_v49 = vsel %vm399_vm0, %v315_v47, 0.0  ;;  %v316_v47 = vld [vmem:[%s8644_s0 + $0x968] sm:$0xff] }
 0x236   :  { %v1303_v25 = vsel %vm399_vm0, %v316_v47, 0.0 }
 0x237   :  { %1292 = vadd.xlane.f32.xlu1 %v1291_v13  ;;  %1253 = vadd.xlane.f32.xlu0 %v1252_v16  ;;  %v330_v13 = vld [vmem:[%s8644_s0 + $0x9d8] sm:$0xff] }
 0x238   :  { %v6825_v28 = vpop.xlane.xlu1 %1097  ;;  %v6827_v33 = vpop.xlane.xlu0 %1058 }
 0x239   :  { %v3448_v47 = vrot.slane %v6827_v33, %v5164_v19 }
 0x23b   :  { %1205 = vadd.xlane.f32.xlu1 %v1204_v38  ;;  %1343 = vadd.xlane.f32.xlu0 %v1342_v39  ;;  %v1345_v38 = vsel %vm399_vm0, %v330_v13, 0.0  ;;  %v314_v39 = vld [vmem:[%s8644_s0 + $0x958] sm:$0xff]  ;;  %v285_v13 = vld [vmem:[%s8644_s0 + $0x870] sm:$0xff] }
 0x23c   :  { %v6837_v50 = vpop.xlane.xlu1 %1010  ;;  %v6839_v60 = vpop.xlane.xlu0 %1148  ;;  %v1210_v59 = vsel %vm399_vm0, %v285_v13, 0.0  ;;  %v1261_v13 = vsel %vm399_vm0, %v302_v26, 0.0  ;;  %v3428_v26 = vrot.slane %v6721_v29, %v5123_v52  ;;  %v1351_v29 = vsel %vm399_vm0, %v332_v4, 0.0 }
 0x23d   :  { %v3443_v4 = vrot.slane %v6803_v54, %v5176_v27  ;;  %v3354_v54 = vrot.slane %v6762_v5, %v5156_v9  ;;  %v3359_v5 = vrot.slane %v6786_v35, %v5144_v3  ;;  %v3369_v35 = vrot.slane %v6837_v50, %v5164_v19 }
 0x23f   :  { %1295 = vadd.xlane.f32.xlu1 %v1294_v62  ;;  %1256 = vadd.xlane.f32.xlu0 %v1255_v0  ;;  %v1297_v0 = vsel %vm399_vm0, %v314_v39, 0.0  ;;  %v1348_v39 = vsel %vm399_vm0, %v331_v14, 0.0  ;;  %v286_v14 = vld [vmem:[%s8644_s0 + $0x878] sm:$0xff] }
 0x240   :  { %v6849_v16 = vpop.xlane.xlu1 %1100  ;;  %v6851_v21 = vpop.xlane.xlu0 %1061  ;;  %v1213_v31 = vsel %vm399_vm0, %v286_v14, 0.0  ;;  %v1357_v14 = vsel %vm399_vm0, %v334_v1, 0.0 }
 0x241   :  { %v3453_v1 = vrot.slane %v6851_v21, %v5190_v41  ;;  %v3576_v21 = vrot.slane %v6737_v45, %v5111_v42 }
 0x243   :  { %1208 = vadd.xlane.f32.xlu1 %v1207_v22  ;;  %1346 = vadd.xlane.f32.xlu0 %v1345_v38 }
 0x244   :  { %v6861_v48 = vpop.xlane.xlu1 %1013  ;;  %v6863_v62 = vpop.xlane.xlu0 %1151 }
 0x247   :  { %1298 = vadd.xlane.f32.xlu1 %v1297_v0  ;;  %1259 = vadd.xlane.f32.xlu0 %v1258_v2 }
 0x248   :  { %v6873_v22 = vpop.xlane.xlu1 %1103  ;;  %v6875_v38 = vpop.xlane.xlu0 %1064 }
 0x249   :  { %v3458_v33 = vrot.slane %v6875_v38, %v5184_v37 }
 0x24b   :  { %1211 = vadd.xlane.f32.xlu1 %v1210_v59  ;;  %1349 = vadd.xlane.f32.xlu0 %v1348_v39  ;;  %v3423_v59 = vrot.slane %v6695_v63, %v5126_v53  ;;  %v333_v39 = vld [vmem:[%s8644_s0 + $0x9f0] sm:$0xff] }
 0x24c   :  { %v6885_v0 = vpop.xlane.xlu1 %1016  ;;  %v6887_v2 = vpop.xlane.xlu0 %1154  ;;  %v317_v63 = vld [vmem:[%s8644_s0 + $0x970] sm:$0xff]  ;;  %v1354_v30 = vsel %vm399_vm0, %v333_v39, 0.0  ;;  %v3349_v39 = vrot.slane %v6735_v40, %v5123_v52  ;;  %v318_v40 = vld [vmem:[%s8644_s0 + $0x978] sm:$0xff] }
 0x24d   :  { %v3424_v24 = vsel %vm2378_vm6, %v3423_v59, %v6679_v44  ;;  %v1309_v38 = vsel %vm399_vm0, %v318_v40, 0.0 }
 0x24f   :  { %1301 = vadd.xlane.f32.xlu1 %v1300_v49  ;;  %1262 = vadd.xlane.f32.xlu0 %v1261_v13  ;;  %v3344_v49 = vrot.slane %v6707_v12, %v5126_v53  ;;  %v3438_v13 = vrot.slane %v6776_v20, %v5144_v3  ;;  %v1306_v12 = vsel %vm399_vm0, %v317_v63, 0.0  ;;  %v3429_v20 = vsel %vm2385_vm7, %v3428_v26, %v3424_v24 }
 0x250   :  { %v6915_v8 = vpop.xlane.xlu1 %1106  ;;  %v1068_v43 = vpop.xlane.xlu0 %1067  ;;  %v3434_v44 = vsel %vm2392_vm8, %v3433_v18, %v3429_v20  ;;  %v1408_v24 = vsel %vm399_vm0, %v351_v11, 0.0 }
 0x251   :  { %v3439_v18 = vsel %vm2399_vm9, %v3438_v13, %v3434_v44  ;;  %v3463_v11 = vrot.slane %v1068_v43, %v5209_v57  ;;  %v3581_v13 = vrot.slane %v6764_v6, %v5126_v53  ;;  %v3374_v43 = vrot.slane %v6861_v48, %v5190_v41 }
 0x252   :  { %v3444_v26 = vsel %vm2406_vm10, %v3443_v4, %v3439_v18  ;;  %v3591_v18 = vrot.slane %v6815_v10, %v5156_v9 }
 0x253   :  { %1214 = vadd.xlane.f32.xlu1 %v1213_v31  ;;  %1352 = vadd.xlane.f32.xlu0 %v1351_v29  ;;  %v3345_v31 = vsel %vm2378_vm6, %v3344_v49, %v6692_v58  ;;  %v3364_v29 = vrot.slane %v6813_v7, %v5176_v27  ;;  %v3449_v49 = vsel %vm2413_vm11, %v3448_v47, %v3444_v26 }
 0x254   :  { %v1020_v59 = vpop.xlane.xlu1 %1019  ;;  %v6944_v63 = vpop.xlane.xlu0 %1157  ;;  %v3350_v58 = vsel %vm2385_vm7, %v3349_v39, %v3345_v31  ;;  %v3454_v7 = vsel %vm2420_vm12, %v3453_v1, %v3449_v49  ;;  %v3379_v39 = vrot.slane %v6885_v0, %v5184_v37  ;;  %v3586_v47 = vrot.slane %v6788_v36, %v5123_v52 }
 0x255   :  { %v3355_v45 = vsel %vm2392_vm8, %v3354_v54, %v3350_v58  ;;  %v3459_v50 = vsel %vm2427_vm13, %v3458_v33, %v3454_v7  ;;  %v3384_v44 = vrot.slane %v1020_v59, %v5209_v57  ;;  %v3577_v1 = vsel %vm2371_vm5, %v3576_v21, %v6719_v23 }
 0x256   :  { %v3464_v54 = vsel %vm2434_vm14, %v3463_v11, %v3459_v50  ;;  %v3497_v36 = vrot.slane %v6747_v56, %v5111_v42  ;;  %v3596_v21 = vrot.slane %v6839_v60, %v5144_v3  ;;  %v3502_v26 = vrot.slane %v6774_v17, %v5126_v53  ;;  %v1710_v17 = vld [vmem:[%s8645_s1 + $0x4f0] sm:$0xff]  ;;  %v1708_v50 = vld [vmem:[%s8645_s1 + $0x4e0] sm:$0xff] }
 0x257   :  { %1355 = vadd.xlane.f32.xlu1 %v1354_v30  ;;  %1304 = vadd.xlane.f32.xlu0 %v1303_v25  ;;  %v335_v30 = vld [vmem:[%s8644_s0 + $0xa00] sm:$0xff]  ;;  %v3360_v25 = vsel %vm2399_vm9, %v3359_v5, %v3355_v45  ;;  %v3507_v58 = vrot.slane %v6801_v51, %v5123_v52  ;;  %v3606_v60 = vrot.slane %v6887_v2, %v5164_v19 }
 0x258   :  { %v6974_v4 = vpop.xlane.xlu1 %1109  ;;  %v1071_v20 = vpop.xlane.xlu0 %1070  ;;  %v3365_v48 = vsel %vm2406_vm10, %v3364_v29, %v3360_v25  ;;  %v1360_v31 = vsel %vm399_vm0, %v335_v30, 0.0  ;;  %v3512_v45 = vrot.slane %v6825_v28, %v5156_v9  ;;  %v3611_v51 = vrot.slane %v6944_v63, %v5190_v41  ;;  %v336_v63 = vld [vmem:[%s8644_s0 + $0xa08] sm:$0xff] }
 0x259   :  { %v3468_v6 = vrot.slane %v1071_v20, %v5204_v55  ;;  %v3370_v40 = vsel %vm2413_vm11, %v3369_v35, %v3365_v48  ;;  %v3498_v7 = vsel %vm2371_vm5, %v3497_v36, %v6733_v34  ;;  %v3517_v28 = vrot.slane %v6849_v16, %v5144_v3 }
 0x25a   :  { %v3375_v59 = vsel %vm2420_vm12, %v3374_v43, %v3370_v40  ;;  %v3503_v30 = vsel %vm2378_vm6, %v3502_v26, %v3498_v7  ;;  %v3522_v25 = vrot.slane %v6873_v22, %v5176_v27  ;;  %v1707_v22 = vld [vmem:[%s8645_s1 + $0x4d8] sm:$0xff]  ;;  %v1363_v36 = vsel %vm399_vm0, %v336_v63, 0.0  ;;  %v1704_v26 = vld [vmem:[%s8645_s1 + $0x4c0] sm:$0xff] }
 0x25b   :  { %1358 = vadd.xlane.f32.xlu1 %v1357_v14  ;;  %1307 = vadd.xlane.f32.xlu0 %v1306_v12  ;;  %v3469_v0 = vsel %vm2441_vm15, %v3468_v6, %v3464_v54  ;;  %v352_v14 = vld [vmem:[%s8644_s0 + $0xa88] sm:$0xff]  ;;  %v3582_v12 = vsel %vm2378_vm6, %v3581_v13, %v3577_v1  ;;  %v3380_v56 = vsel %vm2427_vm13, %v3379_v39, %v3375_v59 }
 0x25c   :  { %v1023_v5 = vpop.xlane.xlu1 %1022  ;;  %v1161_v33 = vpop.xlane.xlu0 %1160  ;;  %v4262_v23 = vsel %vm8661_vm4, %v3469_v0, %v5330_v61  ;;  %v3587_v29 = vsel %vm2385_vm7, %v3586_v47, %v3582_v12  ;;  %v3601_v61 = vrot.slane %v6863_v62, %v5176_v27  ;;  %v3385_v11 = vsel %vm2434_vm14, %v3384_v44, %v3380_v56 }
 0x25d   :  { %v3389_v10 = vrot.slane %v1023_v5, %v5204_v55  ;;  %4349 = vmatprep.mubr.f32.mxu0 %v4262_v23  ;;  %v1411_v35 = vsel %vm399_vm0, %v352_v14, 0.0  ;;  %v3592_v62 = vsel %vm2392_vm8, %v3591_v18, %v3587_v29  ;;  %v3616_v20 = vrot.slane %v1161_v33, %v5184_v37  ;;  %v192_v5 = vld [vmem:[%s8644_s0 + $0x588] sm:$0xff]  ;;  %v1706_v33 = vld [vmem:[%s8645_s1 + $0x4d0] sm:$0xff] }
 0x25e   :  { %v3597_v43 = vsel %vm2399_vm9, %v3596_v21, %v3592_v62  ;;  %v3508_v39 = vsel %vm2385_vm7, %v3507_v58, %v3503_v30  ;;  %v3527_v47 = vrot.slane %v6915_v8, %v5164_v19  ;;  %v3532_v1 = vrot.slane %v6974_v4, %v5190_v41  ;;  %v191_v4 = vld [vmem:[%s8644_s0 + $0x580] sm:$0xff]  ;;  %v1705_v21 = vld [vmem:[%s8645_s1 + $0x4c8] sm:$0xff]  ;;  %v354_v62 = vld [vmem:[%s8644_s0 + $0xa98] sm:$0xff] }
 0x25f   :  { %1409 = vadd.xlane.f32.xlu1 %v1408_v24  ;;  %1310 = vadd.xlane.f32.xlu0 %v1309_v38  ;;  %v3390_v49 = vsel %vm2441_vm15, %v3389_v10, %v3385_v11  ;;  %v353_v38 = vld [vmem:[%s8644_s0 + $0xa90] sm:$0xff]  ;;  %v3602_v34 = vsel %vm2406_vm10, %v3601_v61, %v3597_v43  ;;  %v3513_v44 = vsel %vm2392_vm8, %v3512_v45, %v3508_v39  ;;  %v1773_v39 = vld [vmem:[%s8645_s1 + $0x6e8] sm:$0xff] }
 0x260   :  { %v1164_v13 = vpop.xlane.xlu1 %1163  ;;  %v1113_v2 = vpop.xlane.xlu0 %1112  ;;  %v4261_v24 = vsel %vm8661_vm4, %v3390_v49, %v5233_v15  ;;  %v1709_v15 = vld [vmem:[%s8645_s1 + $0x4e8] sm:$0xff]  ;;  %v3607_v6 = vsel %vm2413_vm11, %v3606_v60, %v3602_v34  ;;  %v1414_v48 = vsel %vm399_vm0, %v353_v38, 0.0  ;;  %v3518_v8 = vsel %vm2399_vm9, %v3517_v28, %v3513_v44  ;;  %v337_v45 = vld [vmem:[%s8644_s0 + $0xa10] sm:$0xff]  ;;  %v1771_v44 = vld [vmem:[%s8645_s1 + $0x6d8] sm:$0xff] }
 0x261   :  { %4350 = vmatmul.mubr.f32.vlgmr.msra.gmra.mxu0 %v4261_v24  ;;  %v3621_v16 = vrot.slane %v1164_v13, %v5209_v57  ;;  %v3612_v54 = vsel %vm2420_vm12, %v3611_v51, %v3607_v6  ;;  %v3537_v18 = vrot.slane %v1113_v2, %v5184_v37  ;;  %v3523_v23 = vsel %vm2406_vm10, %v3522_v25, %v3518_v8  ;;  %v1702_v13 = vld [vmem:[%s8645_s1 + $0x4b0] sm:$0xff]  ;;  %v1701_v24 = vld [vmem:[%s8645_s1 + $0x4a8] sm:$0xff]  ;;  %v1699_v6 = vld [vmem:[%s8645_s1 + $0x498] sm:$0xff] }
 0x262   :  { %4428 = vmatpush1.msra.mxu0 %v1710_v17  ;;  %v3528_v56 = vsel %vm2413_vm11, %v3527_v47, %v3523_v23  ;;  %v931_v60 = vsel %vm399_vm0, %v192_v5, 0.0  ;;  %v928_v49 = vsel %vm399_vm0, %v191_v4, 0.0  ;;  %v1774_v38 = vld [vmem:[%s8645_s1 + $0x6f0] sm:$0xff]  ;;  %v1366_v63 = vsel %vm399_vm0, %v337_v45, 0.0  ;;  %v1772_v47 = vld [vmem:[%s8645_s1 + $0x6e0] sm:$0xff]  ;;  %v1697_v4 = vld [vmem:[%s8645_s1 + $0x488] sm:$0xff] }
 0x263   :  { %1361 = vadd.xlane.f32.xlu1 %v1360_v31  ;;  %1412 = vadd.xlane.f32.xlu0 %v1411_v35  ;;  %v3617_v31 = vsel %vm2427_vm13, %v3616_v20, %v3612_v54  ;;  %v3533_v29 = vsel %vm2420_vm12, %v3532_v1, %v3528_v56  ;;  %v1417_v20 = vsel %vm399_vm0, %v354_v62, 0.0  ;;  %v8677_v30 = vld [vmem:[#allocation6_spill] sm:$0xff]  ;;  %v8678_v25 = vld [vmem:[#allocation7_spill] sm:$0xff]  ;;  %v1696_v23 = vld [vmem:[%s8645_s1 + $0x480] sm:$0xff] }
 0x264   :  { %v1167_v40 = vpop.xlane.xlu1 %1166  ;;  %v1116_v0 = vpop.xlane.xlu0 %1115  ;;  %4429 = vmatprep.subr.mxu0 %v1709_v15  ;;  %v3622_v12 = vsel %vm2434_vm14, %v3621_v16, %v3617_v31  ;;  %v3538_v35 = vsel %vm2427_vm13, %v3537_v18, %v3533_v29  ;;  %v384_v15 = vld [vmem:[%s8644_s0 + $0xb88] sm:$0xff]  ;;  %v8679_v31 = vld [vmem:[#allocation8_spill] sm:$0xff]  ;;  %v193_v5 = vld [vmem:[%s8644_s0 + $0x590] sm:$0xff] }
 0x265   :  { %v3626_v59 = vrot.slane %v1167_v40, %v5204_v55  ;;  %4430 = vmatpush1.msra.mxu0 %v1708_v50  ;;  %v3542_v14 = vrot.slane %v1116_v0, %v5209_v57  ;;  %v383_v50 = vld [vmem:[%s8644_s0 + $0xb80] sm:$0xff]  ;;  %v1507_v40 = vsel %vm399_vm0, %v384_v15, 0.0  ;;  %v1695_v56 = vld [vmem:[%s8645_s1 + $0x478] sm:$0xff]  ;;  %v1694_v62 = vld [vmem:[%s8645_s1 + $0x470] sm:$0xff] }
 0x266   :  { %4431 = vmatprep.subr.mxu0 %v1707_v22  ;;  %v1698_v22 = vld [vmem:[%s8645_s1 + $0x490] sm:$0xff]  ;;  %v1504_v0 = vsel %vm399_vm0, %v383_v50, 0.0  ;;  %v1767_v45 = vld [vmem:[%s8645_s1 + $0x6b8] sm:$0xff] }
 0x267   :  { %1415 = vadd.xlane.f32.xlu1 %v1414_v48  ;;  %1364 = vadd.xlane.f32.xlu0 %v1363_v36  ;;  %v3627_v10 = vsel %vm2441_vm15, %v3626_v59, %v3622_v12  ;;  %v3543_v51 = vsel %vm2434_vm14, %v3542_v14, %v3538_v35  ;;  %v338_v36 = vld [vmem:[%s8644_s0 + $0xa18] sm:$0xff]  ;;  %v1769_v14 = vld [vmem:[%s8645_s1 + $0x6c8] sm:$0xff] }
 0x268   :  { %v1218_v61 = vpop.xlane.xlu1 %1217  ;;  %v1119_v11 = vpop.xlane.xlu0 %1118  ;;  %v4264_v58 = vsel %vm8661_vm4, %v3627_v10, %v5524_v32  ;;  %4432 = vmatpush1.msra.mxu0 %v1706_v33  ;;  %v1703_v32 = vld [vmem:[%s8645_s1 + $0x4b8] sm:$0xff]  ;;  %v1770_v33 = vld [vmem:[%s8645_s1 + $0x6d0] sm:$0xff]  ;;  %v1768_v10 = vld [vmem:[%s8645_s1 + $0x6c0] sm:$0xff] }
 0x269   :  { %v3547_v17 = vrot.slane %v1119_v11, %v5204_v55  ;;  %4420 = vmatprep.mubr.f32.mxu1 %v4264_v58  ;;  %4433 = vmatprep.subr.mxu0 %v1705_v21  ;;  %v3710_v34 = vrot.slane %v1218_v61, %v8677_v30  ;;  %v1369_v61 = vsel %vm399_vm0, %v338_v36, 0.0  ;;  %v934_v11 = vsel %vm399_vm0, %v193_v5, 0.0  ;;  %v367_v58 = vld [vmem:[%s8644_s0 + $0xb00] sm:$0xff]  ;;  %v1691_v50 = vld [vmem:[%s8645_s1 + $0x458] sm:$0xff]  ;;  %v8681_v36 = vld [vmem:[#allocation10_spill] sm:$0xff] }
 0x26a   :  { %4434 = vmatpush1.msra.mxu0 %v1704_v26  ;;  %v1688_v5 = vld [vmem:[%s8645_s1 + $0x440] sm:$0xff] }
 0x26b   :  { %932 = vadd.xlane.f32.xlu1 %v931_v60  ;;  %929 = vadd.xlane.f32.xlu0 %v928_v49  ;;  %v3548_v2 = vsel %vm2441_vm15, %v3547_v17, %v3543_v51  ;;  %v8680_v60 = vld [vmem:[#allocation9_spill] sm:$0xff]  ;;  %v1766_v51 = vld [vmem:[%s8645_s1 + $0x6b0] sm:$0xff] }
 0x26c   :  { %v1170_v7 = vpop.xlane.xlu1 %1169  ;;  %v1221_v43 = vpop.xlane.xlu0 %1220  ;;  %v4263_v28 = vsel %vm8661_vm4, %v3548_v2, %v5427_v46  ;;  %4435 = vmatprep.subr.mxu0 %v1703_v32  ;;  %v1700_v46 = vld [vmem:[%s8645_s1 + $0x4a0] sm:$0xff]  ;;  %v1693_v32 = vld [vmem:[%s8645_s1 + $0x468] sm:$0xff]  ;;  %vm8682_vm4 = vcmask 326912  }
 0x26d   :  { %v3714_v16 = vrot.slane %v1221_v43, %v8678_v25  ;;  %4421 = vmatmul.mubr.f32.vlgmr.msra.gmra.mxu1 %v4263_v28  ;;  %4436 = vmatpush1.msra.mxu0 %v1702_v13  ;;  %v3631_v8 = vrot.slane %v1170_v7, %v8677_v30  ;;  %v355_v17 = vld [vmem:[%s8644_s0 + $0xaa0] sm:$0xff]  ;;  %v1456_v28 = vsel %vm399_vm0, %v367_v58, 0.0 }
 0x26e   :  { %4437 = vmatprep.subr.mxu0 %v1701_v24  ;;  %4499 = vmatpush1.msra.mxu1 %v1774_v38  ;;  %v1692_v24 = vld [vmem:[%s8645_s1 + $0x460] sm:$0xff]  ;;  %v1765_v38 = vld [vmem:[%s8645_s1 + $0x6a8] sm:$0xff] }
 0x26f   :  { %v3715_v48 = vsel %vm2343_vm1, %v3714_v16, %v3710_v34  ;;  %1418 = vadd.xlane.f32.xlu1 %v1417_v20  ;;  %1367 = vadd.xlane.f32.xlu0 %v1366_v63  ;;  %v1420_v20 = vsel %vm399_vm0, %v355_v17, 0.0  ;;  %v385_v63 = vld [vmem:[%s8644_s0 + $0xb90] sm:$0xff]  ;;  %v368_v16 = vld [vmem:[%s8644_s0 + $0xb08] sm:$0xff] }
 0x270   :  { %v1224_v54 = vpop.xlane.xlu1 %1223  ;;  %v1173_v1 = vpop.xlane.xlu0 %1172  ;;  %4438 = vmatpush1.msra.mxu0 %v1700_v46  ;;  %4500 = vmatprep.subr.mxu1 %v1773_v39  ;;  %v1764_v46 = vld [vmem:[%s8645_s1 + $0x6a0] sm:$0xff]  ;;  %v1690_v39 = vld [vmem:[%s8645_s1 + $0x450] sm:$0xff]  ;;  %v1685_v17 = vld [vmem:[%s8645_s1 + $0x428] sm:$0xff] }
 0x271   :  { %v3719_v18 = vrot.slane %v1224_v54, %v8679_v31  ;;  %v3635_v59 = vrot.slane %v1173_v1, %v8678_v25  ;;  %4439 = vmatprep.subr.mxu0 %v1699_v6  ;;  %4501 = vmatpush1.msra.mxu1 %v1772_v47  ;;  %v1763_v6 = vld [vmem:[%s8645_s1 + $0x698] sm:$0xff]  ;;  %v1510_v1 = vsel %vm399_vm0, %v385_v63, 0.0 }
 0x272   :  { %4440 = vmatpush1.msra.mxu0 %v1698_v22  ;;  %4502 = vmatprep.subr.mxu1 %v1771_v44  ;;  %v1762_v22 = vld [vmem:[%s8645_s1 + $0x690] sm:$0xff] }
 0x273   :  { %v3720_v12 = vsel %vm2350_vm2, %v3719_v18, %v3715_v48  ;;  %v3636_v21 = vsel %vm2343_vm1, %v3635_v59, %v3631_v8  ;;  %1508 = vadd.xlane.f32.xlu1 %v1507_v40  ;;  %1505 = vadd.xlane.f32.xlu0 %v1504_v0  ;;  %v1689_v48 = vld [vmem:[%s8645_s1 + $0x448] sm:$0xff]  ;;  %v1459_v40 = vsel %vm399_vm0, %v368_v16, 0.0  ;;  %v339_v0 = vld [vmem:[%s8644_s0 + $0xa20] sm:$0xff]  ;;  %v194_v59 = vld [vmem:[%s8644_s0 + $0x598] sm:$0xff] }
 0x274   :  { %v1227_v26 = vpop.xlane.xlu1 %1226  ;;  %v1176_v29 = vpop.xlane.xlu0 %1175  ;;  %4441 = vmatprep.subr.mxu0 %v1697_v4  ;;  %4503 = vmatpush1.msra.mxu1 %v1770_v33  ;;  %v1761_v4 = vld [vmem:[%s8645_s1 + $0x688] sm:$0xff]  ;;  %v1687_v33 = vld [vmem:[%s8645_s1 + $0x438] sm:$0xff] }
 0x275   :  { %v3724_v49 = vrot.slane %v1227_v26, %v8680_v60  ;;  %v3640_v35 = vrot.slane %v1176_v29, %v8679_v31  ;;  %4442 = vmatpush1.msra.mxu0 %v1696_v23  ;;  %4504 = vmatprep.subr.mxu1 %v1769_v14  ;;  %v1760_v23 = vld [vmem:[%s8645_s1 + $0x680] sm:$0xff]  ;;  %v1372_v29 = vsel %vm399_vm0, %v339_v0, 0.0  ;;  %v1755_v16 = vld [vmem:[%s8645_s1 + $0x658] sm:$0xff] }
 0x276   :  { %4443 = vmatprep.subr.mxu0 %v1695_v56  ;;  %4505 = vmatpush1.msra.mxu1 %v1768_v10  ;;  %v1759_v56 = vld [vmem:[%s8645_s1 + $0x678] sm:$0xff] }
 0x277   :  { %v3725_v13 = vsel %vm2357_vm3, %v3724_v49, %v3720_v12  ;;  %v3641_v2 = vsel %vm2350_vm2, %v3640_v35, %v3636_v21  ;;  %1370 = vadd.xlane.f32.xlu1 %v1369_v61  ;;  %935 = vadd.xlane.f32.xlu0 %v934_v11  ;;  %v1686_v21 = vld [vmem:[%s8645_s1 + $0x430] sm:$0xff]  ;;  %v937_v61 = vsel %vm399_vm0, %v194_v59, 0.0  ;;  %v356_v35 = vld [vmem:[%s8644_s0 + $0xaa8] sm:$0xff]  ;;  %v1743_v59 = vld [vmem:[%s8645_s1 + $0x5f8] sm:$0xff] }
 0x278   :  { %v1317_v7 = vpop.xlane.xlu1 %1316  ;;  %v1314_v43 = vpop.xlane.xlu0 %1313  ;;  %4444 = vmatpush1.msra.mxu0 %v1694_v62  ;;  %4506 = vmatprep.subr.mxu1 %v1767_v45  ;;  %v369_v11 = vld [vmem:[%s8644_s0 + $0xb10] sm:$0xff]  ;;  %v1684_v45 = vld [vmem:[%s8645_s1 + $0x420] sm:$0xff] }
 0x279   :  { %v3872_v15 = vrot.slane %v1317_v7, %v8678_v25  ;;  %v3868_v34 = vrot.slane %v1314_v43, %v8677_v30  ;;  %4445 = vmatprep.subr.mxu0 %v1693_v32  ;;  %4507 = vmatpush1.msra.mxu1 %v1766_v51  ;;  %v1758_v62 = vld [vmem:[%s8645_s1 + $0x670] sm:$0xff]  ;;  %v1757_v32 = vld [vmem:[%s8645_s1 + $0x668] sm:$0xff]  ;;  %v1462_v7 = vsel %vm399_vm0, %v369_v11, 0.0  ;;  %v1423_v43 = vsel %vm399_vm0, %v356_v35, 0.0  ;;  %v1740_v35 = vld [vmem:[%s8645_s1 + $0x5e0] sm:$0xff] }
 0x27a   :  { %4446 = vmatpush1.msra.mxu0 %v1692_v24  ;;  %4508 = vmatprep.subr.mxu1 %v1765_v38 }
 0x27b   :  { %v7233_v47 = vsel %vm2343_vm1, %v3872_v15, %v3868_v34  ;;  %1457 = vadd.xlane.f32.xlu1 %v1456_v28  ;;  %1421 = vadd.xlane.f32.xlu0 %v1420_v20  ;;  %v195_v28 = vld [vmem:[%s8644_s0 + $0x5a0] sm:$0xff]  ;;  %v386_v15 = vld [vmem:[%s8644_s0 + $0xb98] sm:$0xff]  ;;  %v1682_v34 = vld [vmem:[%s8645_s1 + $0x410] sm:$0xff] }
 0x27c   :  { %v1230_v44 = vpop.xlane.xlu1 %1229  ;;  %v1179_v54 = vpop.xlane.xlu0 %1178  ;;  %4447 = vmatprep.subr.mxu0 %v1691_v50  ;;  %4509 = vmatpush1.msra.mxu1 %v1764_v46  ;;  %v1681_v50 = vld [vmem:[%s8645_s1 + $0x408] sm:$0xff]  ;;  %v1754_v46 = vld [vmem:[%s8645_s1 + $0x650] sm:$0xff] }
 0x27d   :  { %v3729_v8 = vrot.slane %v1230_v44, %v8681_v36  ;;  %v3645_v18 = vrot.slane %v1179_v54, %v8680_v60  ;;  %4448 = vmatpush1.msra.mxu0 %v1690_v39  ;;  %4510 = vmatprep.subr.mxu1 %v1763_v6 }
 0x27e   :  { %4449 = vmatprep.subr.mxu0 %v1689_v48  ;;  %4511 = vmatpush1.msra.mxu1 %v1762_v22  ;;  %v1680_v48 = vld [vmem:[%s8645_s1 + $0x400] sm:$0xff]  ;;  %v1753_v22 = vld [vmem:[%s8645_s1 + $0x648] sm:$0xff] }
 0x27f   :  { %v7264_v14 = vsel %vm8682_vm4, %v3729_v8, %v3725_v13  ;;  %v3646_v12 = vsel %vm2357_vm3, %v3645_v18, %v3641_v2  ;;  %1511 = vadd.xlane.f32.xlu1 %v1510_v1  ;;  %1460 = vadd.xlane.f32.xlu0 %v1459_v40  ;;  %v1683_v13 = vld [vmem:[%s8645_s1 + $0x418] sm:$0xff]  ;;  %v1756_v2 = vld [vmem:[%s8645_s1 + $0x660] sm:$0xff]  ;;  %v940_v1 = vsel %vm399_vm0, %v195_v28, 0.0  ;;  %v1513_v40 = vsel %vm399_vm0, %v386_v15, 0.0  ;;  %v340_v18 = vld [vmem:[%s8644_s0 + $0xa28] sm:$0xff] }
 0x280   :  { %v1269_v10 = vpop.xlane.xlu1 %1268  ;;  %v1266_v26 = vpop.xlane.xlu0 %1265  ;;  %4450 = vmatpush1.msra.mxu0 %v1688_v5  ;;  %4512 = vmatprep.subr.mxu1 %v1761_v4  ;;  %v1752_v5 = vld [vmem:[%s8645_s1 + $0x640] sm:$0xff]  ;;  %v1742_v4 = vld [vmem:[%s8645_s1 + $0x5f0] sm:$0xff]  ;;  %v1737_v15 = vld [vmem:[%s8645_s1 + $0x5c8] sm:$0xff] }
 0x281   :  { %v3793_v58 = vrot.slane %v1269_v10, %v8678_v25  ;;  %v3789_v49 = vrot.slane %v1266_v26, %v8677_v30  ;;  %4451 = vmatprep.subr.mxu0 %v1687_v33  ;;  %4513 = vmatpush1.msra.mxu1 %v1760_v23  ;;  %v1751_v33 = vld [vmem:[%s8645_s1 + $0x638] sm:$0xff]  ;;  %v341_v28 = vld [vmem:[%s8644_s0 + $0xa30] sm:$0xff] }
 0x282   :  { %4452 = vmatpush1.msra.mxu0 %v1686_v21  ;;  %4514 = vmatprep.subr.mxu1 %v1759_v56  ;;  %v1741_v21 = vld [vmem:[%s8645_s1 + $0x5e8] sm:$0xff]  ;;  %v1750_v56 = vld [vmem:[%s8645_s1 + $0x630] sm:$0xff] }
 0x283   :  { %v3794_v51 = vsel %vm2343_vm1, %v3793_v58, %v3789_v49  ;;  %1373 = vadd.xlane.f32.xlu1 %v1372_v29  ;;  %938 = vadd.xlane.f32.xlu0 %v937_v61  ;;  %v1375_v61 = vsel %vm399_vm0, %v340_v18, 0.0  ;;  %v370_v49 = vld [vmem:[%s8644_s0 + $0xb18] sm:$0xff]  ;;  %v1733_v18 = vld [vmem:[%s8645_s1 + $0x5a8] sm:$0xff] }
 0x284   :  { %v1182_v24 = vpop.xlane.xlu1 %1181  ;;  %v1320_v38 = vpop.xlane.xlu0 %1319  ;;  %4453 = vmatprep.subr.mxu0 %v1685_v17  ;;  %4515 = vmatpush1.msra.mxu1 %v1758_v62  ;;  %v1749_v17 = vld [vmem:[%s8645_s1 + $0x628] sm:$0xff]  ;;  %v1739_v62 = vld [vmem:[%s8645_s1 + $0x5d8] sm:$0xff] }
 0x285   :  { %v3650_v20 = vrot.slane %v1182_v24, %v8681_v36  ;;  %v3877_v63 = vrot.slane %v1320_v38, %v8679_v31  ;;  %4454 = vmatpush1.msra.mxu0 %v1684_v45  ;;  %4516 = vmatprep.subr.mxu1 %v1757_v32  ;;  %v1748_v45 = vld [vmem:[%s8645_s1 + $0x620] sm:$0xff] }
 0x286   :  { %4455 = vmatprep.subr.mxu0 %v1683_v13  ;;  %4517 = vmatpush1.msra.mxu1 %v1756_v2  ;;  %v1738_v13 = vld [vmem:[%s8645_s1 + $0x5d0] sm:$0xff]  ;;  %v1747_v2 = vld [vmem:[%s8645_s1 + $0x618] sm:$0xff] }
 0x287   :  { %v3651_v39 = vsel %vm8682_vm4, %v3650_v20, %v3646_v12  ;;  %v3878_v6 = vsel %vm2350_vm2, %v3877_v63, %v7233_v47  ;;  %1463 = vadd.xlane.f32.xlu1 %v1462_v7  ;;  %1424 = vadd.xlane.f32.xlu0 %v1423_v43  ;;  %v357_v47 = vld [vmem:[%s8644_s0 + $0xab0] sm:$0xff]  ;;  %v1465_v43 = vsel %vm399_vm0, %v370_v49, 0.0  ;;  %v196_v63 = vld [vmem:[%s8644_s0 + $0x5a8] sm:$0xff]  ;;  %v1803_v49 = vld [vmem:[%s8645_s1 + $0x7d8] sm:$0xff] }
 0x288   :  { %v1272_v44 = vpop.xlane.xlu1 %1271  ;;  %v1233_v54 = vpop.xlane.xlu0 %1232  ;;  %4456 = vmatpush1.msra.mxu0 %v1682_v34  ;;  %4518 = vmatprep.subr.mxu1 %v1755_v16  ;;  %v1426_v29 = vsel %vm399_vm0, %v357_v47, 0.0  ;;  %v1746_v34 = vld [vmem:[%s8645_s1 + $0x610] sm:$0xff]  ;;  %v1736_v16 = vld [vmem:[%s8645_s1 + $0x5c0] sm:$0xff]  ;;  %v358_v47 = vld [vmem:[%s8644_s0 + $0xab8] sm:$0xff] }
 0x289   :  { %v3798_v0 = vrot.slane %v1272_v44, %v8679_v31  ;;  %v3734_v8 = vrot.slane %v1233_v54, %v5111_v42  ;;  %4457 = vmatprep.subr.mxu0 %v1681_v50  ;;  %4519 = vmatpush1.msra.mxu1 %v1754_v46  ;;  %v1745_v50 = vld [vmem:[%s8645_s1 + $0x608] sm:$0xff]  ;;  %v1378_v44 = vsel %vm399_vm0, %v341_v28, 0.0  ;;  %v943_v54 = vsel %vm399_vm0, %v196_v63, 0.0  ;;  %v1800_v63 = vld [vmem:[%s8645_s1 + $0x7c0] sm:$0xff] }
 0x28a   :  { %4458 = vmatpush1.msra.mxu0 %v1680_v48  ;;  %4520 = vmatprep.subr.mxu1 %v1753_v22  ;;  %v1801_v28 = vld [vmem:[%s8645_s1 + $0x7c8] sm:$0xff] }
 0x28b   :  { %v3799_v23 = vsel %vm2350_vm2, %v3798_v0, %v3794_v51  ;;  %v7358_v12 = vsel %vm2371_vm5, %v3734_v8, %v7264_v14  ;;  %941 = vadd.xlane.f32.xlu1 %v940_v1  ;;  %1514 = vadd.xlane.f32.xlu0 %v1513_v40  ;;  %v387_v14 = vld [vmem:[%s8644_s0 + $0xba0] sm:$0xff]  ;;  %v1734_v0 = vld [vmem:[%s8645_s1 + $0x5b0] sm:$0xff]  ;;  %v1807_v8 = vld [vmem:[%s8645_s1 + $0x7f8] sm:$0xff] }
 0x28c   :  { %v1185_v10 = vpop.xlane.xlu1 %1184  ;;  %v1323_v26 = vpop.xlane.xlu0 %1322  ;;  %4459 = vmatprep.subr.mxu0 %v1743_v59  ;;  %4521 = vmatpush1.msra.mxu1 %v1752_v5  ;;  %v1516_v7 = vsel %vm399_vm0, %v387_v14, 0.0  ;;  %v371_v1 = vld [vmem:[%s8644_s0 + $0xb20] sm:$0xff]  ;;  %v1806_v59 = vld [vmem:[%s8645_s1 + $0x7f0] sm:$0xff]  ;;  %v1731_v14 = vld [vmem:[%s8645_s1 + $0x598] sm:$0xff] }
 0x28d   :  { %v3655_v11 = vrot.slane %v1185_v10, %v5111_v42  ;;  %v3882_v58 = vrot.slane %v1323_v26, %v8680_v60  ;;  %4460 = vmatpush2.msra.mxu0 %v1742_v4  ;;  %4522 = vmatprep.subr.mxu1 %v1751_v33  ;;  %v1732_v4 = vld [vmem:[%s8645_s1 + $0x5a0] sm:$0xff]  ;;  %v1805_v33 = vld [vmem:[%s8645_s1 + $0x7e8] sm:$0xff]  ;;  %v1429_v10 = vsel %vm399_vm0, %v358_v47, 0.0  ;;  %v197_v26 = vld [vmem:[%s8644_s0 + $0x5b0] sm:$0xff] }
 0x28e   :  { %4461 = vmatprep.subr.mxu0 %v1741_v21  ;;  %4523 = vmatpush1.msra.mxu1 %v1750_v56  ;;  %v1468_v56 = vsel %vm399_vm0, %v371_v1, 0.0  ;;  %v1724_v1 = vld [vmem:[%s8645_s1 + $0x560] sm:$0xff]  ;;  %v1723_v47 = vld [vmem:[%s8645_s1 + $0x558] sm:$0xff] }
 0x28f   :  { %v7389_v32 = vsel %vm2371_vm5, %v3655_v11, %v3651_v39  ;;  %v3883_v51 = vsel %vm2357_vm3, %v3882_v58, %v3878_v6  ;;  %1427 = vadd.xlane.f32.xlu1 %v1426_v29  ;;  %1376 = vadd.xlane.f32.xlu0 %v1375_v61  ;;  %v1735_v39 = vld [vmem:[%s8645_s1 + $0x5b8] sm:$0xff]  ;;  %v1744_v6 = vld [vmem:[%s8645_s1 + $0x600] sm:$0xff]  ;;  %v388_v61 = vld [vmem:[%s8644_s0 + $0xba8] sm:$0xff] }
 0x290   :  { %v1275_v24 = vpop.xlane.xlu1 %1274  ;;  %v7398_v38 = vpop.xlane.xlu0 %1235  ;;  %4462 = vmatpush2.msra.mxu0 %v1740_v35  ;;  %4524 = vmatprep.subr.mxu1 %v1749_v17  ;;  %v1804_v11 = vld [vmem:[%s8645_s1 + $0x7e0] sm:$0xff]  ;;  %v1730_v58 = vld [vmem:[%s8645_s1 + $0x590] sm:$0xff]  ;;  %v1729_v17 = vld [vmem:[%s8645_s1 + $0x588] sm:$0xff] }
 0x291   :  { %v3803_v20 = vrot.slane %v1275_v24, %v8680_v60  ;;  %4463 = vmatprep.subr.mxu0 %v1739_v62  ;;  %4525 = vmatpush1.msra.mxu1 %v1748_v45  ;;  %v1802_v62 = vld [vmem:[%s8645_s1 + $0x7d0] sm:$0xff]  ;;  %v359_v24 = vld [vmem:[%s8644_s0 + $0xac0] sm:$0xff] }
 0x292   :  { %4464 = vmatpush2.msra.mxu0 %v1738_v13  ;;  %4526 = vmatprep.subr.mxu1 %v1747_v2  ;;  %v946_v13 = vsel %vm399_vm0, %v197_v26, 0.0  ;;  %v1519_v2 = vsel %vm399_vm0, %v388_v61, 0.0  ;;  %v1721_v26 = vld [vmem:[%s8645_s1 + $0x548] sm:$0xff]  ;;  %v1720_v61 = vld [vmem:[%s8645_s1 + $0x540] sm:$0xff] }
 0x293   :  { %v3804_v46 = vsel %vm2357_vm3, %v3803_v20, %v3799_v23  ;;  %1517 = vadd.xlane.f32.xlu1 %v1516_v7  ;;  %1466 = vadd.xlane.f32.xlu0 %v1465_v43  ;;  %v342_v7 = vld [vmem:[%s8644_s0 + $0xa38] sm:$0xff]  ;;  %v1728_v43 = vld [vmem:[%s8645_s1 + $0x580] sm:$0xff] }
 0x294   :  { %v7428_v48 = vpop.xlane.xlu1 %1187  ;;  %v1326_v22 = vpop.xlane.xlu0 %1325  ;;  %4465 = vmatprep.subr.mxu0 %v1737_v15  ;;  %4527 = vmatpush1.msra.mxu1 %v1746_v34  ;;  %v1727_v20 = vld [vmem:[%s8645_s1 + $0x578] sm:$0xff]  ;;  %v1726_v15 = vld [vmem:[%s8645_s1 + $0x570] sm:$0xff] }
 0x295   :  { %v3887_v40 = vrot.slane %v1326_v22, %v8681_v36  ;;  %4466 = vmatpush2.msra.mxu0 %v1736_v16  ;;  %4528 = vmatprep.subr.mxu1 %v1745_v50  ;;  %v1799_v34 = vld [vmem:[%s8645_s1 + $0x7b8] sm:$0xff]  ;;  %v372_v22 = vld [vmem:[%s8644_s0 + $0xb28] sm:$0xff] }
 0x296   :  { %4467 = vmatprep.subr.mxu0 %v1735_v39  ;;  %4529 = vmatpush1.msra.mxu1 %v1744_v6  ;;  %v1381_v39 = vsel %vm399_vm0, %v342_v7, 0.0  ;;  %v389_v6 = vld [vmem:[%s8644_s0 + $0xbb0] sm:$0xff] }
 0x297   :  { %v7452_v5 = vsel %vm8682_vm4, %v3887_v40, %v3883_v51  ;;  %1379 = vadd.xlane.f32.xlu1 %v1378_v44  ;;  %944 = vadd.xlane.f32.xlu0 %v943_v54  ;;  %v1725_v44 = vld [vmem:[%s8645_s1 + $0x568] sm:$0xff]  ;;  %v1798_v54 = vld [vmem:[%s8645_s1 + $0x7b0] sm:$0xff] }
 0x298   :  { %v1278_v23 = vpop.xlane.xlu1 %1277  ;;  %v7460_v21 = vpop.xlane.xlu0 %1238  ;;  %4468 = vmatpush2.msra.mxu0 %v1734_v0  ;;  %4530 = vmatprep.subr.mxu1 %v1807_v8  ;;  %v1797_v40 = vld [vmem:[%s8645_s1 + $0x7a8] sm:$0xff]  ;;  %v1796_v0 = vld [vmem:[%s8645_s1 + $0x7a0] sm:$0xff]  ;;  %v1718_v7 = vld [vmem:[%s8645_s1 + $0x530] sm:$0xff] }
 0x299   :  { %v3808_v29 = vrot.slane %v1278_v23, %v8681_v36  ;;  %4469 = vmatprep.subr.mxu0 %v1733_v18  ;;  %4531 = vmatpush2.msra.mxu1 %v1806_v59  ;;  %v1522_v59 = vsel %vm399_vm0, %v389_v6, 0.0  ;;  %v198_v23 = vld [vmem:[%s8644_s0 + $0x5b8] sm:$0xff] }
 0x29a   :  { %4470 = vmatpush2.msra.mxu0 %v1732_v4  ;;  %4532 = vmatprep.subr.mxu1 %v1805_v33  ;;  %v1471_v4 = vsel %vm399_vm0, %v372_v22, 0.0  ;;  %v343_v33 = vld [vmem:[%s8644_s0 + $0xa40] sm:$0xff]  ;;  %v390_v6 = vld [vmem:[%s8644_s0 + $0xbb8] sm:$0xff] }
 0x29b   :  { %v7484_v35 = vsel %vm8682_vm4, %v3808_v29, %v3804_v46  ;;  %1469 = vadd.xlane.f32.xlu1 %v1468_v56  ;;  %1430 = vadd.xlane.f32.xlu0 %v1429_v10  ;;  %v1432_v46 = vsel %vm399_vm0, %v359_v24, 0.0  ;;  %v1722_v56 = vld [vmem:[%s8645_s1 + $0x550] sm:$0xff]  ;;  %v1795_v10 = vld [vmem:[%s8645_s1 + $0x798] sm:$0xff]  ;;  %v1792_v24 = vld [vmem:[%s8645_s1 + $0x780] sm:$0xff]  ;;  %vm8684_vm4 = vcmask 1041409  }
 0x29c   :  { %v7492_v45 = vpop.xlane.xlu1 %1190  ;;  %v7494_v51 = vpop.xlane.xlu0 %1328  ;;  %4471 = vmatprep.subr.mxu0 %v1731_v14  ;;  %4533 = vmatpush2.msra.mxu1 %v1804_v11  ;;  %v1794_v29 = vld [vmem:[%s8645_s1 + $0x790] sm:$0xff]  ;;  %v1793_v14 = vld [vmem:[%s8645_s1 + $0x788] sm:$0xff]  ;;  %v1716_v22 = vld [vmem:[%s8645_s1 + $0x520] sm:$0xff] }
 0x29d   :  { %4472 = vmatpush2.msra.mxu0 %v1730_v58  ;;  %4534 = vmatprep.subr.mxu1 %v1803_v49  ;;  %v1384_v49 = vsel %vm399_vm0, %v343_v33, 0.0  ;;  %v1525_v33 = vsel %vm399_vm0, %v390_v6, 0.0  ;;  %v345_v6 = vld [vmem:[%s8644_s0 + $0xa50] sm:$0xff] }
 0x29e   :  { %4473 = vmatprep.subr.mxu0 %v1729_v17  ;;  %4535 = vmatpush2.msra.mxu1 %v1802_v62  ;;  %v949_v17 = vsel %vm399_vm0, %v198_v23, 0.0  ;;  %v373_v62 = vld [vmem:[%s8644_s0 + $0xb30] sm:$0xff] }
 0x29f   :  { %947 = vadd.xlane.f32.xlu1 %v946_v13  ;;  %1520 = vadd.xlane.f32.xlu0 %v1519_v2  ;;  %v360_v13 = vld [vmem:[%s8644_s0 + $0xac8] sm:$0xff]  ;;  %v1719_v2 = vld [vmem:[%s8645_s1 + $0x538] sm:$0xff]  ;;  %v361_v23 = vld [vmem:[%s8644_s0 + $0xad0] sm:$0xff] }
 0x2a0   :  { %v7522_v16 = vpop.xlane.xlu1 %1280  ;;  %v7524_v50 = vpop.xlane.xlu0 %1241  ;;  %4474 = vmatpush2.msra.mxu0 %v1728_v43  ;;  %4536 = vmatprep.subr.mxu1 %v1801_v28  ;;  %v1791_v43 = vld [vmem:[%s8645_s1 + $0x778] sm:$0xff]  ;;  %v1717_v28 = vld [vmem:[%s8645_s1 + $0x528] sm:$0xff] }
 0x2a1   :  { %4475 = vmatprep.subr.mxu0 %v1727_v20  ;;  %4537 = vmatpush2.msra.mxu1 %v1800_v63  ;;  %v1790_v20 = vld [vmem:[%s8645_s1 + $0x770] sm:$0xff] }
 0x2a2   :  { %4476 = vmatpush2.msra.mxu0 %v1726_v15  ;;  %4538 = vmatprep.subr.mxu1 %v1799_v34  ;;  %v1474_v34 = vsel %vm399_vm0, %v373_v62, 0.0  ;;  %v1438_v62 = vsel %vm399_vm0, %v361_v23, 0.0  ;;  %v375_v23 = vld [vmem:[%s8644_s0 + $0xb40] sm:$0xff] }
 0x2a3   :  { %1433 = vadd.xlane.f32.xlu1 %v1432_v46  ;;  %1382 = vadd.xlane.f32.xlu0 %v1381_v39  ;;  %v1435_v46 = vsel %vm399_vm0, %v360_v13, 0.0  ;;  %v199_v39 = vld [vmem:[%s8644_s0 + $0x5c0] sm:$0xff] }
 0x2a4   :  { %v7552_v8 = vpop.xlane.xlu1 %1193  ;;  %v7554_v18 = vpop.xlane.xlu0 %1331  ;;  %4477 = vmatprep.subr.mxu0 %v1725_v44  ;;  %4539 = vmatpush2.msra.mxu1 %v1798_v54  ;;  %v1789_v44 = vld [vmem:[%s8645_s1 + $0x768] sm:$0xff]  ;;  %v1715_v54 = vld [vmem:[%s8645_s1 + $0x518] sm:$0xff] }
 0x2a5   :  { %4478 = vmatpush2.msra.mxu0 %v1724_v1  ;;  %4540 = vmatprep.subr.mxu1 %v1797_v40  ;;  %v1788_v1 = vld [vmem:[%s8645_s1 + $0x760] sm:$0xff]  ;;  %v1714_v40 = vld [vmem:[%s8645_s1 + $0x510] sm:$0xff] }
 0x2a6   :  { %4479 = vmatprep.subr.mxu0 %v1723_v47  ;;  %4541 = vmatpush2.msra.mxu1 %v1796_v0  ;;  %v1787_v47 = vld [vmem:[%s8645_s1 + $0x758] sm:$0xff] }
 0x2a7   :  { %1523 = vadd.xlane.f32.xlu1 %v1522_v59  ;;  %1472 = vadd.xlane.f32.xlu0 %v1471_v4  ;;  %v952_v4 = vsel %vm399_vm0, %v199_v39, 0.0 }
 0x2a8   :  { %v7582_v11 = vpop.xlane.xlu1 %1283  ;;  %v7584_v58 = vpop.xlane.xlu0 %1244  ;;  %4480 = vmatpush2.msra.mxu0 %v1722_v56  ;;  %4542 = vmatprep.subr.mxu1 %v1795_v10  ;;  %v344_v56 = vld [vmem:[%s8644_s0 + $0xa48] sm:$0xff] }
 0x2a9   :  { %4481 = vmatprep.subr.mxu0 %v1721_v26  ;;  %4543 = vmatpush2.msra.mxu1 %v1794_v29  ;;  %v1713_v10 = vld [vmem:[%s8645_s1 + $0x508] sm:$0xff]  ;;  %v1786_v26 = vld [vmem:[%s8645_s1 + $0x750] sm:$0xff]  ;;  %v1712_v29 = vld [vmem:[%s8645_s1 + $0x500] sm:$0xff]  ;;  %v1387_v13 = vsel %vm399_vm0, %v344_v56, 0.0 }
 0x2aa   :  { %4482 = vmatpush2.msra.mxu0 %v1720_v61  ;;  %4544 = vmatprep.subr.mxu1 %v1793_v14  ;;  %v1785_v61 = vld [vmem:[%s8645_s1 + $0x748] sm:$0xff]  ;;  %v1784_v14 = vld [vmem:[%s8645_s1 + $0x740] sm:$0xff]  ;;  %v362_v56 = vld [vmem:[%s8644_s0 + $0xad8] sm:$0xff] }
 0x2ab   :  { %1385 = vadd.xlane.f32.xlu1 %v1384_v49  ;;  %950 = vadd.xlane.f32.xlu0 %v949_v17 }
 0x2ac   :  { %v7612_v63 = vpop.xlane.xlu1 %1196  ;;  %v7614_v15 = vpop.xlane.xlu0 %1334  ;;  %4483 = vmatprep.subr.mxu0 %v1719_v2  ;;  %4545 = vmatpush2.msra.mxu1 %v1792_v24  ;;  %v391_v2 = vld [vmem:[%s8644_s0 + $0xbc0] sm:$0xff]  ;;  %v374_v24 = vld [vmem:[%s8644_s0 + $0xb38] sm:$0xff] }
 0x2ad   :  { %4484 = vmatpush2.msra.mxu0 %v1718_v7  ;;  %4546 = vmatprep.subr.mxu1 %v1791_v43  ;;  %v1783_v7 = vld [vmem:[%s8645_s1 + $0x738] sm:$0xff]  ;;  %v1782_v43 = vld [vmem:[%s8645_s1 + $0x730] sm:$0xff]  ;;  %v1477_v39 = vsel %vm399_vm0, %v374_v24, 0.0  ;;  %v392_v24 = vld [vmem:[%s8644_s0 + $0xbc8] sm:$0xff] }
 0x2ae   :  { %4485 = vmatprep.subr.mxu0 %v1717_v28  ;;  %4547 = vmatpush2.msra.mxu1 %v1790_v20  ;;  %v1781_v28 = vld [vmem:[%s8645_s1 + $0x728] sm:$0xff] }
 0x2af   :  { %1475 = vadd.xlane.f32.xlu1 %v1474_v34  ;;  %1436 = vadd.xlane.f32.xlu0 %v1435_v46  ;;  %v1528_v46 = vsel %vm399_vm0, %v391_v2, 0.0  ;;  %v201_v2 = vld [vmem:[%s8644_s0 + $0x5d0] sm:$0xff] }
 0x2b0   :  { %v7642_v0 = vpop.xlane.xlu1 %1286  ;;  %v7644_v59 = vpop.xlane.xlu0 %1247  ;;  %4486 = vmatpush2.msra.mxu0 %v1716_v22  ;;  %4548 = vmatprep.subr.mxu1 %v1789_v44  ;;  %v200_v22 = vld [vmem:[%s8644_s0 + $0x5c8] sm:$0xff]  ;;  %v1780_v44 = vld [vmem:[%s8645_s1 + $0x720] sm:$0xff] }
 0x2b1   :  { %4487 = vmatprep.subr.mxu0 %v1715_v54  ;;  %4549 = vmatpush2.msra.mxu1 %v1788_v1  ;;  %v1779_v54 = vld [vmem:[%s8645_s1 + $0x718] sm:$0xff]  ;;  %v1778_v1 = vld [vmem:[%s8645_s1 + $0x710] sm:$0xff] }
 0x2b2   :  { %4488 = vmatpush2.msra.mxu0 %v1714_v40  ;;  %4550 = vmatprep.subr.mxu1 %v1787_v47 }
 0x2b3   :  { %953 = vadd.xlane.f32.xlu1 %v952_v4  ;;  %1526 = vadd.xlane.f32.xlu0 %v1525_v33  ;;  %v1390_v4 = vsel %vm399_vm0, %v345_v6, 0.0  ;;  %v955_v33 = vsel %vm399_vm0, %v200_v22, 0.0  ;;  %v346_v6 = vld [vmem:[%s8644_s0 + $0xa58] sm:$0xff] }
 0x2b4   :  { %v7669_v49 = vpop.xlane.xlu1 %1199  ;;  %v7671_v17 = vpop.xlane.xlu0 %1337  ;;  %4489 = vmatprep.subr.mxu0 %v1713_v10  ;;  %4551 = vmatpush2.msra.mxu1 %v1786_v26  ;;  %v1777_v10 = vld [vmem:[%s8645_s1 + $0x708] sm:$0xff]  ;;  %v1776_v26 = vld [vmem:[%s8645_s1 + $0x700] sm:$0xff] }
 0x2b5   :  { %4490 = vmatpush2.msra.mxu0 %v1712_v29  ;;  %4552 = vmatprep.subr.mxu1 %v1785_v61 }
 0x2b6   :  { %4553 = vmatpush2.msra.mxu1 %v1784_v14  ;;  %v1480_v14 = vsel %vm399_vm0, %v375_v23, 0.0 }
 0x2b7   :  { %1439 = vadd.xlane.f32.xlu1 %v1438_v62  ;;  %1388 = vadd.xlane.f32.xlu0 %v1387_v13  ;;  %v1441_v62 = vsel %vm399_vm0, %v362_v56, 0.0  ;;  %v1839_v13 = vld [vmem:[%s8645_s1 + $0x8f8] sm:$0xff] }
 0x2b8   :  { %v7690_v20 = vpop.xlane.xlu1 %1289  ;;  %v7692_v34 = vpop.xlane.xlu0 %1250  ;;  %4554 = vmatprep.subr.mxu1 %v1783_v7  ;;  %4569 = vmatprep.subr.mxu0 %v1839_v13  ;;  %v202_v13 = vld [vmem:[%s8644_s0 + $0x5d8] sm:$0xff] }
 0x2b9   :  { %4555 = vmatpush2.msra.mxu1 %v1782_v43 }
 0x2ba   :  { %4556 = vmatprep.subr.mxu1 %v1781_v28  ;;  %v958_v28 = vsel %vm399_vm0, %v201_v2, 0.0  ;;  %v3739_v2 = vrot.slane %v7398_v38, %v5126_v53  ;;  %v3749_v38 = vrot.slane %v7524_v50, %v5156_v9  ;;  %v365_v50 = vld [vmem:[%s8644_s0 + $0xaf0] sm:$0xff] }
 0x2bb   :  { %1529 = vadd.xlane.f32.xlu1 %v1528_v46  ;;  %1478 = vadd.xlane.f32.xlu0 %v1477_v39  ;;  %v1531_v46 = vsel %vm399_vm0, %v392_v24, 0.0  ;;  %v363_v39 = vld [vmem:[%s8644_s0 + $0xae0] sm:$0xff]  ;;  %v377_v24 = vld [vmem:[%s8644_s0 + $0xb50] sm:$0xff] }
 0x2bc   :  { %v7711_v40 = vpop.xlane.xlu1 %1202  ;;  %v7713_v47 = vpop.xlane.xlu0 %1340  ;;  %4557 = vmatpush2.msra.mxu1 %v1780_v44 }
 0x2bd   :  { %4558 = vmatprep.subr.mxu1 %v1779_v54  ;;  %v1444_v54 = vsel %vm399_vm0, %v363_v39, 0.0  ;;  %v203_v39 = vld [vmem:[%s8644_s0 + $0x5e0] sm:$0xff] }
 0x2be   :  { %4559 = vmatpush2.msra.mxu1 %v1778_v1  ;;  %v1393_v1 = vsel %vm399_vm0, %v346_v6, 0.0  ;;  %v964_v36 = vsel %vm399_vm0, %v203_v39, 0.0 }
 0x2bf   :  { %1391 = vadd.xlane.f32.xlu1 %v1390_v4  ;;  %956 = vadd.xlane.f32.xlu0 %v955_v33  ;;  %v393_v4 = vld [vmem:[%s8644_s0 + $0xbd0] sm:$0xff]  ;;  %v376_v33 = vld [vmem:[%s8644_s0 + $0xb48] sm:$0xff] }
 0x2c0   :  { %v7729_v29 = vpop.xlane.xlu1 %1292  ;;  %v7731_v61 = vpop.xlane.xlu0 %1253  ;;  %4560 = vmatprep.subr.mxu1 %v1777_v10  ;;  %v1534_v10 = vsel %vm399_vm0, %v393_v4, 0.0  ;;  %v394_v4 = vld [vmem:[%s8644_s0 + $0xbd8] sm:$0xff] }
 0x2c1   :  { %4561 = vmatpush2.msra.mxu1 %v1776_v26  ;;  %v1483_v26 = vsel %vm399_vm0, %v376_v33, 0.0  ;;  %v3660_v33 = vrot.slane %v7428_v48, %v5126_v53  ;;  %v1537_v60 = vsel %vm399_vm0, %v394_v4, 0.0  ;;  %v3680_v4 = vrot.slane %v7669_v49, %v5176_v27 }
 0x2c3   :  { %1481 = vadd.xlane.f32.xlu1 %v1480_v14  ;;  %1442 = vadd.xlane.f32.xlu0 %v1441_v62  ;;  %v1903_v14 = vld [vmem:[%s8645_s1 + $0xaf8] sm:$0xff]  ;;  %v347_v62 = vld [vmem:[%s8644_s0 + $0xa60] sm:$0xff]  ;;  %v3661_v39 = vsel %vm2378_vm6, %v3660_v33, %v7389_v32 }
 0x2c4   :  { %v7744_v7 = vpop.xlane.xlu1 %1205  ;;  %v7746_v43 = vpop.xlane.xlu0 %1343  ;;  %4640 = vmatprep.subr.mxu1 %v1903_v14  ;;  %v3740_v14 = vsel %vm2378_vm6, %v3739_v2, %v7358_v12  ;;  %v3769_v2 = vrot.slane %v7731_v61, %v5190_v41 }
 0x2c7   :  { %959 = vadd.xlane.f32.xlu1 %v958_v28  ;;  %1532 = vadd.xlane.f32.xlu0 %v1531_v46  ;;  %v3744_v28 = vrot.slane %v7460_v21, %v5123_v52  ;;  %v364_v46 = vld [vmem:[%s8644_s0 + $0xae8] sm:$0xff]  ;;  %v961_v21 = vsel %vm399_vm0, %v202_v13, 0.0 }
 0x2c8   :  { %v7756_v22 = vpop.xlane.xlu1 %1295  ;;  %v7758_v44 = vpop.xlane.xlu0 %1256  ;;  %v1447_v13 = vsel %vm399_vm0, %v364_v46, 0.0 }
 0x2c9   :  { %v3745_v48 = vsel %vm2385_vm7, %v3744_v28, %v3740_v14  ;;  %v3774_v61 = vrot.slane %v7758_v44, %v5184_v37 }
 0x2ca   :  { %v3750_v12 = vsel %vm2392_vm8, %v3749_v38, %v3745_v48 }
 0x2cb   :  { %1445 = vadd.xlane.f32.xlu1 %v1444_v54  ;;  %1394 = vadd.xlane.f32.xlu0 %v1393_v1  ;;  %v1396_v1 = vsel %vm399_vm0, %v347_v62, 0.0  ;;  %v3759_v62 = vrot.slane %v7644_v59, %v5176_v27  ;;  %v3670_v59 = vrot.slane %v7552_v8, %v5156_v9  ;;  %v3675_v8 = vrot.slane %v7612_v63, %v5144_v3 }
 0x2cc   :  { %v7768_v23 = vpop.xlane.xlu1 %1208  ;;  %v7770_v56 = vpop.xlane.xlu0 %1346  ;;  %v3685_v63 = vrot.slane %v7711_v40, %v5164_v19  ;;  %v395_v40 = vld [vmem:[%s8644_s0 + $0xbe0] sm:$0xff] }
 0x2cd   :  { %v3695_v48 = vrot.slane %v7768_v23, %v5184_v37 }
 0x2cf   :  { %1535 = vadd.xlane.f32.xlu1 %v1534_v10  ;;  %1484 = vadd.xlane.f32.xlu0 %v1483_v26  ;;  %v3754_v10 = vrot.slane %v7584_v58, %v5144_v3  ;;  %v1486_v26 = vsel %vm399_vm0, %v377_v24, 0.0  ;;  %v3665_v58 = vrot.slane %v7492_v45, %v5123_v52  ;;  %v3764_v24 = vrot.slane %v7692_v34, %v5164_v19  ;;  %v348_v34 = vld [vmem:[%s8644_s0 + $0xa68] sm:$0xff] }
 0x2d0   :  { %v7798_v6 = vpop.xlane.xlu1 %1298  ;;  %v1260_v54 = vpop.xlane.xlu0 %1259  ;;  %v1450_v45 = vsel %vm399_vm0, %v365_v50, 0.0  ;;  %v1399_v44 = vsel %vm399_vm0, %v348_v34, 0.0  ;;  %v1540_v34 = vsel %vm399_vm0, %v395_v40, 0.0 }
 0x2d1   :  { %v3755_v38 = vsel %vm2399_vm9, %v3754_v10, %v3750_v12  ;;  %v3779_v50 = vrot.slane %v1260_v54, %v5209_v57  ;;  %v3666_v32 = vsel %vm2385_vm7, %v3665_v58, %v3661_v39  ;;  %v3897_v10 = vrot.slane %v7554_v18, %v5126_v53 }
 0x2d2   :  { %v3690_v54 = vrot.slane %v7744_v7, %v5190_v41  ;;  %v3902_v58 = vrot.slane %v7614_v15, %v5123_v52  ;;  %v3813_v15 = vrot.slane %v7522_v16, %v5111_v42  ;;  %v3907_v39 = vrot.slane %v7671_v17, %v5156_v9 }
 0x2d3   :  { %1397 = vadd.xlane.f32.xlu1 %v1396_v1  ;;  %962 = vadd.xlane.f32.xlu0 %v961_v21  ;;  %v3892_v1 = vrot.slane %v7494_v51, %v5111_v42  ;;  %v3760_v21 = vsel %vm2406_vm10, %v3759_v62, %v3755_v38  ;;  %v3671_v51 = vsel %vm2392_vm8, %v3670_v59, %v3666_v32 }
 0x2d4   :  { %v1212_v46 = vpop.xlane.xlu1 %1211  ;;  %v7830_v28 = vpop.xlane.xlu0 %1349  ;;  %v3765_v33 = vsel %vm2413_vm11, %v3764_v24, %v3760_v21  ;;  %v3818_v21 = vrot.slane %v7582_v11, %v5126_v53  ;;  %v1838_v11 = vld [vmem:[%s8645_s1 + $0x8f0] sm:$0xff] }
 0x2d5   :  { %v3770_v49 = vsel %vm2420_vm12, %v3769_v2, %v3765_v33  ;;  %v3700_v12 = vrot.slane %v1212_v46, %v5209_v57  ;;  %v3893_v59 = vsel %vm2371_vm5, %v3892_v1, %v7452_v5  ;;  %v3912_v1 = vrot.slane %v7713_v47, %v5144_v3 }
 0x2d6   :  { %v3823_v33 = vrot.slane %v7642_v0, %v5123_v52  ;;  %v3922_v47 = vrot.slane %v7770_v56, %v5164_v19  ;;  %v3927_v0 = vrot.slane %v7830_v28, %v5190_v41  ;;  %v204_v28 = vld [vmem:[%s8644_s0 + $0x5e8] sm:$0xff] }
 0x2d7   :  { %1487 = vadd.xlane.f32.xlu1 %v1486_v26  ;;  %1448 = vadd.xlane.f32.xlu0 %v1447_v13  ;;  %v3676_v26 = vsel %vm2399_vm9, %v3675_v8, %v3671_v51  ;;  %v3775_v13 = vsel %vm2427_vm13, %v3774_v61, %v3770_v49  ;;  %v8683_v61 = vld [vmem:[#allocation12_spill] sm:$0xff] }
 0x2d8   :  { %v7860_v14 = vpop.xlane.xlu1 %1301  ;;  %v1263_v62 = vpop.xlane.xlu0 %1262  ;;  %v3681_v7 = vsel %vm2406_vm10, %v3680_v4, %v3676_v26  ;;  %v3780_v24 = vsel %vm2434_vm14, %v3779_v50, %v3775_v13  ;;  %v3917_v50 = vrot.slane %v7746_v43, %v5176_v27  ;;  %v1837_v13 = vld [vmem:[%s8645_s1 + $0x8e8] sm:$0xff] }
 0x2d9   :  { %v3784_v18 = vrot.slane %v1263_v62, %v5204_v55  ;;  %v3686_v2 = vsel %vm2413_vm11, %v3685_v63, %v3681_v7  ;;  %v3814_v62 = vsel %vm2371_vm5, %v3813_v15, %v7484_v35  ;;  %v3848_v15 = vrot.slane %v7860_v14, %v5190_v41  ;;  %v366_v14 = vld [vmem:[%s8644_s0 + $0xaf8] sm:$0xff] }
 0x2da   :  { %v3691_v38 = vsel %vm2420_vm12, %v3690_v54, %v3686_v2  ;;  %v8685_v54 = vld [vmem:[#allocation11_spill] sm:$0xff] }
 0x2db   :  { %965 = vadd.xlane.f32.xlu1 %v964_v36  ;;  %1538 = vadd.xlane.f32.xlu0 %v1537_v60  ;;  %v3785_v23 = vsel %vm2441_vm15, %v3784_v18, %v3780_v24  ;;  %v378_v60 = vld [vmem:[%s8644_s0 + $0xb58] sm:$0xff]  ;;  %v3898_v36 = vsel %vm2378_vm6, %v3897_v10, %v3893_v59  ;;  %v3696_v16 = vsel %vm2427_vm13, %v3695_v48, %v3691_v38 }
 0x2dc   :  { %v1215_v46 = vpop.xlane.xlu1 %1214  ;;  %v1353_v8 = vpop.xlane.xlu0 %1352  ;;  %v4266_v5 = vsel %vm8684_vm4, %v3785_v23, %v8683_v61  ;;  %v3903_v4 = vsel %vm2385_vm7, %v3902_v58, %v3898_v36  ;;  %v3701_v32 = vsel %vm2434_vm14, %v3700_v12, %v3696_v16  ;;  %v1489_v51 = vsel %vm399_vm0, %v378_v60, 0.0  ;;  %v1836_v58 = vld [vmem:[%s8645_s1 + $0x8e0] sm:$0xff]  ;;  %v1834_v60 = vld [vmem:[%s8645_s1 + $0x8d0] sm:$0xff] }
 0x2dd   :  { %v3705_v17 = vrot.slane %v1215_v46, %v5204_v55  ;;  %4491 = vmatprep.mubr.f32.mxu0 %v4266_v5  ;;  %v3908_v43 = vsel %vm2392_vm8, %v3907_v39, %v3903_v4  ;;  %v3828_v10 = vrot.slane %v7690_v20, %v5156_v9  ;;  %v3833_v20 = vrot.slane %v7729_v29, %v5144_v3  ;;  %v379_v5 = vld [vmem:[%s8644_s0 + $0xb60] sm:$0xff] }
 0x2de   :  { %v3913_v40 = vsel %vm2399_vm9, %v3912_v1, %v3908_v43  ;;  %v3932_v26 = vrot.slane %v1353_v8, %v5184_v37  ;;  %v3819_v48 = vsel %vm2378_vm6, %v3818_v21, %v3814_v62  ;;  %v3838_v18 = vrot.slane %v7756_v22, %v5176_v27  ;;  %v1835_v22 = vld [vmem:[%s8645_s1 + $0x8d8] sm:$0xff] }
 0x2df   :  { %v3706_v63 = vsel %vm2441_vm15, %v3705_v17, %v3701_v32  ;;  %1451 = vadd.xlane.f32.xlu1 %v1450_v45  ;;  %1400 = vadd.xlane.f32.xlu0 %v1399_v44  ;;  %v349_v44 = vld [vmem:[%s8644_s0 + $0xa70] sm:$0xff]  ;;  %v3918_v35 = vsel %vm2406_vm10, %v3917_v50, %v3913_v40  ;;  %v3824_v7 = vsel %vm2385_vm7, %v3823_v33, %v3819_v48  ;;  %v967_v46 = vsel %vm399_vm0, %v204_v28, 0.0  ;;  %v1833_v17 = vld [vmem:[%s8645_s1 + $0x8c8] sm:$0xff]  ;;  %v1832_v50 = vld [vmem:[%s8645_s1 + $0x8c0] sm:$0xff] }
 0x2e0   :  { %v1356_v49 = vpop.xlane.xlu1 %1355  ;;  %v1305_v56 = vpop.xlane.xlu0 %1304  ;;  %v4265_v45 = vsel %vm8684_vm4, %v3706_v63, %v8685_v54  ;;  %v3923_v24 = vsel %vm2413_vm11, %v3922_v47, %v3918_v35  ;;  %v3843_v12 = vrot.slane %v7798_v6, %v5164_v19  ;;  %v1402_v59 = vsel %vm399_vm0, %v349_v44, 0.0  ;;  %v8686_v63 = vld [vmem:[#allocation14_spill] sm:$0xff]  ;;  %v1831_v54 = vld [vmem:[%s8645_s1 + $0x8b8] sm:$0xff] }
 0x2e1   :  { %4492 = vmatmul.mubr.f32.vlgmr.msra.gmra.mxu0 %v4265_v45  ;;  %v3937_v29 = vrot.slane %v1356_v49, %v5209_v57  ;;  %v3829_v2 = vsel %vm2392_vm8, %v3828_v10, %v3824_v7  ;;  %v3928_v23 = vsel %vm2420_vm12, %v3927_v0, %v3923_v24  ;;  %v3853_v8 = vrot.slane %v1305_v56, %v5184_v37  ;;  %v205_v49 = vld [vmem:[%s8644_s0 + $0x5f0] sm:$0xff]  ;;  %v396_v56 = vld [vmem:[%s8644_s0 + $0xbe8] sm:$0xff]  ;;  %v350_v24 = vld [vmem:[%s8644_s0 + $0xa78] sm:$0xff] }
 0x2e2   :  { %4570 = vmatpush1.msra.mxu0 %v1838_v11  ;;  %v3834_v6 = vsel %vm2399_vm9, %v3833_v20, %v3829_v2  ;;  %v1492_v11 = vsel %vm399_vm0, %v379_v5, 0.0  ;;  %v1453_v43 = vsel %vm399_vm0, %v366_v14, 0.0  ;;  %v1830_v44 = vld [vmem:[%s8645_s1 + $0x8b0] sm:$0xff]  ;;  %v1829_v40 = vld [vmem:[%s8645_s1 + $0x8a8] sm:$0xff]  ;;  %v970_v35 = vsel %vm399_vm0, %v205_v49, 0.0  ;;  %v1900_v2 = vld [vmem:[%s8645_s1 + $0xae0] sm:$0xff] }
 0x2e3   :  { %1541 = vadd.xlane.f32.xlu1 %v1540_v34  ;;  %1490 = vadd.xlane.f32.xlu0 %v1489_v51  ;;  %v3933_v34 = vsel %vm2427_vm13, %v3932_v26, %v3928_v23  ;;  %v3839_v36 = vsel %vm2406_vm10, %v3838_v18, %v3834_v6  ;;  %v1902_v20 = vld [vmem:[%s8645_s1 + $0xaf0] sm:$0xff]  ;;  %v1543_v18 = vsel %vm399_vm0, %v396_v56, 0.0  ;;  %v1895_v56 = vld [vmem:[%s8645_s1 + $0xab8] sm:$0xff] }
 0x2e4   :  { %v1359_v39 = vpop.xlane.xlu1 %1358  ;;  %v1308_v38 = vpop.xlane.xlu0 %1307  ;;  %4571 = vmatprep.subr.mxu0 %v1837_v13  ;;  %v3938_v1 = vsel %vm2434_vm14, %v3937_v29, %v3933_v34  ;;  %v3844_v21 = vsel %vm2413_vm11, %v3843_v12, %v3839_v36  ;;  %v8687_v13 = vld [vmem:[#allocation13_spill] sm:$0xff]  ;;  %v1405_v34 = vsel %vm399_vm0, %v350_v24, 0.0  ;;  %v1822_v49 = vld [vmem:[%s8645_s1 + $0x870] sm:$0xff] }
 0x2e5   :  { %v3942_v61 = vrot.slane %v1359_v39, %v5204_v55  ;;  %4572 = vmatpush1.msra.mxu0 %v1836_v58  ;;  %v3858_v16 = vrot.slane %v1308_v38, %v5209_v57  ;;  %v3849_v32 = vsel %vm2420_vm12, %v3848_v15, %v3844_v21  ;;  %v380_v29 = vld [vmem:[%s8644_s0 + $0xb68] sm:$0xff]  ;;  %v1828_v12 = vld [vmem:[%s8645_s1 + $0x8a0] sm:$0xff]  ;;  %v1826_v15 = vld [vmem:[%s8645_s1 + $0x890] sm:$0xff] }
 0x2e6   :  { %4573 = vmatprep.subr.mxu0 %v1835_v22  ;;  %v3854_v10 = vsel %vm2427_vm13, %v3853_v8, %v3849_v32  ;;  %v1827_v22 = vld [vmem:[%s8645_s1 + $0x898] sm:$0xff]  ;;  %v1495_v6 = vsel %vm399_vm0, %v380_v29, 0.0  ;;  %v1825_v36 = vld [vmem:[%s8645_s1 + $0x888] sm:$0xff]  ;;  %v1896_v32 = vld [vmem:[%s8645_s1 + $0xac0] sm:$0xff] }
 0x2e7   :  { %1403 = vadd.xlane.f32.xlu1 %v1402_v59  ;;  %968 = vadd.xlane.f32.xlu0 %v967_v46  ;;  %v3943_v4 = vsel %vm2441_vm15, %v3942_v61, %v3938_v1  ;;  %v3859_v45 = vsel %vm2434_vm14, %v3858_v16, %v3854_v10  ;;  %v1901_v59 = vld [vmem:[%s8645_s1 + $0xae8] sm:$0xff]  ;;  %v1899_v39 = vld [vmem:[%s8645_s1 + $0xad8] sm:$0xff]  ;;  %v1898_v1 = vld [vmem:[%s8645_s1 + $0xad0] sm:$0xff] }
 0x2e8   :  { %v1410_v33 = vpop.xlane.xlu1 %1409  ;;  %v1311_v47 = vpop.xlane.xlu0 %1310  ;;  %v4268_v51 = vsel %vm8684_vm4, %v3943_v4, %v8686_v63  ;;  %4574 = vmatpush1.msra.mxu0 %v1834_v60  ;;  %v206_v8 = vld [vmem:[%s8644_s0 + $0x5f8] sm:$0xff]  ;;  %v397_v60 = vld [vmem:[%s8644_s0 + $0xbf0] sm:$0xff]  ;;  %v1824_v16 = vld [vmem:[%s8645_s1 + $0x880] sm:$0xff] }
 0x2e9   :  { %v3863_v0 = vrot.slane %v1311_v47, %v5204_v55  ;;  %4562 = vmatprep.mubr.f32.mxu1 %v4268_v51  ;;  %4575 = vmatprep.subr.mxu0 %v1833_v17  ;;  %v4026_v58 = vrot.slane %v1410_v33, %v8677_v30  ;;  %v1897_v17 = vld [vmem:[%s8645_s1 + $0xac8] sm:$0xff]  ;;  %v973_v63 = vsel %vm399_vm0, %v206_v8, 0.0  ;;  %v1546_v51 = vsel %vm399_vm0, %v397_v60, 0.0  ;;  %v1892_v24 = vld [vmem:[%s8645_s1 + $0xaa0] sm:$0xff] }
 0x2ea   :  { %4576 = vmatpush1.msra.mxu0 %v1832_v50  ;;  %v1823_v50 = vld [vmem:[%s8645_s1 + $0x878] sm:$0xff]  ;;  %v1888_v60 = vld [vmem:[%s8645_s1 + $0xa80] sm:$0xff] }
 0x2eb   :  { %v3864_v62 = vsel %vm2441_vm15, %v3863_v0, %v3859_v45  ;;  %1493 = vadd.xlane.f32.xlu1 %v1492_v11  ;;  %1454 = vadd.xlane.f32.xlu0 %v1453_v43  ;;  %v398_v11 = vld [vmem:[%s8644_s0 + $0xbf8] sm:$0xff]  ;;  %v381_v0 = vld [vmem:[%s8644_s0 + $0xb70] sm:$0xff] }
 0x2ec   :  { %v1362_v26 = vpop.xlane.xlu1 %1361  ;;  %v1413_v28 = vpop.xlane.xlu0 %1412  ;;  %v4267_v48 = vsel %vm8684_vm4, %v3864_v62, %v8687_v13  ;;  %4577 = vmatprep.subr.mxu0 %v1831_v54  ;;  %v1821_v54 = vld [vmem:[%s8645_s1 + $0x868] sm:$0xff]  ;;  %v1894_v45 = vld [vmem:[%s8645_s1 + $0xab0] sm:$0xff]  ;;  %v1820_v62 = vld [vmem:[%s8645_s1 + $0x860] sm:$0xff]  ;;  %v1498_v13 = vsel %vm399_vm0, %v381_v0, 0.0 }
 0x2ed   :  { %v4030_v7 = vrot.slane %v1413_v28, %v8678_v25  ;;  %4563 = vmatmul.mubr.f32.vlgmr.msra.gmra.mxu1 %v4267_v48  ;;  %4578 = vmatpush1.msra.mxu0 %v1830_v44  ;;  %v3947_v61 = vrot.slane %v1362_v26, %v8677_v30  ;;  %v1549_v28 = vsel %vm399_vm0, %v398_v11, 0.0  ;;  %v382_v48 = vld [vmem:[%s8644_s0 + $0xb78] sm:$0xff]  ;;  %v1884_v11 = vld [vmem:[%s8645_s1 + $0xa60] sm:$0xff]  ;;  %v1810_v0 = vld [vmem:[%s8645_s1 + $0x810] sm:$0xff] }
 0x2ee   :  { %4579 = vmatprep.subr.mxu0 %v1829_v40  ;;  %4641 = vmatpush1.msra.mxu1 %v1902_v20  ;;  %v1893_v40 = vld [vmem:[%s8645_s1 + $0xaa8] sm:$0xff] }
 0x2ef   :  { %v4031_v23 = vsel %vm2343_vm1, %v4030_v7, %v4026_v58  ;;  %971 = vadd.xlane.f32.xlu1 %v970_v35  ;;  %1544 = vadd.xlane.f32.xlu0 %v1543_v18  ;;  %v8688_v35 = vld [vmem:[#allocation9_spill] sm:$0xff]  ;;  %v190_v58 = vld [vmem:[%s8644_s0 + $0x578] sm:$0xff] }
 0x2f0   :  { %v1416_v38 = vpop.xlane.xlu1 %1415  ;;  %v1365_v46 = vpop.xlane.xlu0 %1364  ;;  %4580 = vmatpush1.msra.mxu0 %v1828_v12  ;;  %4642 = vmatprep.subr.mxu1 %v1901_v59  ;;  %v1819_v7 = vld [vmem:[%s8645_s1 + $0x858] sm:$0xff]  ;;  %v1818_v12 = vld [vmem:[%s8645_s1 + $0x850] sm:$0xff] }
 0x2f1   :  { %v4035_v5 = vrot.slane %v1416_v38, %v8679_v31  ;;  %v3951_v14 = vrot.slane %v1365_v46, %v8678_v25  ;;  %4581 = vmatprep.subr.mxu0 %v1827_v22  ;;  %4643 = vmatpush1.msra.mxu1 %v1900_v2  ;;  %v1891_v59 = vld [vmem:[%s8645_s1 + $0xa98] sm:$0xff]  ;;  %v1501_v46 = vsel %vm399_vm0, %v382_v48, 0.0 }
 0x2f2   :  { %4582 = vmatpush1.msra.mxu0 %v1826_v15  ;;  %4644 = vmatprep.subr.mxu1 %v1899_v39  ;;  %v1890_v15 = vld [vmem:[%s8645_s1 + $0xa90] sm:$0xff] }
 0x2f3   :  { %v4036_v21 = vsel %vm2350_vm2, %v4035_v5, %v4031_v23  ;;  %v3952_v4 = vsel %vm2343_vm1, %v3951_v14, %v3947_v61  ;;  %1496 = vadd.xlane.f32.xlu1 %v1495_v6  ;;  %1406 = vadd.xlane.f32.xlu0 %v1405_v34  ;;  %v1817_v23 = vld [vmem:[%s8645_s1 + $0x848] sm:$0xff]  ;;  %v925_v6 = vsel %vm399_vm0, %v190_v58, 0.0  ;;  %v1816_v61 = vld [vmem:[%s8645_s1 + $0x840] sm:$0xff]  ;;  %v1815_v14 = vld [vmem:[%s8645_s1 + $0x838] sm:$0xff]  ;;  %vm8690_vm0 = vcmask 326912  }
 0x2f4   :  { %v933_v33 = vpop.xlane.xlu1 %932  ;;  %v930_v47 = vpop.xlane.xlu0 %929  ;;  %4583 = vmatprep.subr.mxu0 %v1825_v36  ;;  %4645 = vmatpush1.msra.mxu1 %v1898_v1  ;;  %v1889_v5 = vld [vmem:[%s8645_s1 + $0xa88] sm:$0xff]  ;;  %v1814_v1 = vld [vmem:[%s8645_s1 + $0x830] sm:$0xff]  ;;  %vm8693_vm4 = vmmov %vm8690_vm0 }
 0x2f5   :  { %v3240_v43 = vrot.slane %v933_v33, %v8678_v25  ;;  %v3236_v10 = vrot.slane %v930_v47, %v8677_v30  ;;  %4584 = vmatpush1.msra.mxu0 %v1824_v16  ;;  %4646 = vmatprep.subr.mxu1 %v1897_v17  ;;  %v1887_v16 = vld [vmem:[%s8645_s1 + $0xa78] sm:$0xff]  ;;  %v1812_v47 = vld [vmem:[%s8645_s1 + $0x820] sm:$0xff] }
 0x2f6   :  { %4585 = vmatprep.subr.mxu0 %v1823_v50  ;;  %4647 = vmatpush1.msra.mxu1 %v1896_v32  ;;  %v1886_v50 = vld [vmem:[%s8645_s1 + $0xa70] sm:$0xff] }
 0x2f7   :  { %v8089_v44 = vsel %vm2343_vm1, %v3240_v43, %v3236_v10  ;;  %974 = vadd.xlane.f32.xlu1 %v973_v63  ;;  %1547 = vadd.xlane.f32.xlu0 %v1546_v51  ;;  %v1885_v63 = vld [vmem:[%s8645_s1 + $0xa68] sm:$0xff]  ;;  %v1811_v51 = vld [vmem:[%s8645_s1 + $0x818] sm:$0xff] }
 0x2f8   :  { %v1419_v20 = vpop.xlane.xlu1 %1418  ;;  %v1368_v26 = vpop.xlane.xlu0 %1367  ;;  %4586 = vmatpush1.msra.mxu0 %v1822_v49  ;;  %4648 = vmatprep.subr.mxu1 %v1895_v56  ;;  %v1883_v49 = vld [vmem:[%s8645_s1 + $0xa58] sm:$0xff] }
 0x2f9   :  { %v4040_v18 = vrot.slane %v1419_v20, %v8688_v35  ;;  %v3956_v29 = vrot.slane %v1368_v26, %v8679_v31  ;;  %4587 = vmatprep.subr.mxu0 %v1821_v54  ;;  %4649 = vmatpush1.msra.mxu1 %v1894_v45  ;;  %v1809_v45 = vld [vmem:[%s8645_s1 + $0x808] sm:$0xff]  ;;  %v1808_v20 = vld [vmem:[%s8645_s1 + $0x800] sm:$0xff] }
 0x2fa   :  { %4588 = vmatpush1.msra.mxu0 %v1820_v62  ;;  %4650 = vmatprep.subr.mxu1 %v1893_v40  ;;  %v8689_v62 = vld [vmem:[#allocation10_spill] sm:$0xff] }
 0x2fb   :  { %v8120_v22 = vsel %vm2357_vm3, %v4040_v18, %v4036_v21  ;;  %v3957_v2 = vsel %vm2350_vm2, %v3956_v29, %v3952_v4  ;;  %1550 = vadd.xlane.f32.xlu1 %v1549_v28  ;;  %1499 = vadd.xlane.f32.xlu0 %v1498_v13  ;;  %v1813_v4 = vld [vmem:[%s8645_s1 + $0x828] sm:$0xff]  ;;  %v1871_v28 = vld [vmem:[%s8645_s1 + $0x9f8] sm:$0xff]  ;;  %v1880_v13 = vld [vmem:[%s8645_s1 + $0xa40] sm:$0xff] }
 0x2fc   :  { %v1509_v39 = vpop.xlane.xlu1 %1508  ;;  %v1506_v38 = vpop.xlane.xlu0 %1505  ;;  %4589 = vmatprep.subr.mxu0 %v1819_v7  ;;  %4651 = vmatpush1.msra.mxu1 %v1892_v24  ;;  %v1881_v26 = vld [vmem:[%s8645_s1 + $0xa48] sm:$0xff]  ;;  %v1870_v18 = vld [vmem:[%s8645_s1 + $0x9f0] sm:$0xff]  ;;  %v1879_v29 = vld [vmem:[%s8645_s1 + $0xa38] sm:$0xff] }
 0x2fd   :  { %v4188_v34 = vrot.slane %v1509_v39, %v8678_v25  ;;  %v4184_v8 = vrot.slane %v1506_v38, %v8677_v30  ;;  %4590 = vmatpush1.msra.mxu0 %v1818_v12  ;;  %4652 = vmatprep.subr.mxu1 %v1891_v59  ;;  %v1869_v24 = vld [vmem:[%s8645_s1 + $0x9e8] sm:$0xff]  ;;  %v1878_v12 = vld [vmem:[%s8645_s1 + $0xa30] sm:$0xff]  ;;  %v1867_v39 = vld [vmem:[%s8645_s1 + $0x9d8] sm:$0xff] }
 0x2fe   :  { %4591 = vmatprep.subr.mxu0 %v1817_v23  ;;  %4653 = vmatpush1.msra.mxu1 %v1890_v15  ;;  %v1868_v23 = vld [vmem:[%s8645_s1 + $0x9e0] sm:$0xff]  ;;  %v1877_v15 = vld [vmem:[%s8645_s1 + $0xa28] sm:$0xff] }
 0x2ff   :  { %v8146_v36 = vsel %vm2343_vm1, %v4188_v34, %v4184_v8  ;;  %1502 = vadd.xlane.f32.xlu1 %v1501_v46  ;;  %926 = vadd.xlane.f32.xlu0 %v925_v6  ;;  %v1866_v46 = vld [vmem:[%s8645_s1 + $0x9d0] sm:$0xff]  ;;  %v1875_v6 = vld [vmem:[%s8645_s1 + $0xa18] sm:$0xff] }
 0x300   :  { %v1371_v17 = vpop.xlane.xlu1 %1370  ;;  %v936_v21 = vpop.xlane.xlu0 %935  ;;  %4592 = vmatpush1.msra.mxu0 %v1816_v61  ;;  %4654 = vmatprep.subr.mxu1 %v1889_v5  ;;  %v1865_v61 = vld [vmem:[%s8645_s1 + $0x9c8] sm:$0xff]  ;;  %v1874_v5 = vld [vmem:[%s8645_s1 + $0xa10] sm:$0xff] }
 0x301   :  { %v3961_v32 = vrot.slane %v1371_v17, %v8688_v35  ;;  %v3245_v33 = vrot.slane %v936_v21, %v8679_v31  ;;  %4593 = vmatprep.subr.mxu0 %v1815_v14  ;;  %4655 = vmatpush1.msra.mxu1 %v1888_v60  ;;  %v1872_v17 = vld [vmem:[%s8645_s1 + $0xa00] sm:$0xff] }
 0x302   :  { %4594 = vmatpush1.msra.mxu0 %v1814_v1  ;;  %4656 = vmatprep.subr.mxu1 %v1887_v16  ;;  %v1873_v1 = vld [vmem:[%s8645_s1 + $0xa08] sm:$0xff]  ;;  %v1863_v16 = vld [vmem:[%s8645_s1 + $0x9b8] sm:$0xff] }
 0x303   :  { %v8175_v43 = vsel %vm2357_vm3, %v3961_v32, %v3957_v2  ;;  %v8179_v10 = vsel %vm2350_vm2, %v3245_v33, %v8089_v44  ;;  %4595 = vmatprep.subr.mxu0 %v1813_v4  ;;  %4657 = vmatpush1.msra.mxu1 %v1886_v50  ;;  %v1882_v44 = vld [vmem:[%s8645_s1 + $0xa50] sm:$0xff]  ;;  %v1935_v32 = vld [vmem:[%s8645_s1 + $0xbf8] sm:$0xff] }
 0x304   :  { %v1458_v56 = vpop.xlane.xlu1 %1457  ;;  %v1422_v54 = vpop.xlane.xlu0 %1421  ;;  %4596 = vmatpush1.msra.mxu0 %v1812_v47  ;;  %4658 = vmatprep.subr.mxu1 %v1885_v63  ;;  %v1862_v50 = vld [vmem:[%s8645_s1 + $0x9b0] sm:$0xff]  ;;  %v1861_v63 = vld [vmem:[%s8645_s1 + $0x9a8] sm:$0xff] }
 0x305   :  { %v4045_v40 = vrot.slane %v1422_v54, %v8689_v62  ;;  %4597 = vmatprep.subr.mxu0 %v1811_v51  ;;  %4659 = vmatpush1.msra.mxu1 %v1884_v11  ;;  %v4105_v59 = vrot.slane %v1458_v56, %v8677_v30  ;;  %v1876_v30 = vld [vmem:[%s8645_s1 + $0xa20] sm:$0xff]  ;;  %v1934_v51 = vld [vmem:[%s8645_s1 + $0xbf0] sm:$0xff] }
 0x306   :  { %4598 = vmatpush1.msra.mxu0 %v1810_v0  ;;  %4660 = vmatprep.subr.mxu1 %v1883_v49  ;;  %v1933_v0 = vld [vmem:[%s8645_s1 + $0xbe8] sm:$0xff]  ;;  %v1859_v49 = vld [vmem:[%s8645_s1 + $0x998] sm:$0xff] }
 0x307   :  { %v8208_v48 = vsel %vm8690_vm0, %v4045_v40, %v8120_v22  ;;  %4599 = vmatprep.subr.mxu0 %v1809_v45  ;;  %4661 = vmatpush1.msra.mxu1 %v1882_v44  ;;  %v1858_v45 = vld [vmem:[%s8645_s1 + $0x990] sm:$0xff]  ;;  %v1931_v44 = vld [vmem:[%s8645_s1 + $0xbd8] sm:$0xff] }
 0x308   :  { %v1512_v58 = vpop.xlane.xlu1 %1511  ;;  %v1461_v7 = vpop.xlane.xlu0 %1460  ;;  %4600 = vmatpush1.msra.mxu0 %v1808_v20  ;;  %4662 = vmatprep.subr.mxu1 %v1881_v26  ;;  %v1857_v26 = vld [vmem:[%s8645_s1 + $0x988] sm:$0xff] }
 0x309   :  { %v4193_v22 = vrot.slane %v1512_v58, %v8679_v31  ;;  %v4109_v2 = vrot.slane %v1461_v7, %v8678_v25  ;;  %4601 = vmatprep.subr.mxu0 %v1871_v28  ;;  %4663 = vmatpush1.msra.mxu1 %v1880_v13  ;;  %v1930_v28 = vld [vmem:[%s8645_s1 + $0xbd0] sm:$0xff]  ;;  %v1855_v58 = vld [vmem:[%s8645_s1 + $0x978] sm:$0xff]  ;;  %v1928_v7 = vld [vmem:[%s8645_s1 + $0xbc0] sm:$0xff] }
 0x30a   :  { %4602 = vmatpush2.msra.mxu0 %v1870_v18  ;;  %4664 = vmatprep.subr.mxu1 %v1879_v29  ;;  %v1856_v18 = vld [vmem:[%s8645_s1 + $0x980] sm:$0xff]  ;;  %v1929_v29 = vld [vmem:[%s8645_s1 + $0xbc8] sm:$0xff] }
 0x30b   :  { %v8239_v25 = vsel %vm2350_vm2, %v4193_v22, %v8146_v36  ;;  %v4110_v38 = vsel %vm2343_vm1, %v4109_v2, %v4105_v59  ;;  %4603 = vmatprep.subr.mxu0 %v1869_v24  ;;  %4665 = vmatpush1.msra.mxu1 %v1878_v12  ;;  %v1864_v36 = vld [vmem:[%s8645_s1 + $0x9c0] sm:$0xff]  ;;  %vm8691_vm1 = vmmov %vm8690_vm0  ;;  %v1854_v59 = vld [vmem:[%s8645_s1 + $0x970] sm:$0xff] }
 0x30c   :  { %v1374_v34 = vpop.xlane.xlu1 %1373  ;;  %v939_v8 = vpop.xlane.xlu0 %938  ;;  %4604 = vmatpush2.msra.mxu0 %v1868_v23  ;;  %4666 = vmatprep.subr.mxu1 %v1877_v15  ;;  %v1927_v22 = vld [vmem:[%s8645_s1 + $0xbb8] sm:$0xff]  ;;  %v1853_v15 = vld [vmem:[%s8645_s1 + $0x968] sm:$0xff] }
 0x30d   :  { %v3966_v14 = vrot.slane %v1374_v34, %v8689_v62  ;;  %v3250_v60 = vrot.slane %v939_v8, %v8688_v35  ;;  %4605 = vmatprep.subr.mxu0 %v1867_v39  ;;  %4667 = vmatpush1.msra.mxu1 %v1876_v30  ;;  %v1926_v39 = vld [vmem:[%s8645_s1 + $0xbb0] sm:$0xff]  ;;  %v1924_v34 = vld [vmem:[%s8645_s1 + $0xba0] sm:$0xff] }
 0x30e   :  { %4606 = vmatpush2.msra.mxu0 %v1866_v46  ;;  %4668 = vmatprep.subr.mxu1 %v1875_v6  ;;  %v1925_v46 = vld [vmem:[%s8645_s1 + $0xba8] sm:$0xff]  ;;  %v1851_v6 = vld [vmem:[%s8645_s1 + $0x958] sm:$0xff] }
 0x30f   :  { %v8270_v21 = vsel %vm8691_vm1, %v3966_v14, %v8175_v43  ;;  %v3251_v4 = vsel %vm2357_vm3, %v3250_v60, %v8179_v10  ;;  %4607 = vmatprep.subr.mxu0 %v1865_v61  ;;  %4669 = vmatpush1.msra.mxu1 %v1874_v5  ;;  %v1860_v10 = vld [vmem:[%s8645_s1 + $0x9a0] sm:$0xff]  ;;  %v1850_v5 = vld [vmem:[%s8645_s1 + $0x950] sm:$0xff]  ;;  %v1923_v14 = vld [vmem:[%s8645_s1 + $0xb98] sm:$0xff] }
 0x310   :  { %v1464_v33 = vpop.xlane.xlu1 %1463  ;;  %v1425_v47 = vpop.xlane.xlu0 %1424  ;;  %4608 = vmatpush2.msra.mxu0 %v1864_v36  ;;  %4670 = vmatprep.subr.mxu1 %v1873_v1  ;;  %v1849_v1 = vld [vmem:[%s8645_s1 + $0x948] sm:$0xff] }
 0x311   :  { %v4114_v11 = vrot.slane %v1464_v33, %v8679_v31  ;;  %v4050_v43 = vrot.slane %v1425_v47, %v5111_v42  ;;  %4609 = vmatprep.subr.mxu0 %v1863_v16  ;;  %4671 = vmatpush1.msra.mxu1 %v1872_v17  ;;  %v1932_v31 = vld [vmem:[%s8645_s1 + $0xbe0] sm:$0xff]  ;;  %v1922_v16 = vld [vmem:[%s8645_s1 + $0xb90] sm:$0xff] }
 0x312   :  { %4610 = vmatpush2.msra.mxu0 %v1862_v50  ;;  %4672 = vmatprep.subr.mxu1 %v1935_v32  ;;  %v1921_v50 = vld [vmem:[%s8645_s1 + $0xb88] sm:$0xff]  ;;  %v1847_v32 = vld [vmem:[%s8645_s1 + $0x938] sm:$0xff] }
 0x313   :  { %v8301_v56 = vsel %vm2350_vm2, %v4114_v11, %v4110_v38  ;;  %v4051_v54 = vsel %vm2371_vm5, %v4050_v43, %v8208_v48  ;;  %4611 = vmatprep.subr.mxu0 %v1861_v63  ;;  %4673 = vmatpush2.msra.mxu1 %v1934_v51  ;;  %vm8692_vm2 = vmmov %vm8690_vm0  ;;  %v1852_v38 = vld [vmem:[%s8645_s1 + $0x960] sm:$0xff]  ;;  %v1846_v63 = vld [vmem:[%s8645_s1 + $0x930] sm:$0xff] }
 0x314   :  { %v942_v40 = vpop.xlane.xlu1 %941  ;;  %v1515_v20 = vpop.xlane.xlu0 %1514  ;;  %4612 = vmatpush2.msra.mxu0 %v1860_v10  ;;  %4674 = vmatprep.subr.mxu1 %v1933_v0  ;;  %v1919_v51 = vld [vmem:[%s8645_s1 + $0xb78] sm:$0xff]  ;;  %v1845_v10 = vld [vmem:[%s8645_s1 + $0x928] sm:$0xff]  ;;  %v1918_v0 = vld [vmem:[%s8645_s1 + $0xb70] sm:$0xff] }
 0x315   :  { %v3255_v13 = vrot.slane %v942_v40, %v8689_v62  ;;  %v4198_v48 = vrot.slane %v1515_v20, %v8688_v35  ;;  %4613 = vmatprep.subr.mxu0 %v1859_v49  ;;  %4675 = vmatpush2.msra.mxu1 %v1932_v31 }
 0x316   :  { %4614 = vmatpush2.msra.mxu0 %v1858_v45  ;;  %4676 = vmatprep.subr.mxu1 %v1931_v44  ;;  %v1843_v45 = vld [vmem:[%s8645_s1 + $0x918] sm:$0xff]  ;;  %v1916_v44 = vld [vmem:[%s8645_s1 + $0xb60] sm:$0xff] }
 0x317   :  { %v8332_v24 = vsel %vm8692_vm2, %v3255_v13, %v3251_v4  ;;  %v4199_v12 = vsel %vm2357_vm3, %v4198_v48, %v8239_v25  ;;  %4615 = vmatprep.subr.mxu0 %v1857_v26  ;;  %4677 = vmatpush2.msra.mxu1 %v1930_v28  ;;  %v1848_v4 = vld [vmem:[%s8645_s1 + $0x940] sm:$0xff]  ;;  %v1842_v26 = vld [vmem:[%s8645_s1 + $0x910] sm:$0xff]  ;;  %v1915_v28 = vld [vmem:[%s8645_s1 + $0xb58] sm:$0xff] }
 0x318   :  { %v1428_v2 = vpop.xlane.xlu1 %1427  ;;  %v1377_v23 = vpop.xlane.xlu0 %1376  ;;  %4616 = vmatpush2.msra.mxu0 %v1856_v18  ;;  %4678 = vmatprep.subr.mxu1 %v1929_v29  ;;  %v1841_v18 = vld [vmem:[%s8645_s1 + $0x908] sm:$0xff]  ;;  %v1914_v29 = vld [vmem:[%s8645_s1 + $0xb50] sm:$0xff] }
 0x319   :  { %v4055_v30 = vrot.slane %v1428_v2, %v5126_v53  ;;  %v3971_v25 = vrot.slane %v1377_v23, %v5111_v42  ;;  %4617 = vmatprep.subr.mxu0 %v1855_v58  ;;  %4679 = vmatpush2.msra.mxu1 %v1928_v7  ;;  %v1911_v2 = vld [vmem:[%s8645_s1 + $0xb38] sm:$0xff] }
 0x31a   :  { %4618 = vmatpush2.msra.mxu0 %v1854_v59  ;;  %4680 = vmatprep.subr.mxu1 %v1927_v22  ;;  %v1912_v59 = vld [vmem:[%s8645_s1 + $0xb40] sm:$0xff] }
 0x31b   :  { %v8363_v8 = vsel %vm2378_vm6, %v4055_v30, %v4051_v54  ;;  %v3972_v61 = vsel %vm2371_vm5, %v3971_v25, %v8270_v21  ;;  %4619 = vmatprep.subr.mxu0 %v1853_v15  ;;  %4681 = vmatpush2.msra.mxu1 %v1926_v39  ;;  %v1917_v54 = vld [vmem:[%s8645_s1 + $0xb68] sm:$0xff]  ;;  %v1910_v39 = vld [vmem:[%s8645_s1 + $0xb30] sm:$0xff] }
 0x31c   :  { %v1518_v60 = vpop.xlane.xlu1 %1517  ;;  %v1467_v36 = vpop.xlane.xlu0 %1466  ;;  %4620 = vmatpush2.msra.mxu0 %v1852_v38  ;;  %4682 = vmatprep.subr.mxu1 %v1925_v46  ;;  %v1909_v38 = vld [vmem:[%s8645_s1 + $0xb28] sm:$0xff]  ;;  %v1908_v46 = vld [vmem:[%s8645_s1 + $0xb20] sm:$0xff] }
 0x31d   :  { %v4203_v17 = vrot.slane %v1518_v60, %v8689_v62  ;;  %v4119_v21 = vrot.slane %v1467_v36, %v8688_v35  ;;  %4621 = vmatprep.subr.mxu0 %v1851_v6  ;;  %4683 = vmatpush2.msra.mxu1 %v1924_v34  ;;  %v1920_v35 = vld [vmem:[%s8645_s1 + $0xb80] sm:$0xff] }
 0x31e   :  { %4622 = vmatpush2.msra.mxu0 %v1850_v5  ;;  %4684 = vmatprep.subr.mxu1 %v1923_v14  ;;  %v1906_v14 = vld [vmem:[%s8645_s1 + $0xb10] sm:$0xff] }
 0x31f   :  { %v4204_v33 = vsel %vm8693_vm4, %v4203_v17, %v4199_v12  ;;  %v4120_v47 = vsel %vm2357_vm3, %v4119_v21, %v8301_v56  ;;  %4623 = vmatprep.subr.mxu0 %v1849_v1  ;;  %4685 = vmatpush2.msra.mxu1 %v1922_v16  ;;  %v1844_v56 = vld [vmem:[%s8645_s1 + $0x920] sm:$0xff]  ;;  %v1913_v12 = vld [vmem:[%s8645_s1 + $0xb48] sm:$0xff]  ;;  %vm8694_vm3 = vmmov %vm8690_vm0 }
 0x320   :  { %v1380_v11 = vpop.xlane.xlu1 %1379  ;;  %v945_v43 = vpop.xlane.xlu0 %944  ;;  %4624 = vmatpush2.msra.mxu0 %v1848_v4  ;;  %4686 = vmatprep.subr.mxu1 %v1921_v50  ;;  %v1905_v1 = vld [vmem:[%s8645_s1 + $0xb08] sm:$0xff]  ;;  %v1904_v16 = vld [vmem:[%s8645_s1 + $0xb00] sm:$0xff] }
 0x321   :  { %v3976_v49 = vrot.slane %v1380_v11, %v5126_v53  ;;  %v3260_v31 = vrot.slane %v945_v43, %v5111_v42  ;;  %4625 = vmatprep.subr.mxu0 %v1847_v32  ;;  %4687 = vmatpush2.msra.mxu1 %v1920_v35 }
 0x322   :  { %4626 = vmatpush2.msra.mxu0 %v1846_v63  ;;  %4688 = vmatprep.subr.mxu1 %v1919_v51 }
 0x323   :  { %v3977_v40 = vsel %vm2378_vm6, %v3976_v49, %v3972_v61  ;;  %v3261_v20 = vsel %vm2371_vm5, %v3260_v31, %v8332_v24  ;;  %4627 = vmatprep.subr.mxu0 %v1845_v10  ;;  %4689 = vmatpush2.msra.mxu1 %v1918_v0  ;;  %v1840_v24 = vld [vmem:[%s8645_s1 + $0x900] sm:$0xff] }
 0x324   :  { %v1470_v13 = vpop.xlane.xlu1 %1469  ;;  %v1431_v48 = vpop.xlane.xlu0 %1430  ;;  %4628 = vmatpush2.msra.mxu0 %v1844_v56  ;;  %4690 = vmatprep.subr.mxu1 %v1917_v54 }
 0x325   :  { %v4124_v58 = vrot.slane %v1470_v13, %v8689_v62  ;;  %v4060_v7 = vrot.slane %v1431_v48, %v5123_v52  ;;  %4629 = vmatprep.subr.mxu0 %v1843_v45  ;;  %4691 = vmatpush2.msra.mxu1 %v1916_v44 }
 0x326   :  { %4630 = vmatpush2.msra.mxu0 %v1842_v26  ;;  %4692 = vmatprep.subr.mxu1 %v1915_v28 }
 0x327   :  { %v4125_v62 = vsel %vm8694_vm3, %v4124_v58, %v4120_v47  ;;  %v4061_v22 = vsel %vm2385_vm7, %v4060_v7, %v8363_v8  ;;  %4631 = vmatprep.subr.mxu0 %v1841_v18  ;;  %4693 = vmatpush2.msra.mxu1 %v1914_v29  ;;  %v1907_v8 = vld [vmem:[%s8645_s1 + $0xb18] sm:$0xff] }
 0x328   :  { %v948_v23 = vpop.xlane.xlu1 %947  ;;  %v1521_v15 = vpop.xlane.xlu0 %1520  ;;  %4632 = vmatpush2.msra.mxu0 %v1840_v24  ;;  %4694 = vmatprep.subr.mxu1 %v1913_v12 }
 0x329   :  { %v3265_v30 = vrot.slane %v948_v23, %v5126_v53  ;;  %v4208_v25 = vrot.slane %v1521_v15, %v5111_v42  ;;  %4695 = vmatpush2.msra.mxu1 %v1912_v59 }
 0x32a   :  { %4696 = vmatprep.subr.mxu1 %v1911_v2 }
 0x32b   :  { %v3266_v6 = vsel %vm2378_vm6, %v3265_v30, %v3261_v20  ;;  %v4209_v34 = vsel %vm2371_vm5, %v4208_v25, %v4204_v33  ;;  %4697 = vmatpush2.msra.mxu1 %v1910_v39 }
 0x32c   :  { %v1434_v61 = vpop.xlane.xlu1 %1433  ;;  %v1383_v5 = vpop.xlane.xlu0 %1382  ;;  %4698 = vmatprep.subr.mxu1 %v1909_v38 }
 0x32d   :  { %v4065_v60 = vrot.slane %v1434_v61, %v5156_v9  ;;  %v3981_v36 = vrot.slane %v1383_v5, %v5123_v52  ;;  %4699 = vmatpush2.msra.mxu1 %v1908_v46 }
 0x32e   :  { %4700 = vmatprep.subr.mxu1 %v1907_v8 }
 0x32f   :  { %v4066_v17 = vsel %vm2392_vm8, %v4065_v60, %v4061_v22  ;;  %v3982_v21 = vsel %vm2385_vm7, %v3981_v36, %v3977_v40  ;;  %4701 = vmatpush2.msra.mxu1 %v1906_v14 }
 0x330   :  { %v1524_v4 = vpop.xlane.xlu1 %1523  ;;  %v1473_v50 = vpop.xlane.xlu0 %1472  ;;  %4702 = vmatprep.subr.mxu1 %v1905_v1 }
 0x331   :  { %v4213_v32 = vrot.slane %v1524_v4, %v5126_v53  ;;  %v4129_v35 = vrot.slane %v1473_v50, %v5111_v42  ;;  %4703 = vmatpush2.msra.mxu1 %v1904_v16 }
 0x333   :  { %v4214_v33 = vsel %vm2378_vm6, %v4213_v32, %v4209_v34  ;;  %v4130_v47 = vsel %vm2371_vm5, %v4129_v35, %v4125_v62  ;;  %vm8696_vm5 = vcmask 1041409  }
 0x334   :  { %v1386_v63 = vpop.xlane.xlu1 %1385  ;;  %v951_v51 = vpop.xlane.xlu0 %950 }
 0x335   :  { %v3986_v11 = vrot.slane %v1386_v63, %v5156_v9  ;;  %v3270_v43 = vrot.slane %v951_v51, %v5123_v52 }
 0x337   :  { %v8490_v10 = vsel %vm2392_vm8, %v3986_v11, %v3982_v21  ;;  %v3271_v0 = vsel %vm2385_vm7, %v3270_v43, %v3266_v6 }
 0x338   :  { %v1476_v49 = vpop.xlane.xlu1 %1475  ;;  %v1437_v31 = vpop.xlane.xlu0 %1436 }
 0x339   :  { %v4134_v42 = vrot.slane %v1476_v49, %v5126_v53  ;;  %v4070_v61 = vrot.slane %v1437_v31, %v5144_v3 }
 0x33b   :  { %v8495_v56 = vsel %vm2378_vm6, %v4134_v42, %v4130_v47  ;;  %v4071_v16 = vsel %vm2399_vm9, %v4070_v61, %v4066_v17  ;;  %vm8698_vm6 = vmmov %vm8696_vm5 }
 0x33c   :  { %v954_v54 = vpop.xlane.xlu1 %953  ;;  %v1527_v45 = vpop.xlane.xlu0 %1526 }
 0x33d   :  { %v3275_v44 = vrot.slane %v954_v54, %v5156_v9  ;;  %v4218_v40 = vrot.slane %v1527_v45, %v5123_v52 }
 0x33f   :  { %v8500_v20 = vsel %vm2392_vm8, %v3275_v44, %v3271_v0  ;;  %v4219_v26 = vsel %vm2385_vm7, %v4218_v40, %v4214_v33  ;;  %v8695_v44 = vld [vmem:[#allocation16_spill] sm:$0xff] }
 0x340   :  { %v1440_v28 = vpop.xlane.xlu1 %1439  ;;  %v1389_v13 = vpop.xlane.xlu0 %1388 }
 0x341   :  { %v4075_v5 = vrot.slane %v1440_v28, %v5176_v27  ;;  %v3991_v63 = vrot.slane %v1389_v13, %v5144_v3 }
 0x343   :  { %v4076_v4 = vsel %vm2406_vm10, %v4075_v5, %v4071_v16  ;;  %v3992_v28 = vsel %vm2399_vm9, %v3991_v63, %v8490_v10 }
 0x344   :  { %v1530_v48 = vpop.xlane.xlu1 %1529  ;;  %v8503_v18 = vpop.xlane.xlu0 %1478 }
 0x345   :  { %v4223_v31 = vrot.slane %v1530_v48, %v5156_v9 }
 0x347   :  { %v4224_v10 = vsel %vm2392_vm8, %v4223_v31, %v4219_v26 }
 0x348   :  { %v1392_v53 = vpop.xlane.xlu1 %1391  ;;  %v8505_v29 = vpop.xlane.xlu0 %956 }
 0x349   :  { %v3996_v17 = vrot.slane %v1392_v53, %v5176_v27  ;;  %v4139_v53 = vrot.slane %v8503_v18, %v5123_v52  ;;  %v3280_v48 = vrot.slane %v8505_v29, %v5144_v3 }
 0x34b   :  { %v3281_v26 = vsel %vm2399_vm9, %v3280_v48, %v8500_v20 }
 0x34c   :  { %v8507_v58 = vpop.xlane.xlu1 %1481  ;;  %v1443_v7 = vpop.xlane.xlu0 %1442 }
 0x34d   :  { %v4080_v14 = vrot.slane %v1443_v7, %v5164_v19  ;;  %v3997_v7 = vsel %vm2406_vm10, %v3996_v17, %v3992_v28 }
 0x34f   :  { %v4081_v32 = vsel %vm2413_vm11, %v4080_v14, %v4076_v4 }
 0x350   :  { %v8509_v24 = vpop.xlane.xlu1 %959  ;;  %v8511_v12 = vpop.xlane.xlu0 %1532 }
 0x351   :  { %v3285_v52 = vrot.slane %v8509_v24, %v5176_v27  ;;  %v4228_v18 = vrot.slane %v8511_v12, %v5144_v3 }
 0x354   :  { %v1446_v59 = vpop.xlane.xlu1 %1445  ;;  %v1395_v62 = vpop.xlane.xlu0 %1394 }
 0x355   :  { %v4085_v60 = vrot.slane %v1446_v59, %v5190_v41  ;;  %v4001_v0 = vrot.slane %v1395_v62, %v5164_v19  ;;  %v4144_v62 = vrot.slane %v8507_v58, %v5156_v9  ;;  %v4140_v9 = vsel %vm2385_vm7, %v4139_v53, %v8495_v56  ;;  %vm8699_vm7 = vmmov %vm8696_vm5 }
 0x357   :  { %v4086_v35 = vsel %vm2420_vm12, %v4085_v60, %v4081_v32  ;;  %v4145_v24 = vsel %vm2392_vm8, %v4144_v62, %v4140_v9  ;;  %v8700_v62 = vld [vmem:[#allocation17_spill] sm:$0xff]  ;;  %vm8701_vm8 = vmmov %vm8696_vm5 }
 0x358   :  { %v8513_v22 = vpop.xlane.xlu1 %1535  ;;  %v8515_v2 = vpop.xlane.xlu0 %1484 }
 0x359   :  { %v4233_v58 = vrot.slane %v8513_v22, %v5176_v27  ;;  %v4149_v56 = vrot.slane %v8515_v2, %v5144_v3 }
 0x35c   :  { %v1398_v23 = vpop.xlane.xlu1 %1397  ;;  %v8517_v15 = vpop.xlane.xlu0 %962 }
 0x35d   :  { %v4006_v42 = vrot.slane %v1398_v23, %v5190_v41  ;;  %v4002_v23 = vsel %vm2413_vm11, %v4001_v0, %v3997_v7  ;;  %v3290_v12 = vrot.slane %v8517_v15, %v5164_v19  ;;  %v3286_v15 = vsel %vm2406_vm10, %v3285_v52, %v3281_v26 }
 0x360   :  { %v8519_v39 = vpop.xlane.xlu1 %1487  ;;  %v1449_v30 = vpop.xlane.xlu0 %1448 }
 0x361   :  { %v4090_v21 = vrot.slane %v1449_v30, %v5184_v37  ;;  %v4007_v30 = vsel %vm2420_vm12, %v4006_v42, %v4002_v23 }
 0x363   :  { %v4091_v51 = vsel %vm2427_vm13, %v4090_v21, %v4086_v35  ;;  %v8697_v21 = vld [vmem:[#allocation15_spill] sm:$0xff]  ;;  %v3291_v35 = vsel %vm2413_vm11, %v3290_v12, %v3286_v15 }
 0x364   :  { %v8521_v25 = vpop.xlane.xlu1 %965  ;;  %v8523_v38 = vpop.xlane.xlu0 %1538 }
 0x365   :  { %v4238_v14 = vrot.slane %v8523_v38, %v5164_v19  ;;  %v3295_v20 = vrot.slane %v8521_v25, %v5190_v41  ;;  %v4229_v38 = vsel %vm2399_vm9, %v4228_v18, %v4224_v10  ;;  %v4154_v25 = vrot.slane %v8519_v39, %v5176_v27 }
 0x366   :  { %v4234_v2 = vsel %vm2406_vm10, %v4233_v58, %v4229_v38 }
 0x368   :  { %v1452_v46 = vpop.xlane.xlu1 %1451  ;;  %v1401_v6 = vpop.xlane.xlu0 %1400 }
 0x369   :  { %v4095_v50 = vrot.slane %v1452_v46, %v5209_v57  ;;  %v4011_v13 = vrot.slane %v1401_v6, %v5184_v37 }
 0x36b   :  { %v4096_v43 = vsel %vm2434_vm14, %v4095_v50, %v4091_v51  ;;  %v4012_v29 = vsel %vm2427_vm13, %v4011_v13, %v4007_v30  ;;  %v4150_v51 = vsel %vm2399_vm9, %v4149_v56, %v4145_v24  ;;  %v4351_v30 = vpop.f32.mrf.mxu0 }
 0x36c   :  { %v8525_v34 = vpop.xlane.xlu1 %1541  ;;  %v8527_v8 = vpop.xlane.xlu0 %1490 }
 0x36d   :  { %v4243_v22 = vrot.slane %v8525_v34, %v5190_v41  ;;  %v4159_v63 = vrot.slane %v8527_v8, %v5164_v19  ;;  %v4155_v8 = vsel %vm2406_vm10, %v4154_v25, %v4150_v51  ;;  %v4353_v18 = vpop.f32.mrf.mxu0 }
 0x370   :  { %v1404_v36 = vpop.xlane.xlu1 %1403  ;;  %v8533_v1 = vpop.xlane.xlu0 %968 }
 0x371   :  { %v4016_v59 = vrot.slane %v1404_v36, %v5209_v57  ;;  %v3300_v50 = vrot.slane %v8533_v1, %v5184_v37 }
 0x373   :  { %v4017_v5 = vsel %vm2434_vm14, %v4016_v59, %v4012_v29  ;;  %v4422_v29 = vpop.f32.mrf.mxu1 }
 0x374   :  { %v8541_v33 = vpop.xlane.xlu1 %1493  ;;  %v1455_v47 = vpop.xlane.xlu0 %1454 }
 0x375   :  { %v4100_v11 = vrot.slane %v1455_v47, %v5204_v55  ;;  %v4239_v47 = vsel %vm2413_vm11, %v4238_v14, %v4234_v2  ;;  %v4164_v27 = vrot.slane %v8541_v33, %v5190_v41  ;;  %v4160_v41 = vsel %vm2413_vm11, %v4159_v63, %v4155_v8  ;;  %v4424_v58 = vpop.f32.mrf.mxu1 }
 0x376   :  { %v4244_v17 = vsel %vm2420_vm12, %v4243_v22, %v4239_v47 }
 0x377   :  { %v4101_v49 = vsel %vm2441_vm15, %v4100_v11, %v4096_v43  ;;  %v3296_v11 = vsel %vm2420_vm12, %v3295_v20, %v3291_v35 }
 0x378   :  { %v972_v54 = vpop.xlane.xlu1 %971  ;;  %v1545_v45 = vpop.xlane.xlu0 %1544  ;;  %v4270_v40 = vsel %vm8696_vm5, %v4101_v49, %v8695_v44  ;;  %v3301_v0 = vsel %vm2427_vm13, %v3300_v50, %v3296_v11 }
 0x379   :  { %4633 = vmatprep.mubr.f32.mxu0 %v4270_v40  ;;  %v4248_v3 = vrot.slane %v1545_v45, %v5184_v37  ;;  %v3305_v34 = vrot.slane %v972_v54, %v5209_v57  ;;  %v4165_v40 = vsel %vm2420_vm12, %v4164_v27, %v4160_v41 }
 0x37b   :  { %v4249_v49 = vsel %vm2427_vm13, %v4248_v3, %v4244_v17  ;;  %v3306_v42 = vsel %vm2434_vm14, %v3305_v34, %v3301_v0 }
 0x37c   :  { %v1497_v46 = vpop.xlane.xlu1 %1496  ;;  %v1407_v6 = vpop.xlane.xlu0 %1406 }
 0x37d   :  { %v4021_v61 = vrot.slane %v1407_v6, %v5204_v55  ;;  %v4169_v31 = vrot.slane %v1497_v46, %v5184_v37  ;;  %v8702_v46 = vld [vmem:[#allocation5_spill] sm:$0xff] }
 0x37e   :  { %v1940_v6 = vsub.s32 0, %v8702_v46  ;;  %v1944_v52 = vsub.s32 1, %v8702_v46 }
 0x37f   :  { %v4022_v60 = vsel %vm2441_vm15, %v4021_v61, %v4017_v5  ;;  %v4170_v53 = vsel %vm2427_vm13, %v4169_v31, %v4165_v40 }
 0x380   :  { %v975_v36 = vpop.xlane.xlu1 %974  ;;  %v1548_v16 = vpop.xlane.xlu0 %1547  ;;  %v4269_v4 = vsel %vm8698_vm6, %v4022_v60, %v8697_v21 }
 0x381   :  { %4634 = vmatmul.mubr.f32.vlgmr.msra.gmra.mxu0 %v4269_v4  ;;  %v4253_v32 = vrot.slane %v1548_v16, %v5209_v57  ;;  %v3310_v1 = vrot.slane %v975_v36, %v5204_v55 }
 0x383   :  { %v4254_v54 = vsel %vm2434_vm14, %v4253_v32, %v4249_v49  ;;  %v3311_v33 = vsel %vm2441_vm15, %v3310_v1, %v3306_v42 }
 0x384   :  { %v1551_v39 = vpop.xlane.xlu1 %1550  ;;  %v1500_v43 = vpop.xlane.xlu0 %1499 }
 0x385   :  { %v4258_v19 = vrot.slane %v1551_v39, %v5204_v55  ;;  %v4174_v45 = vrot.slane %v1500_v43, %v5209_v57 }
 0x387   :  { %v4259_v44 = vsel %vm2441_vm15, %v4258_v19, %v4254_v54  ;;  %v4175_v57 = vsel %vm2434_vm14, %v4174_v45, %v4170_v53 }
 0x388   :  { %v1503_v28 = vpop.xlane.xlu1 %1502  ;;  %v927_v37 = vpop.xlane.xlu0 %926  ;;  %v4272_v13 = vsel %vm8699_vm7, %v4259_v44, %v3311_v33 }
 0x389   :  { %v4179_v7 = vrot.slane %v1503_v28, %v5204_v55  ;;  %v3231_v48 = vrot.slane %v927_v37, %v5204_v55  ;;  %4704 = vmatprep.mubr.f32.mxu1 %v4272_v13  ;;  %v1936_v55 = vld [vmem:[%s8646_s2] sm:$0x3]  ;;  %s4761_s2 = smov [#allocation2]  }
 0x38a   :  { %v1941_v9 = vrot.slane %v1936_v55, %v1940_v6  ;;  %v1945_v26 = vrot.slane %v1936_v55, %v1944_v52  ;;  %s4729_s30 = sshll.u32 %s4761_s2, 4  ;;  %s4730_s30 = int_to_ptr.vmem [resolvable:$true] %s4729_s30 }
 0x38b   :  { %v4180_v59 = vsel %vm2441_vm15, %v4179_v7, %v4175_v57  ;;  %v3232_v23 = vsel %vm2441_vm15, %v3231_v48, %v8700_v62  ;;  %s4739_s4 = scalar_lea.vmem %s4730_s30, 64  ;;  %p4744_p1 = scmp.lt.s32.totalorder %s4730_s30, %s4730_s30 }
 0x38c   :  { %v4271_v10 = vsel %vm8701_vm8, %v4180_v59, %v3232_v23  ;;  %v4352_v12 = vadd.f32 %v4351_v30, %v1941_v9  ;;  %v4354_v14 = vadd.f32 %v4353_v18, %v1945_v26  ;;  %p4740_p0 = scmp.ne.s32.totalorder %s4730_s30, %s4739_s4  ;;  %p4745_p2 = scmp.lt.s32.totalorder %s4739_s4, %s4739_s4 }
 0x38d   :  { %4705 = vmatmul.mubr.f32.vlgmr.msra.gmra.mxu1 %v4271_v10 }
 0x38e   :  { %v4423_v56 = vadd.f32 %v4422_v29, %v4352_v12  ;;  %v4425_v20 = vadd.f32 %v4424_v58, %v4354_v14  ;;  %p4746_p3 = por %p4745_p2, %p4744_p1 }
 0x390   :  { %p4747_p4 = pnand %p4746_p3, %p4740_p0 }
 0x3a1   :  { %v4493_v61 = vpop.f32.mrf.mxu0 }
 0x3a2   :  { %v4494_v36 = vadd.f32 %v4493_v61, %v4423_v56 }
 0x3a3   :  { %v4495_v5 = vpop.f32.mrf.mxu0 }
 0x3a4   :  { %v4496_v16 = vadd.f32 %v4495_v5, %v4425_v20 }
 0x3ad   :  { %v4564_v24 = vpop.f32.mrf.mxu1 }
 0x3ae   :  { %v4565_v4 = vadd.f32 %v4564_v24, %v4494_v36 }
 0x3af   :  { %v4566_v22 = vpop.f32.mrf.mxu1 }
 0x3b0   :  { %v4567_v15 = vadd.f32 %v4566_v22, %v4496_v16 }
 0x441   :  { %v4635_v60 = vpop.f32.mrf.mxu0 }
 0x442   :  { %v4636_v50 = vadd.f32 %v4635_v60, %v4565_v4 }
 0x443   :  { %v4637_v21 = vpop.f32.mrf.mxu0 }
 0x444   :  { %v4638_v3 = vadd.f32 %v4637_v21, %v4567_v15 }
 0x44d   :  { %v4706_v38 = vpop.f32.mrf.mxu1 }
 0x44e   :  { %v4707_v25 = vadd.f32 %v4706_v38, %v4636_v50 }
 0x44f   :  { %v4708_v2 = vpop.f32.mrf.mxu1 }
 0x450   :  { %v4709_v34 = vadd.f32 %v4708_v2, %v4638_v3 }
 0x452   :  { %v4713_v32 = vcombine.low %v4707_v25, %v4709_v34 }
 0x454   :  { %4737 = vst.sshfl [vmem:[#allocation2] sm:$0x33 pattern:$0x76325410] %v4713_v32 }
 0x455   :  { %4750 = shalt.err (!%p4747_p4)
}
 0x456   :  { %4732 = dma.vmem_to_hbm [thread:$0]  %s4730_s30, 64, %s8647_s3, [#allocation3]  }
 0x457   :  { %4759 = dma.done.wait [#allocation3], 64  }
 0x458   :  { %4760 = vsyncadd [#allocation3], 4294967232 }
 0x459   :  { %4736 = vsyncpa [#allocation3], 1 }

</bundles_post_ra>
